<compile_context>
chip_gen: v6e
topology: v6e:2x2x1
jax: 0.10.0
libtpu: 0.0.40
codegen_flags: <defaults>
</compile_context>

<pallas_src>
import jax
import jax.numpy as jnp
from jax.experimental import pallas as pl
from jax.experimental.pallas import tpu as pltpu

# ---- module-consistent shapes ----------------------------------------------
BATCH = 8
INPUT_DIM = 32
LATENT_DIM = 16
OUTPUT_DIM = 4
BN_EPS = 1e-5
PACK_W = 1024        # lane width of the packed bias/BN buffer
OUT_W = 128          # lane-dense output slab width
N_BIG = 10           # 5 encoder + 5 decoder weight matrices (bf16, manual DMA)

ENC_DIMS = [INPUT_DIM, 1024, 512, 256, 128, LATENT_DIM]
DEC_DIMS = [LATENT_DIM, 128, 256, 512, 1024, INPUT_DIM]
REG_DIMS = [LATENT_DIM, 15, 15, OUTPUT_DIM]


# ---- in-kernel helpers (pure jnp, traced inside the Pallas body) -----------
def _sigmoid(x):
    # 1/(1+exp(-x)) with the reciprocal on the EUP slot.
    return pl.reciprocal(1.0 + jnp.exp(-x), approx=True)


def _elu(x):
    # clamp the exp argument so the discarded positive branch never produces inf
    return jnp.where(x > 0.0, x, jnp.exp(jnp.minimum(x, 0.0)) - 1.0)


def _batchnorm_train(x, gamma, beta):
    # PyTorch BatchNorm1d in (default) training mode: biased batch statistics.
    mean = jnp.mean(x, axis=0, keepdims=True)
    var = jnp.mean((x - mean) ** 2, axis=0, keepdims=True)
    return (x - mean) * jax.lax.rsqrt(var + BN_EPS) * gamma + beta


# ---- the kernel ------------------------------------------------------------
def semi_supervised_kernel(*refs):
    # inputs : x, bias_pack, regw_pack, w_hbm[0..9]
    # outputs: out_slab (BATCH, 128)
    # scratch: w_vmem[0..9], dma_sem
    x_ref, bias_ref, regw_ref = refs[0], refs[1], refs[2]
    w_hbm = refs[3:3 + N_BIG]
    out_ref = refs[3 + N_BIG]
    w_vmem = refs[4 + N_BIG:4 + 2 * N_BIG]
    sem = refs[4 + 2 * N_BIG]

    # Kick off all 10 weight DMAs up front, in use order, so transfers for
    # layers i+1..N overlap compute of layer i.
    copies = []
    for i in range(N_BIG):
        cp = pltpu.make_async_copy(w_hbm[i], w_vmem[i], sem.at[i])
        cp.start()
        copies.append(cp)

    def linear_big(h, i, out_dim):
        copies[i].wait()                           # weight i now resident in VMEM
        w = w_vmem[i][...]                         # bf16 (in, out)
        b = bias_ref[i:i + 1, 0:out_dim]           # f32  (1, out)
        return jnp.dot(h.astype(jnp.bfloat16), w,
                       preferred_element_type=jnp.float32) + b

    x = x_ref[...]

    # ----- encoder: Linear+ReLU x4, then Linear -----
    h = x
    for i in range(5):
        h = linear_big(h, i, ENC_DIMS[i + 1])
        if i < 4:
            h = jnp.maximum(h, 0.0)
    encoded = h  # (B, LATENT_DIM) f32

    # ----- decoder: Linear+ReLU x4, then Linear+Sigmoid -----
    h = encoded
    for i in range(5):
        h = linear_big(h, 5 + i, DEC_DIMS[i + 1])
        h = jnp.maximum(h, 0.0) if i < 4 else _sigmoid(h)
    decoded = h  # (B, INPUT_DIM) f32

    # ----- regressor: Linear->BN->ELU->Linear->BN->Sigmoid->Linear (all f32) -----
    w1 = regw_ref[0:16, 0:15]
    w2 = regw_ref[16:31, 0:15]
    w3 = regw_ref[32:47, 0:4]
    b1 = bias_ref[10:11, 0:15]
    b2 = bias_ref[11:12, 0:15]
    b3 = bias_ref[12:13, 0:4]
    g1, be1 = bias_ref[13:14, 0:15], bias_ref[14:15, 0:15]
    g2, be2 = bias_ref[15:16, 0:15], bias_ref[16:17, 0:15]

    h = jnp.dot(encoded, w1, preferred_element_type=jnp.float32) + b1
    h = _elu(_batchnorm_train(h, g1, be1))
    h = jnp.dot(h, w2, preferred_element_type=jnp.float32) + b2
    h = _sigmoid(_batchnorm_train(h, g2, be2))
    reg = jnp.dot(h, w3, preferred_element_type=jnp.float32) + b3  # (B, OUTPUT_DIM)

    # ----- single lane-dense output slab -----
    out_ref[...] = jnp.zeros((BATCH, OUT_W), jnp.float32)
    out_ref[:, 0:INPUT_DIM] = decoded
    out_ref[:, INPUT_DIM:INPUT_DIM + OUTPUT_DIM] = reg
    # TODO(synk): BatchNorm running_mean/running_var updates (training-mode side
    # effect) are not materialized; only the forward outputs are produced.


# ---- wrapper ---------------------------------------------------------------
def semi_supervised_forward(x, params):
    enc_ws, dec_ws, bias_pack, regw_pack = params
    big_ws = list(enc_ws) + list(dec_ws)           # 10 bf16 matrices, (in, out)

    vmem = pl.BlockSpec(memory_space=pltpu.MemorySpace.VMEM)
    hbm = pl.BlockSpec(memory_space=pl.ANY)

    slab = pl.pallas_call(
        semi_supervised_kernel,
        out_shape=jax.ShapeDtypeStruct((BATCH, OUT_W), jnp.float32),
        in_specs=[vmem, vmem, vmem] + [hbm] * N_BIG,
        out_specs=vmem,
        scratch_shapes=(
            [pltpu.VMEM(w.shape, jnp.bfloat16) for w in big_ws]
            + [pltpu.SemaphoreType.DMA((N_BIG,))]
        ),
        compiler_params=pltpu.CompilerParams(vmem_limit_bytes=24 * 1024 * 1024),
    )(x, bias_pack, regw_pack, *big_ws)

    decoded = slab[:, :INPUT_DIM]
    reg_out = slab[:, INPUT_DIM:INPUT_DIM + OUTPUT_DIM]
    return decoded, reg_out


# ---- deterministic parameter init (matches torch.nn.Linear default bounds) --
def init_params(key):
    keys = jax.random.split(key, 13)

    def linear_init(k, fan_in, fan_out):
        kw, kb = jax.random.split(k)
        bound = 1.0 / (fan_in ** 0.5)
        w = jax.random.uniform(kw, (fan_in, fan_out), jnp.float32, -bound, bound)
        b = jax.random.uniform(kb, (fan_out,), jnp.float32, -bound, bound)
        return w, b

    ki = 0
    enc_ws, dec_ws, biases, reg_ws = [], [], [], []
    for dims, dest in ((ENC_DIMS, enc_ws), (DEC_DIMS, dec_ws)):
        for fan_in, fan_out in zip(dims[:-1], dims[1:]):
            w, b = linear_init(keys[ki], fan_in, fan_out)
            ki += 1
            dest.append(w.astype(jnp.bfloat16))   # big weights stored bf16
            biases.append(b)
    for fan_in, fan_out in zip(REG_DIMS[:-1], REG_DIMS[1:]):
        w, b = linear_init(keys[ki], fan_in, fan_out)
        ki += 1
        reg_ws.append(w)                          # tiny regressor weights stay f32
        biases.append(b)

    # BatchNorm1d(15) x2: gamma=1, beta=0 (PyTorch default init)
    bn_rows = [jnp.ones((15,), jnp.float32), jnp.zeros((15,), jnp.float32),
               jnp.ones((15,), jnp.float32), jnp.zeros((15,), jnp.float32)]

    # pack 13 biases + 4 BN rows into one (17, PACK_W) f32 buffer
    bias_pack = jnp.zeros((17, PACK_W), jnp.float32)
    for i, row in enumerate(biases + bn_rows):
        bias_pack = bias_pack.at[i, :row.shape[0]].set(row)

    # pack the 3 regressor weights into one (48, 16) f32 buffer
    regw_pack = jnp.zeros((48, 16), jnp.float32)
    regw_pack = regw_pack.at[0:16, 0:15].set(reg_ws[0])    # (16, 15)
    regw_pack = regw_pack.at[16:31, 0:15].set(reg_ws[1])   # (15, 15)
    regw_pack = regw_pack.at[32:47, 0:4].set(reg_ws[2])    # (15, 4)

    return enc_ws, dec_ws, bias_pack, regw_pack


if __name__ == "__main__":
    key = jax.random.PRNGKey(0)
    kx, kp = jax.random.split(key)
    x = jax.random.normal(kx, (BATCH, INPUT_DIM), jnp.float32)
    params = init_params(kp)

    decoded, reg_out = semi_supervised_forward(x, params)
    jax.block_until_ready((decoded, reg_out))

    assert decoded.shape == (BATCH, INPUT_DIM)
    assert reg_out.shape == (BATCH, OUTPUT_DIM)
    assert bool(jnp.all(jnp.isfinite(decoded))) and bool(jnp.all(jnp.isfinite(reg_out)))
    # decoder ends in a sigmoid; allow tiny slack for the approx EUP reciprocal
    assert bool(jnp.all((decoded >= 0.0) & (decoded <= 1.0 + 1e-3)))
    print("KERNEL_OK")
</pallas_src>

<mosaic_0001>
module attributes {stable_mosaic.version = 11 : i64} {
  func.func @semi_supervised_kernel(%arg0: memref<8x32xf32, #tpu.memory_space<vmem>>, %arg1: memref<17x1024xf32, #tpu.memory_space<vmem>>, %arg2: memref<48x16xf32, #tpu.memory_space<vmem>>, %arg3: memref<32x1024xbf16, #tpu.memory_space<any>>, %arg4: memref<1024x512xbf16, #tpu.memory_space<any>>, %arg5: memref<512x256xbf16, #tpu.memory_space<any>>, %arg6: memref<256x128xbf16, #tpu.memory_space<any>>, %arg7: memref<128x16xbf16, #tpu.memory_space<any>>, %arg8: memref<16x128xbf16, #tpu.memory_space<any>>, %arg9: memref<128x256xbf16, #tpu.memory_space<any>>, %arg10: memref<256x512xbf16, #tpu.memory_space<any>>, %arg11: memref<512x1024xbf16, #tpu.memory_space<any>>, %arg12: memref<1024x32xbf16, #tpu.memory_space<any>>, %arg13: memref<8x128xf32, #tpu.memory_space<vmem>>, %arg14: memref<32x1024xbf16, #tpu.memory_space<vmem>>, %arg15: memref<1024x512xbf16, #tpu.memory_space<vmem>>, %arg16: memref<512x256xbf16, #tpu.memory_space<vmem>>, %arg17: memref<256x128xbf16, #tpu.memory_space<vmem>>, %arg18: memref<128x16xbf16, #tpu.memory_space<vmem>>, %arg19: memref<16x128xbf16, #tpu.memory_space<vmem>>, %arg20: memref<128x256xbf16, #tpu.memory_space<vmem>>, %arg21: memref<256x512xbf16, #tpu.memory_space<vmem>>, %arg22: memref<512x1024xbf16, #tpu.memory_space<vmem>>, %arg23: memref<1024x32xbf16, #tpu.memory_space<vmem>>, %arg24: memref<10x!tpu.dma_semaphore, #tpu.memory_space<semaphore_mem>>) attributes {dimension_semantics = [], scalar_prefetch = 0 : i64, scratch_operands = 11 : i64, tpu.core_type = #tpu.core_type<tc>} {
    %c0_i32 = arith.constant 0 : i32
    %0 = tpu.memref_slice %arg24[%c0_i32] : memref<10x!tpu.dma_semaphore, #tpu.memory_space<semaphore_mem>> -> memref<1x!tpu.dma_semaphore, #tpu.memory_space<semaphore_mem>>
    %1 = tpu.memref_squeeze %0 : memref<1x!tpu.dma_semaphore, #tpu.memory_space<semaphore_mem>> -> memref<!tpu.dma_semaphore, #tpu.memory_space<semaphore_mem>>
    tpu.enqueue_dma source(%arg3 : memref<32x1024xbf16, #tpu.memory_space<any>>) target(%arg14 : memref<32x1024xbf16, #tpu.memory_space<vmem>>) target_semaphore(%1 : memref<!tpu.dma_semaphore, #tpu.memory_space<semaphore_mem>>)
    %c1_i32 = arith.constant 1 : i32
    %2 = tpu.memref_slice %arg24[%c1_i32] : memref<10x!tpu.dma_semaphore, #tpu.memory_space<semaphore_mem>> -> memref<1x!tpu.dma_semaphore, #tpu.memory_space<semaphore_mem>>
    %3 = tpu.memref_squeeze %2 : memref<1x!tpu.dma_semaphore, #tpu.memory_space<semaphore_mem>> -> memref<!tpu.dma_semaphore, #tpu.memory_space<semaphore_mem>>
    tpu.enqueue_dma source(%arg4 : memref<1024x512xbf16, #tpu.memory_space<any>>) target(%arg15 : memref<1024x512xbf16, #tpu.memory_space<vmem>>) target_semaphore(%3 : memref<!tpu.dma_semaphore, #tpu.memory_space<semaphore_mem>>)
    %c2_i32 = arith.constant 2 : i32
    %4 = tpu.memref_slice %arg24[%c2_i32] : memref<10x!tpu.dma_semaphore, #tpu.memory_space<semaphore_mem>> -> memref<1x!tpu.dma_semaphore, #tpu.memory_space<semaphore_mem>>
    %5 = tpu.memref_squeeze %4 : memref<1x!tpu.dma_semaphore, #tpu.memory_space<semaphore_mem>> -> memref<!tpu.dma_semaphore, #tpu.memory_space<semaphore_mem>>
    tpu.enqueue_dma source(%arg5 : memref<512x256xbf16, #tpu.memory_space<any>>) target(%arg16 : memref<512x256xbf16, #tpu.memory_space<vmem>>) target_semaphore(%5 : memref<!tpu.dma_semaphore, #tpu.memory_space<semaphore_mem>>)
    %c3_i32 = arith.constant 3 : i32
    %6 = tpu.memref_slice %arg24[%c3_i32] : memref<10x!tpu.dma_semaphore, #tpu.memory_space<semaphore_mem>> -> memref<1x!tpu.dma_semaphore, #tpu.memory_space<semaphore_mem>>
    %7 = tpu.memref_squeeze %6 : memref<1x!tpu.dma_semaphore, #tpu.memory_space<semaphore_mem>> -> memref<!tpu.dma_semaphore, #tpu.memory_space<semaphore_mem>>
    tpu.enqueue_dma source(%arg6 : memref<256x128xbf16, #tpu.memory_space<any>>) target(%arg17 : memref<256x128xbf16, #tpu.memory_space<vmem>>) target_semaphore(%7 : memref<!tpu.dma_semaphore, #tpu.memory_space<semaphore_mem>>)
    %c4_i32 = arith.constant 4 : i32
    %8 = tpu.memref_slice %arg24[%c4_i32] : memref<10x!tpu.dma_semaphore, #tpu.memory_space<semaphore_mem>> -> memref<1x!tpu.dma_semaphore, #tpu.memory_space<semaphore_mem>>
    %9 = tpu.memref_squeeze %8 : memref<1x!tpu.dma_semaphore, #tpu.memory_space<semaphore_mem>> -> memref<!tpu.dma_semaphore, #tpu.memory_space<semaphore_mem>>
    tpu.enqueue_dma source(%arg7 : memref<128x16xbf16, #tpu.memory_space<any>>) target(%arg18 : memref<128x16xbf16, #tpu.memory_space<vmem>>) target_semaphore(%9 : memref<!tpu.dma_semaphore, #tpu.memory_space<semaphore_mem>>)
    %c5_i32 = arith.constant 5 : i32
    %10 = tpu.memref_slice %arg24[%c5_i32] : memref<10x!tpu.dma_semaphore, #tpu.memory_space<semaphore_mem>> -> memref<1x!tpu.dma_semaphore, #tpu.memory_space<semaphore_mem>>
    %11 = tpu.memref_squeeze %10 : memref<1x!tpu.dma_semaphore, #tpu.memory_space<semaphore_mem>> -> memref<!tpu.dma_semaphore, #tpu.memory_space<semaphore_mem>>
    tpu.enqueue_dma source(%arg8 : memref<16x128xbf16, #tpu.memory_space<any>>) target(%arg19 : memref<16x128xbf16, #tpu.memory_space<vmem>>) target_semaphore(%11 : memref<!tpu.dma_semaphore, #tpu.memory_space<semaphore_mem>>)
    %c6_i32 = arith.constant 6 : i32
    %12 = tpu.memref_slice %arg24[%c6_i32] : memref<10x!tpu.dma_semaphore, #tpu.memory_space<semaphore_mem>> -> memref<1x!tpu.dma_semaphore, #tpu.memory_space<semaphore_mem>>
    %13 = tpu.memref_squeeze %12 : memref<1x!tpu.dma_semaphore, #tpu.memory_space<semaphore_mem>> -> memref<!tpu.dma_semaphore, #tpu.memory_space<semaphore_mem>>
    tpu.enqueue_dma source(%arg9 : memref<128x256xbf16, #tpu.memory_space<any>>) target(%arg20 : memref<128x256xbf16, #tpu.memory_space<vmem>>) target_semaphore(%13 : memref<!tpu.dma_semaphore, #tpu.memory_space<semaphore_mem>>)
    %c7_i32 = arith.constant 7 : i32
    %14 = tpu.memref_slice %arg24[%c7_i32] : memref<10x!tpu.dma_semaphore, #tpu.memory_space<semaphore_mem>> -> memref<1x!tpu.dma_semaphore, #tpu.memory_space<semaphore_mem>>
    %15 = tpu.memref_squeeze %14 : memref<1x!tpu.dma_semaphore, #tpu.memory_space<semaphore_mem>> -> memref<!tpu.dma_semaphore, #tpu.memory_space<semaphore_mem>>
    tpu.enqueue_dma source(%arg10 : memref<256x512xbf16, #tpu.memory_space<any>>) target(%arg21 : memref<256x512xbf16, #tpu.memory_space<vmem>>) target_semaphore(%15 : memref<!tpu.dma_semaphore, #tpu.memory_space<semaphore_mem>>)
    %c8_i32 = arith.constant 8 : i32
    %16 = tpu.memref_slice %arg24[%c8_i32] : memref<10x!tpu.dma_semaphore, #tpu.memory_space<semaphore_mem>> -> memref<1x!tpu.dma_semaphore, #tpu.memory_space<semaphore_mem>>
    %17 = tpu.memref_squeeze %16 : memref<1x!tpu.dma_semaphore, #tpu.memory_space<semaphore_mem>> -> memref<!tpu.dma_semaphore, #tpu.memory_space<semaphore_mem>>
    tpu.enqueue_dma source(%arg11 : memref<512x1024xbf16, #tpu.memory_space<any>>) target(%arg22 : memref<512x1024xbf16, #tpu.memory_space<vmem>>) target_semaphore(%17 : memref<!tpu.dma_semaphore, #tpu.memory_space<semaphore_mem>>)
    %c9_i32 = arith.constant 9 : i32
    %18 = tpu.memref_slice %arg24[%c9_i32] : memref<10x!tpu.dma_semaphore, #tpu.memory_space<semaphore_mem>> -> memref<1x!tpu.dma_semaphore, #tpu.memory_space<semaphore_mem>>
    %19 = tpu.memref_squeeze %18 : memref<1x!tpu.dma_semaphore, #tpu.memory_space<semaphore_mem>> -> memref<!tpu.dma_semaphore, #tpu.memory_space<semaphore_mem>>
    tpu.enqueue_dma source(%arg12 : memref<1024x32xbf16, #tpu.memory_space<any>>) target(%arg23 : memref<1024x32xbf16, #tpu.memory_space<vmem>>) target_semaphore(%19 : memref<!tpu.dma_semaphore, #tpu.memory_space<semaphore_mem>>)
    %c0 = arith.constant 0 : index
    %c0_0 = arith.constant 0 : index
    %20 = vector.load %arg0[%c0, %c0_0] : memref<8x32xf32, #tpu.memory_space<vmem>>, vector<8x32xf32>
    %c0_i32_1 = arith.constant 0 : i32
    %21 = tpu.memref_slice %arg24[%c0_i32_1] : memref<10x!tpu.dma_semaphore, #tpu.memory_space<semaphore_mem>> -> memref<1x!tpu.dma_semaphore, #tpu.memory_space<semaphore_mem>>
    %22 = tpu.memref_squeeze %21 : memref<1x!tpu.dma_semaphore, #tpu.memory_space<semaphore_mem>> -> memref<!tpu.dma_semaphore, #tpu.memory_space<semaphore_mem>>
    tpu.wait_dma2 semaphore(%22 : memref<!tpu.dma_semaphore, #tpu.memory_space<semaphore_mem>>) src(%arg3 : memref<32x1024xbf16, #tpu.memory_space<any>>) dst(%arg14 : memref<32x1024xbf16, #tpu.memory_space<vmem>>)
    %c0_2 = arith.constant 0 : index
    %c0_3 = arith.constant 0 : index
    %23 = vector.load %arg14[%c0_2, %c0_3] : memref<32x1024xbf16, #tpu.memory_space<vmem>>, vector<32x1024xbf16>
    %c0_4 = arith.constant 0 : index
    %c0_5 = arith.constant 0 : index
    %24 = vector.load %arg1[%c0_4, %c0_5] : memref<17x1024xf32, #tpu.memory_space<vmem>>, vector<1x1024xf32>
    %25 = arith.truncf %20 : vector<8x32xf32> to vector<8x32xbf16>
    %cst = arith.constant dense<0.000000e+00> : vector<8x1024xf32>
    %26 = tpu.matmul %25, %23, %cst {dimension_numbers = #tpu.dot_dimension_numbers<[1], [0], [0], [1], [0, 0, 1, 1], [], []>} : vector<8x32xbf16>, vector<32x1024xbf16>, vector<8x1024xf32> -> vector<8x1024xf32>
    %27 = vector.broadcast %24 : vector<1x1024xf32> to vector<8x1024xf32>
    %28 = arith.addf %26, %27 : vector<8x1024xf32>
    %cst_6 = arith.constant 0.000000e+00 : f32
    %29 = vector.broadcast %cst_6 : f32 to vector<8x1024xf32>
    %30 = arith.maximumf %28, %29 : vector<8x1024xf32>
    %c1_i32_7 = arith.constant 1 : i32
    %31 = tpu.memref_slice %arg24[%c1_i32_7] : memref<10x!tpu.dma_semaphore, #tpu.memory_space<semaphore_mem>> -> memref<1x!tpu.dma_semaphore, #tpu.memory_space<semaphore_mem>>
    %32 = tpu.memref_squeeze %31 : memref<1x!tpu.dma_semaphore, #tpu.memory_space<semaphore_mem>> -> memref<!tpu.dma_semaphore, #tpu.memory_space<semaphore_mem>>
    tpu.wait_dma2 semaphore(%32 : memref<!tpu.dma_semaphore, #tpu.memory_space<semaphore_mem>>) src(%arg4 : memref<1024x512xbf16, #tpu.memory_space<any>>) dst(%arg15 : memref<1024x512xbf16, #tpu.memory_space<vmem>>)
    %c0_8 = arith.constant 0 : index
    %c0_9 = arith.constant 0 : index
    %33 = vector.load %arg15[%c0_8, %c0_9] : memref<1024x512xbf16, #tpu.memory_space<vmem>>, vector<1024x512xbf16>
    %c1 = arith.constant 1 : index
    %c0_10 = arith.constant 0 : index
    %34 = vector.load %arg1[%c1, %c0_10] : memref<17x1024xf32, #tpu.memory_space<vmem>>, vector<1x512xf32>
    %35 = arith.truncf %30 : vector<8x1024xf32> to vector<8x1024xbf16>
    %cst_11 = arith.constant dense<0.000000e+00> : vector<8x512xf32>
    %36 = tpu.matmul %35, %33, %cst_11 {dimension_numbers = #tpu.dot_dimension_numbers<[1], [0], [0], [1], [0, 0, 1, 1], [], []>} : vector<8x1024xbf16>, vector<1024x512xbf16>, vector<8x512xf32> -> vector<8x512xf32>
    %37 = vector.broadcast %34 : vector<1x512xf32> to vector<8x512xf32>
    %38 = arith.addf %36, %37 : vector<8x512xf32>
    %cst_12 = arith.constant 0.000000e+00 : f32
    %39 = vector.broadcast %cst_12 : f32 to vector<8x512xf32>
    %40 = arith.maximumf %38, %39 : vector<8x512xf32>
    %c2_i32_13 = arith.constant 2 : i32
    %41 = tpu.memref_slice %arg24[%c2_i32_13] : memref<10x!tpu.dma_semaphore, #tpu.memory_space<semaphore_mem>> -> memref<1x!tpu.dma_semaphore, #tpu.memory_space<semaphore_mem>>
    %42 = tpu.memref_squeeze %41 : memref<1x!tpu.dma_semaphore, #tpu.memory_space<semaphore_mem>> -> memref<!tpu.dma_semaphore, #tpu.memory_space<semaphore_mem>>
    tpu.wait_dma2 semaphore(%42 : memref<!tpu.dma_semaphore, #tpu.memory_space<semaphore_mem>>) src(%arg5 : memref<512x256xbf16, #tpu.memory_space<any>>) dst(%arg16 : memref<512x256xbf16, #tpu.memory_space<vmem>>)
    %c0_14 = arith.constant 0 : index
    %c0_15 = arith.constant 0 : index
    %43 = vector.load %arg16[%c0_14, %c0_15] : memref<512x256xbf16, #tpu.memory_space<vmem>>, vector<512x256xbf16>
    %c2 = arith.constant 2 : index
    %c0_16 = arith.constant 0 : index
    %44 = vector.load %arg1[%c2, %c0_16] : memref<17x1024xf32, #tpu.memory_space<vmem>>, vector<1x256xf32>
    %45 = arith.truncf %40 : vector<8x512xf32> to vector<8x512xbf16>
    %cst_17 = arith.constant dense<0.000000e+00> : vector<8x256xf32>
    %46 = tpu.matmul %45, %43, %cst_17 {dimension_numbers = #tpu.dot_dimension_numbers<[1], [0], [0], [1], [0, 0, 1, 1], [], []>} : vector<8x512xbf16>, vector<512x256xbf16>, vector<8x256xf32> -> vector<8x256xf32>
    %47 = vector.broadcast %44 : vector<1x256xf32> to vector<8x256xf32>
    %48 = arith.addf %46, %47 : vector<8x256xf32>
    %cst_18 = arith.constant 0.000000e+00 : f32
    %49 = vector.broadcast %cst_18 : f32 to vector<8x256xf32>
    %50 = arith.maximumf %48, %49 : vector<8x256xf32>
    %c3_i32_19 = arith.constant 3 : i32
    %51 = tpu.memref_slice %arg24[%c3_i32_19] : memref<10x!tpu.dma_semaphore, #tpu.memory_space<semaphore_mem>> -> memref<1x!tpu.dma_semaphore, #tpu.memory_space<semaphore_mem>>
    %52 = tpu.memref_squeeze %51 : memref<1x!tpu.dma_semaphore, #tpu.memory_space<semaphore_mem>> -> memref<!tpu.dma_semaphore, #tpu.memory_space<semaphore_mem>>
    tpu.wait_dma2 semaphore(%52 : memref<!tpu.dma_semaphore, #tpu.memory_space<semaphore_mem>>) src(%arg6 : memref<256x128xbf16, #tpu.memory_space<any>>) dst(%arg17 : memref<256x128xbf16, #tpu.memory_space<vmem>>)
    %c0_20 = arith.constant 0 : index
    %c0_21 = arith.constant 0 : index
    %53 = vector.load %arg17[%c0_20, %c0_21] : memref<256x128xbf16, #tpu.memory_space<vmem>>, vector<256x128xbf16>
    %c3 = arith.constant 3 : index
    %c0_22 = arith.constant 0 : index
    %54 = vector.load %arg1[%c3, %c0_22] : memref<17x1024xf32, #tpu.memory_space<vmem>>, vector<1x128xf32>
    %55 = arith.truncf %50 : vector<8x256xf32> to vector<8x256xbf16>
    %cst_23 = arith.constant dense<0.000000e+00> : vector<8x128xf32>
    %56 = tpu.matmul %55, %53, %cst_23 {dimension_numbers = #tpu.dot_dimension_numbers<[1], [0], [0], [1], [0, 0, 1, 1], [], []>} : vector<8x256xbf16>, vector<256x128xbf16>, vector<8x128xf32> -> vector<8x128xf32>
    %57 = vector.broadcast %54 : vector<1x128xf32> to vector<8x128xf32>
    %58 = arith.addf %56, %57 : vector<8x128xf32>
    %cst_24 = arith.constant 0.000000e+00 : f32
    %59 = vector.broadcast %cst_24 : f32 to vector<8x128xf32>
    %60 = arith.maximumf %58, %59 : vector<8x128xf32>
    %c4_i32_25 = arith.constant 4 : i32
    %61 = tpu.memref_slice %arg24[%c4_i32_25] : memref<10x!tpu.dma_semaphore, #tpu.memory_space<semaphore_mem>> -> memref<1x!tpu.dma_semaphore, #tpu.memory_space<semaphore_mem>>
    %62 = tpu.memref_squeeze %61 : memref<1x!tpu.dma_semaphore, #tpu.memory_space<semaphore_mem>> -> memref<!tpu.dma_semaphore, #tpu.memory_space<semaphore_mem>>
    tpu.wait_dma2 semaphore(%62 : memref<!tpu.dma_semaphore, #tpu.memory_space<semaphore_mem>>) src(%arg7 : memref<128x16xbf16, #tpu.memory_space<any>>) dst(%arg18 : memref<128x16xbf16, #tpu.memory_space<vmem>>)
    %c0_26 = arith.constant 0 : index
    %c0_27 = arith.constant 0 : index
    %63 = vector.load %arg18[%c0_26, %c0_27] : memref<128x16xbf16, #tpu.memory_space<vmem>>, vector<128x16xbf16>
    %c4 = arith.constant 4 : index
    %c0_28 = arith.constant 0 : index
    %64 = vector.load %arg1[%c4, %c0_28] : memref<17x1024xf32, #tpu.memory_space<vmem>>, vector<1x16xf32>
    %65 = arith.truncf %60 : vector<8x128xf32> to vector<8x128xbf16>
    %cst_29 = arith.constant dense<0.000000e+00> : vector<8x16xf32>
    %66 = tpu.matmul %65, %63, %cst_29 {dimension_numbers = #tpu.dot_dimension_numbers<[1], [0], [0], [1], [0, 0, 1, 1], [], []>} : vector<8x128xbf16>, vector<128x16xbf16>, vector<8x16xf32> -> vector<8x16xf32>
    %67 = vector.broadcast %64 : vector<1x16xf32> to vector<8x16xf32>
    %68 = arith.addf %66, %67 : vector<8x16xf32>
    %c5_i32_30 = arith.constant 5 : i32
    %69 = tpu.memref_slice %arg24[%c5_i32_30] : memref<10x!tpu.dma_semaphore, #tpu.memory_space<semaphore_mem>> -> memref<1x!tpu.dma_semaphore, #tpu.memory_space<semaphore_mem>>
    %70 = tpu.memref_squeeze %69 : memref<1x!tpu.dma_semaphore, #tpu.memory_space<semaphore_mem>> -> memref<!tpu.dma_semaphore, #tpu.memory_space<semaphore_mem>>
    tpu.wait_dma2 semaphore(%70 : memref<!tpu.dma_semaphore, #tpu.memory_space<semaphore_mem>>) src(%arg8 : memref<16x128xbf16, #tpu.memory_space<any>>) dst(%arg19 : memref<16x128xbf16, #tpu.memory_space<vmem>>)
    %c0_31 = arith.constant 0 : index
    %c0_32 = arith.constant 0 : index
    %71 = vector.load %arg19[%c0_31, %c0_32] : memref<16x128xbf16, #tpu.memory_space<vmem>>, vector<16x128xbf16>
    %c5 = arith.constant 5 : index
    %c0_33 = arith.constant 0 : index
    %72 = vector.load %arg1[%c5, %c0_33] : memref<17x1024xf32, #tpu.memory_space<vmem>>, vector<1x128xf32>
    %73 = arith.truncf %68 : vector<8x16xf32> to vector<8x16xbf16>
    %cst_34 = arith.constant dense<0.000000e+00> : vector<8x128xf32>
    %74 = tpu.matmul %73, %71, %cst_34 {dimension_numbers = #tpu.dot_dimension_numbers<[1], [0], [0], [1], [0, 0, 1, 1], [], []>} : vector<8x16xbf16>, vector<16x128xbf16>, vector<8x128xf32> -> vector<8x128xf32>
    %75 = vector.broadcast %72 : vector<1x128xf32> to vector<8x128xf32>
    %76 = arith.addf %74, %75 : vector<8x128xf32>
    %cst_35 = arith.constant 0.000000e+00 : f32
    %77 = vector.broadcast %cst_35 : f32 to vector<8x128xf32>
    %78 = arith.maximumf %76, %77 : vector<8x128xf32>
    %c6_i32_36 = arith.constant 6 : i32
    %79 = tpu.memref_slice %arg24[%c6_i32_36] : memref<10x!tpu.dma_semaphore, #tpu.memory_space<semaphore_mem>> -> memref<1x!tpu.dma_semaphore, #tpu.memory_space<semaphore_mem>>
    %80 = tpu.memref_squeeze %79 : memref<1x!tpu.dma_semaphore, #tpu.memory_space<semaphore_mem>> -> memref<!tpu.dma_semaphore, #tpu.memory_space<semaphore_mem>>
    tpu.wait_dma2 semaphore(%80 : memref<!tpu.dma_semaphore, #tpu.memory_space<semaphore_mem>>) src(%arg9 : memref<128x256xbf16, #tpu.memory_space<any>>) dst(%arg20 : memref<128x256xbf16, #tpu.memory_space<vmem>>)
    %c0_37 = arith.constant 0 : index
    %c0_38 = arith.constant 0 : index
    %81 = vector.load %arg20[%c0_37, %c0_38] : memref<128x256xbf16, #tpu.memory_space<vmem>>, vector<128x256xbf16>
    %c6 = arith.constant 6 : index
    %c0_39 = arith.constant 0 : index
    %82 = vector.load %arg1[%c6, %c0_39] : memref<17x1024xf32, #tpu.memory_space<vmem>>, vector<1x256xf32>
    %83 = arith.truncf %78 : vector<8x128xf32> to vector<8x128xbf16>
    %cst_40 = arith.constant dense<0.000000e+00> : vector<8x256xf32>
    %84 = tpu.matmul %83, %81, %cst_40 {dimension_numbers = #tpu.dot_dimension_numbers<[1], [0], [0], [1], [0, 0, 1, 1], [], []>} : vector<8x128xbf16>, vector<128x256xbf16>, vector<8x256xf32> -> vector<8x256xf32>
    %85 = vector.broadcast %82 : vector<1x256xf32> to vector<8x256xf32>
    %86 = arith.addf %84, %85 : vector<8x256xf32>
    %cst_41 = arith.constant 0.000000e+00 : f32
    %87 = vector.broadcast %cst_41 : f32 to vector<8x256xf32>
    %88 = arith.maximumf %86, %87 : vector<8x256xf32>
    %c7_i32_42 = arith.constant 7 : i32
    %89 = tpu.memref_slice %arg24[%c7_i32_42] : memref<10x!tpu.dma_semaphore, #tpu.memory_space<semaphore_mem>> -> memref<1x!tpu.dma_semaphore, #tpu.memory_space<semaphore_mem>>
    %90 = tpu.memref_squeeze %89 : memref<1x!tpu.dma_semaphore, #tpu.memory_space<semaphore_mem>> -> memref<!tpu.dma_semaphore, #tpu.memory_space<semaphore_mem>>
    tpu.wait_dma2 semaphore(%90 : memref<!tpu.dma_semaphore, #tpu.memory_space<semaphore_mem>>) src(%arg10 : memref<256x512xbf16, #tpu.memory_space<any>>) dst(%arg21 : memref<256x512xbf16, #tpu.memory_space<vmem>>)
    %c0_43 = arith.constant 0 : index
    %c0_44 = arith.constant 0 : index
    %91 = vector.load %arg21[%c0_43, %c0_44] : memref<256x512xbf16, #tpu.memory_space<vmem>>, vector<256x512xbf16>
    %c7 = arith.constant 7 : index
    %c0_45 = arith.constant 0 : index
    %92 = vector.load %arg1[%c7, %c0_45] : memref<17x1024xf32, #tpu.memory_space<vmem>>, vector<1x512xf32>
    %93 = arith.truncf %88 : vector<8x256xf32> to vector<8x256xbf16>
    %cst_46 = arith.constant dense<0.000000e+00> : vector<8x512xf32>
    %94 = tpu.matmul %93, %91, %cst_46 {dimension_numbers = #tpu.dot_dimension_numbers<[1], [0], [0], [1], [0, 0, 1, 1], [], []>} : vector<8x256xbf16>, vector<256x512xbf16>, vector<8x512xf32> -> vector<8x512xf32>
    %95 = vector.broadcast %92 : vector<1x512xf32> to vector<8x512xf32>
    %96 = arith.addf %94, %95 : vector<8x512xf32>
    %cst_47 = arith.constant 0.000000e+00 : f32
    %97 = vector.broadcast %cst_47 : f32 to vector<8x512xf32>
    %98 = arith.maximumf %96, %97 : vector<8x512xf32>
    %c8_i32_48 = arith.constant 8 : i32
    %99 = tpu.memref_slice %arg24[%c8_i32_48] : memref<10x!tpu.dma_semaphore, #tpu.memory_space<semaphore_mem>> -> memref<1x!tpu.dma_semaphore, #tpu.memory_space<semaphore_mem>>
    %100 = tpu.memref_squeeze %99 : memref<1x!tpu.dma_semaphore, #tpu.memory_space<semaphore_mem>> -> memref<!tpu.dma_semaphore, #tpu.memory_space<semaphore_mem>>
    tpu.wait_dma2 semaphore(%100 : memref<!tpu.dma_semaphore, #tpu.memory_space<semaphore_mem>>) src(%arg11 : memref<512x1024xbf16, #tpu.memory_space<any>>) dst(%arg22 : memref<512x1024xbf16, #tpu.memory_space<vmem>>)
    %c0_49 = arith.constant 0 : index
    %c0_50 = arith.constant 0 : index
    %101 = vector.load %arg22[%c0_49, %c0_50] : memref<512x1024xbf16, #tpu.memory_space<vmem>>, vector<512x1024xbf16>
    %c8 = arith.constant 8 : index
    %c0_51 = arith.constant 0 : index
    %102 = vector.load %arg1[%c8, %c0_51] : memref<17x1024xf32, #tpu.memory_space<vmem>>, vector<1x1024xf32>
    %103 = arith.truncf %98 : vector<8x512xf32> to vector<8x512xbf16>
    %cst_52 = arith.constant dense<0.000000e+00> : vector<8x1024xf32>
    %104 = tpu.matmul %103, %101, %cst_52 {dimension_numbers = #tpu.dot_dimension_numbers<[1], [0], [0], [1], [0, 0, 1, 1], [], []>} : vector<8x512xbf16>, vector<512x1024xbf16>, vector<8x1024xf32> -> vector<8x1024xf32>
    %105 = vector.broadcast %102 : vector<1x1024xf32> to vector<8x1024xf32>
    %106 = arith.addf %104, %105 : vector<8x1024xf32>
    %cst_53 = arith.constant 0.000000e+00 : f32
    %107 = vector.broadcast %cst_53 : f32 to vector<8x1024xf32>
    %108 = arith.maximumf %106, %107 : vector<8x1024xf32>
    %c9_i32_54 = arith.constant 9 : i32
    %109 = tpu.memref_slice %arg24[%c9_i32_54] : memref<10x!tpu.dma_semaphore, #tpu.memory_space<semaphore_mem>> -> memref<1x!tpu.dma_semaphore, #tpu.memory_space<semaphore_mem>>
    %110 = tpu.memref_squeeze %109 : memref<1x!tpu.dma_semaphore, #tpu.memory_space<semaphore_mem>> -> memref<!tpu.dma_semaphore, #tpu.memory_space<semaphore_mem>>
    tpu.wait_dma2 semaphore(%110 : memref<!tpu.dma_semaphore, #tpu.memory_space<semaphore_mem>>) src(%arg12 : memref<1024x32xbf16, #tpu.memory_space<any>>) dst(%arg23 : memref<1024x32xbf16, #tpu.memory_space<vmem>>)
    %c0_55 = arith.constant 0 : index
    %c0_56 = arith.constant 0 : index
    %111 = vector.load %arg23[%c0_55, %c0_56] : memref<1024x32xbf16, #tpu.memory_space<vmem>>, vector<1024x32xbf16>
    %c9 = arith.constant 9 : index
    %c0_57 = arith.constant 0 : index
    %112 = vector.load %arg1[%c9, %c0_57] : memref<17x1024xf32, #tpu.memory_space<vmem>>, vector<1x32xf32>
    %113 = arith.truncf %108 : vector<8x1024xf32> to vector<8x1024xbf16>
    %cst_58 = arith.constant dense<0.000000e+00> : vector<8x32xf32>
    %114 = tpu.matmul %113, %111, %cst_58 {dimension_numbers = #tpu.dot_dimension_numbers<[1], [0], [0], [1], [0, 0, 1, 1], [], []>} : vector<8x1024xbf16>, vector<1024x32xbf16>, vector<8x32xf32> -> vector<8x32xf32>
    %115 = vector.broadcast %112 : vector<1x32xf32> to vector<8x32xf32>
    %116 = arith.addf %114, %115 : vector<8x32xf32>
    %cst_59 = arith.constant 0.000000e+00 : f32
    %117 = vector.broadcast %cst_59 : f32 to vector<8x32xf32>
    %118 = arith.subf %117, %116 : vector<8x32xf32>
    %119 = math.exp %118 : vector<8x32xf32>
    %cst_60 = arith.constant 1.000000e+00 : f32
    %120 = vector.broadcast %cst_60 : f32 to vector<8x32xf32>
    %121 = arith.addf %120, %119 : vector<8x32xf32>
    %122 = tpu.reciprocal %121 {approx = true} : vector<8x32xf32> -> vector<8x32xf32>
    %c0_61 = arith.constant 0 : index
    %c0_62 = arith.constant 0 : index
    %123 = vector.load %arg2[%c0_61, %c0_62] : memref<48x16xf32, #tpu.memory_space<vmem>>, vector<16x15xf32>
    %c16 = arith.constant 16 : index
    %c0_63 = arith.constant 0 : index
    %124 = vector.load %arg2[%c16, %c0_63] : memref<48x16xf32, #tpu.memory_space<vmem>>, vector<15x15xf32>
    %c32 = arith.constant 32 : index
    %c0_64 = arith.constant 0 : index
    %125 = vector.load %arg2[%c32, %c0_64] : memref<48x16xf32, #tpu.memory_space<vmem>>, vector<15x4xf32>
    %c10 = arith.constant 10 : index
    %c0_65 = arith.constant 0 : index
    %126 = vector.load %arg1[%c10, %c0_65] : memref<17x1024xf32, #tpu.memory_space<vmem>>, vector<1x15xf32>
    %c11 = arith.constant 11 : index
    %c0_66 = arith.constant 0 : index
    %127 = vector.load %arg1[%c11, %c0_66] : memref<17x1024xf32, #tpu.memory_space<vmem>>, vector<1x15xf32>
    %c12 = arith.constant 12 : index
    %c0_67 = arith.constant 0 : index
    %128 = vector.load %arg1[%c12, %c0_67] : memref<17x1024xf32, #tpu.memory_space<vmem>>, vector<1x4xf32>
    %c13 = arith.constant 13 : index
    %c0_68 = arith.constant 0 : index
    %129 = vector.load %arg1[%c13, %c0_68] : memref<17x1024xf32, #tpu.memory_space<vmem>>, vector<1x15xf32>
    %c14 = arith.constant 14 : index
    %c0_69 = arith.constant 0 : index
    %130 = vector.load %arg1[%c14, %c0_69] : memref<17x1024xf32, #tpu.memory_space<vmem>>, vector<1x15xf32>
    %c15 = arith.constant 15 : index
    %c0_70 = arith.constant 0 : index
    %131 = vector.load %arg1[%c15, %c0_70] : memref<17x1024xf32, #tpu.memory_space<vmem>>, vector<1x15xf32>
    %c16_71 = arith.constant 16 : index
    %c0_72 = arith.constant 0 : index
    %132 = vector.load %arg1[%c16_71, %c0_72] : memref<17x1024xf32, #tpu.memory_space<vmem>>, vector<1x15xf32>
    %cst_73 = arith.constant dense<0.000000e+00> : vector<8x15xf32>
    %133 = tpu.matmul %68, %123, %cst_73 {dimension_numbers = #tpu.dot_dimension_numbers<[1], [0], [0], [1], [0, 0, 1, 1], [], []>} : vector<8x16xf32>, vector<16x15xf32>, vector<8x15xf32> -> vector<8x15xf32>
    %134 = vector.broadcast %126 : vector<1x15xf32> to vector<8x15xf32>
    %135 = arith.addf %133, %134 : vector<8x15xf32>
    %cst_74 = arith.constant dense<0.000000e+00> : vector<15xf32>
    %136 = vector.multi_reduction <add>, %135, %cst_74 [0] : vector<8x15xf32> to vector<15xf32>
    %137 = vector.shape_cast %136 : vector<15xf32> to vector<1x15xf32>
    %cst_75 = arith.constant 8.000000e+00 : f32
    %138 = vector.broadcast %cst_75 : f32 to vector<1x15xf32>
    %139 = arith.divf %137, %138 : vector<1x15xf32>
    %140 = vector.broadcast %139 : vector<1x15xf32> to vector<8x15xf32>
    %141 = arith.subf %135, %140 : vector<8x15xf32>
    %142 = arith.mulf %141, %141 : vector<8x15xf32>
    %cst_76 = arith.constant dense<0.000000e+00> : vector<15xf32>
    %143 = vector.multi_reduction <add>, %142, %cst_76 [0] : vector<8x15xf32> to vector<15xf32>
    %144 = vector.shape_cast %143 : vector<15xf32> to vector<1x15xf32>
    %cst_77 = arith.constant 8.000000e+00 : f32
    %145 = vector.broadcast %cst_77 : f32 to vector<1x15xf32>
    %146 = arith.divf %144, %145 : vector<1x15xf32>
    %147 = vector.broadcast %139 : vector<1x15xf32> to vector<8x15xf32>
    %148 = arith.subf %135, %147 : vector<8x15xf32>
    %cst_78 = arith.constant 9.99999974E-6 : f32
    %149 = vector.broadcast %cst_78 : f32 to vector<1x15xf32>
    %150 = arith.addf %146, %149 : vector<1x15xf32>
    %151 = math.rsqrt %150 : vector<1x15xf32>
    %152 = vector.broadcast %151 : vector<1x15xf32> to vector<8x15xf32>
    %153 = arith.mulf %148, %152 : vector<8x15xf32>
    %154 = vector.broadcast %129 : vector<1x15xf32> to vector<8x15xf32>
    %155 = arith.mulf %153, %154 : vector<8x15xf32>
    %156 = vector.broadcast %130 : vector<1x15xf32> to vector<8x15xf32>
    %157 = arith.addf %155, %156 : vector<8x15xf32>
    %cst_79 = arith.constant 0.000000e+00 : f32
    %158 = vector.broadcast %cst_79 : f32 to vector<8x15xf32>
    %159 = arith.cmpf ogt, %157, %158 : vector<8x15xf32>
    %cst_80 = arith.constant 0.000000e+00 : f32
    %160 = vector.broadcast %cst_80 : f32 to vector<8x15xf32>
    %161 = arith.minimumf %157, %160 : vector<8x15xf32>
    %162 = math.exp %161 : vector<8x15xf32>
    %cst_81 = arith.constant 1.000000e+00 : f32
    %163 = vector.broadcast %cst_81 : f32 to vector<8x15xf32>
    %164 = arith.subf %162, %163 : vector<8x15xf32>
    %165 = arith.select %159, %157, %164 : vector<8x15xi1>, vector<8x15xf32>
    %cst_82 = arith.constant dense<0.000000e+00> : vector<8x15xf32>
    %166 = tpu.matmul %165, %124, %cst_82 {dimension_numbers = #tpu.dot_dimension_numbers<[1], [0], [0], [1], [0, 0, 1, 1], [], []>} : vector<8x15xf32>, vector<15x15xf32>, vector<8x15xf32> -> vector<8x15xf32>
    %167 = vector.broadcast %127 : vector<1x15xf32> to vector<8x15xf32>
    %168 = arith.addf %166, %167 : vector<8x15xf32>
    %cst_83 = arith.constant dense<0.000000e+00> : vector<15xf32>
    %169 = vector.multi_reduction <add>, %168, %cst_83 [0] : vector<8x15xf32> to vector<15xf32>
    %170 = vector.shape_cast %169 : vector<15xf32> to vector<1x15xf32>
    %cst_84 = arith.constant 8.000000e+00 : f32
    %171 = vector.broadcast %cst_84 : f32 to vector<1x15xf32>
    %172 = arith.divf %170, %171 : vector<1x15xf32>
    %173 = vector.broadcast %172 : vector<1x15xf32> to vector<8x15xf32>
    %174 = arith.subf %168, %173 : vector<8x15xf32>
    %175 = arith.mulf %174, %174 : vector<8x15xf32>
    %cst_85 = arith.constant dense<0.000000e+00> : vector<15xf32>
    %176 = vector.multi_reduction <add>, %175, %cst_85 [0] : vector<8x15xf32> to vector<15xf32>
    %177 = vector.shape_cast %176 : vector<15xf32> to vector<1x15xf32>
    %cst_86 = arith.constant 8.000000e+00 : f32
    %178 = vector.broadcast %cst_86 : f32 to vector<1x15xf32>
    %179 = arith.divf %177, %178 : vector<1x15xf32>
    %180 = vector.broadcast %172 : vector<1x15xf32> to vector<8x15xf32>
    %181 = arith.subf %168, %180 : vector<8x15xf32>
    %cst_87 = arith.constant 9.99999974E-6 : f32
    %182 = vector.broadcast %cst_87 : f32 to vector<1x15xf32>
    %183 = arith.addf %179, %182 : vector<1x15xf32>
    %184 = math.rsqrt %183 : vector<1x15xf32>
    %185 = vector.broadcast %184 : vector<1x15xf32> to vector<8x15xf32>
    %186 = arith.mulf %181, %185 : vector<8x15xf32>
    %187 = vector.broadcast %131 : vector<1x15xf32> to vector<8x15xf32>
    %188 = arith.mulf %186, %187 : vector<8x15xf32>
    %189 = vector.broadcast %132 : vector<1x15xf32> to vector<8x15xf32>
    %190 = arith.addf %188, %189 : vector<8x15xf32>
    %cst_88 = arith.constant 0.000000e+00 : f32
    %191 = vector.broadcast %cst_88 : f32 to vector<8x15xf32>
    %192 = arith.subf %191, %190 : vector<8x15xf32>
    %193 = math.exp %192 : vector<8x15xf32>
    %cst_89 = arith.constant 1.000000e+00 : f32
    %194 = vector.broadcast %cst_89 : f32 to vector<8x15xf32>
    %195 = arith.addf %194, %193 : vector<8x15xf32>
    %196 = tpu.reciprocal %195 {approx = true} : vector<8x15xf32> -> vector<8x15xf32>
    %cst_90 = arith.constant dense<0.000000e+00> : vector<8x4xf32>
    %197 = tpu.matmul %196, %125, %cst_90 {dimension_numbers = #tpu.dot_dimension_numbers<[1], [0], [0], [1], [0, 0, 1, 1], [], []>} : vector<8x15xf32>, vector<15x4xf32>, vector<8x4xf32> -> vector<8x4xf32>
    %198 = vector.broadcast %128 : vector<1x4xf32> to vector<8x4xf32>
    %199 = arith.addf %197, %198 : vector<8x4xf32>
    %cst_91 = arith.constant 0.000000e+00 : f32
    %200 = vector.broadcast %cst_91 : f32 to vector<8x128xf32>
    %c0_92 = arith.constant 0 : index
    %c0_93 = arith.constant 0 : index
    %201 = vector.load %arg13[%c0_92, %c0_93] : memref<8x128xf32, #tpu.memory_space<vmem>>, vector<8x128xf32>
    tpu.vector_store %arg13[%c0_92, %c0_93], %200 {strides = array<i32>} : memref<8x128xf32, #tpu.memory_space<vmem>>, vector<8x128xf32>,
    %c0_94 = arith.constant 0 : index
    %c0_95 = arith.constant 0 : index
    %202 = vector.load %arg13[%c0_94, %c0_95] : memref<8x128xf32, #tpu.memory_space<vmem>>, vector<8x32xf32>
    tpu.vector_store %arg13[%c0_94, %c0_95], %122 {strides = array<i32>} : memref<8x128xf32, #tpu.memory_space<vmem>>, vector<8x32xf32>,
    %c0_96 = arith.constant 0 : index
    %c32_97 = arith.constant 32 : index
    %203 = vector.load %arg13[%c0_96, %c32_97] : memref<8x128xf32, #tpu.memory_space<vmem>>, vector<8x4xf32>
    tpu.vector_store %arg13[%c0_96, %c32_97], %199 {strides = array<i32>} : memref<8x128xf32, #tpu.memory_space<vmem>>, vector<8x4xf32>,
    return
  }
}

</mosaic_0001>

<bundles_post_ra>
// kernel: tpu_custom_call.1
= control target key start
LH: loop header
LB: loop body
LE: loop exit
PB: predicated region body
PF: predicated region fallthrough
CT: control target
= control target key end

     0   :  { %18 = vsyncpa [#allocation14], 0  ;;  %s9031_s29 = smov [#allocation2]   ;;  %s9032_s14 = smov [#allocation3]   ;;  %s10147_s0 = inlined_call_operand.vmem [shape: f32[8,32], index: 0, kind: input, shape index: {}]   ;;  %s10148_s1 = inlined_call_operand.vmem [shape: f32[17,1024], index: 1, kind: input, shape index: {}]   ;;  %s10149_s2 = inlined_call_operand.vmem [shape: f32[48,16], index: 2, kind: input, shape index: {}]   ;;  %s10150_s3 = inlined_call_operand.hbm [shape: bf16[32,1024], index: 3, kind: input, shape index: {}]   ;;  %s10151_s4 = inlined_call_operand.hbm [shape: bf16[1024,512], index: 4, kind: input, shape index: {}]   ;;  %s10152_s5 = inlined_call_operand.vmem [shape: bf16[512,256], index: 5, kind: input, shape index: {}]   ;;  %s10153_s6 = inlined_call_operand.hbm [shape: bf16[256,128], index: 6, kind: input, shape index: {}]   ;;  %s10154_s7 = inlined_call_operand.vmem [shape: bf16[128,16], index: 7, kind: input, shape index: {}]   ;;  %s10155_s8 = inlined_call_operand.vmem [shape: bf16[16,128], index: 8, kind: input, shape index: {}]   ;;  %s10156_s9 = inlined_call_operand.hbm [shape: bf16[128,256], index: 9, kind: input, shape index: {}]   ;;  %s10157_s10 = inlined_call_operand.hbm [shape: bf16[256,512], index: 10, kind: input, shape index: {}]   ;;  %s10158_s11 = inlined_call_operand.hbm [shape: bf16[512,1024], index: 11, kind: input, shape index: {}]   ;;  %s10159_s12 = inlined_call_operand.vmem [shape: bf16[1024,32], index: 12, kind: input, shape index: {}]   ;;  %s10160_s13 = inlined_call_operand.hbm [shape: f32[8,128], index: 13, kind: output, shape index: {}]  }
   0x1   :  { %v9115_v0 = vld [vmem:[%s10152_s5] sm:$0xff]  ;;  %v9120_v1 = vld [vmem:[%s10152_s5 + $0x8] sm:$0xff]  ;;  %s33_s30 = sshll.u32 %s9031_s29, 4  ;;  %s45_s15 = sshll.u32 %s9032_s14, 4  ;;  %v9125_v2 = vld [vmem:[%s10152_s5 + $0x10] sm:$0xff]  ;;  %s34_s30 = int_to_ptr.vmem [resolvable:$true] %s33_s30  ;;  %s46_s15 = int_to_ptr.vmem [resolvable:$true] %s45_s15 }
   0x2   :  { %v9130_v3 = vld [vmem:[%s10152_s5 + $0x18] sm:$0xff]  ;;  %v9135_v4 = vld [vmem:[%s10152_s5 + $0x20] sm:$0xff]  ;;  %v9140_v5 = vld [vmem:[%s10152_s5 + $0x28] sm:$0xff]  ;;  %s8877_s28 = scalar_lea.vmem %s34_s30, 2048  ;;  %p8882_p1 = scmp.lt.s32.totalorder %s34_s30, %s34_s30 }
   0x3   :  { %v9145_v6 = vld [vmem:[%s10152_s5 + $0x30] sm:$0xff]  ;;  %v9150_v7 = vld [vmem:[%s10152_s5 + $0x38] sm:$0xff]  ;;  %p8878_p0 = scmp.ne.s32.totalorder %s34_s30, %s8877_s28  ;;  %p8883_p2 = scmp.lt.s32.totalorder %s8877_s28, %s8877_s28 }
   0x5   :  { %p8884_p3 = por %p8883_p2, %p8882_p1 }
   0x7   :  { %p8885_p4 = pnand %p8884_p3, %p8878_p0 }
   0x9   :  { %8888 = shalt.err (!%p8885_p4)  }
   0xa   :  { %36 = dma.hbm_to_vmem [thread:$0]  %s10150_s3, 2048, %s34_s30, [#allocation12]  ;;  %v9158_v8 = vld [vmem:[%s10152_s5 + $0x40] sm:$0xff]  ;;  %v9163_v9 = vld [vmem:[%s10152_s5 + $0x48] sm:$0xff]  ;;  %v9168_v10 = vld [vmem:[%s10152_s5 + $0x50] sm:$0xff] }
   0xb   :  { %s8897_s22 = scalar_lea.vmem %s46_s15, 32768  ;;  %p8902_p6 = scmp.lt.s32.totalorder %s46_s15, %s46_s15 }
   0xc   :  { %p8898_p5 = scmp.ne.s32.totalorder %s46_s15, %s8897_s22  ;;  %p8903_p7 = scmp.lt.s32.totalorder %s8897_s22, %s8897_s22 }
   0xe   :  { %p8904_p8 = por %p8903_p7, %p8902_p6 }
  0x10   :  { %p8905_p9 = pnand %p8904_p8, %p8898_p5 }
  0x12   :  { %8908 = shalt.err (!%p8905_p9)  }
  0x13   :  { %48 = dma.hbm_to_vmem [thread:$0]  %s10151_s4, 32768, %s46_s15, [#allocation12 + $0x1]  ;;  %v9176_v11 = vld [vmem:[%s10152_s5 + $0x58] sm:$0xff]  ;;  %v9181_v12 = vld [vmem:[%s10152_s5 + $0x60] sm:$0xff]  ;;  %v9186_v13 = vld [vmem:[%s10152_s5 + $0x68] sm:$0xff] }
  0x14   :  { %v9191_v14 = vld [vmem:[%s10152_s5 + $0x70] sm:$0xff]  ;;  %v9196_v15 = vld [vmem:[%s10152_s5 + $0x78] sm:$0xff]  ;;  %v9201_v16 = vld [vmem:[%s10152_s5 + $0x80] sm:$0xff] }
  0x15   :  { %10203 = vst [vmem:[#allocation44_spill] sm:$0xff] %v9201_v16  ;;  %v9206_v17 = vld [vmem:[%s10152_s5 + $0x88] sm:$0xff]  ;;  %v9211_v18 = vld [vmem:[%s10152_s5 + $0x90] sm:$0xff]  ;;  %v9216_v19 = vld [vmem:[%s10152_s5 + $0x98] sm:$0xff] }
  0x16   :  { %10204 = vst [vmem:[#allocation45_spill] sm:$0xff] %v9206_v17  ;;  %10205 = vst [vmem:[#allocation46_spill] sm:$0xff] %v9211_v18  ;;  %v9221_v20 = vld [vmem:[%s10152_s5 + $0xa0] sm:$0xff]  ;;  %v9226_v21 = vld [vmem:[%s10152_s5 + $0xa8] sm:$0xff] }
  0x17   :  { %10206 = vst [vmem:[#allocation47_spill] sm:$0xff] %v9216_v19  ;;  %10207 = vst [vmem:[#allocation48_spill] sm:$0xff] %v9221_v20  ;;  %v9231_v22 = vld [vmem:[%s10152_s5 + $0xb0] sm:$0xff]  ;;  %v9236_v23 = vld [vmem:[%s10152_s5 + $0xb8] sm:$0xff] }
  0x18   :  { %10208 = vst [vmem:[#allocation49_spill] sm:$0xff] %v9226_v21  ;;  %10209 = vst [vmem:[#allocation50_spill] sm:$0xff] %v9231_v22  ;;  %v9241_v24 = vld [vmem:[%s10152_s5 + $0xc0] sm:$0xff]  ;;  %v9246_v25 = vld [vmem:[%s10152_s5 + $0xc8] sm:$0xff] }
  0x19   :  { %10210 = vst [vmem:[#allocation51_spill] sm:$0xff] %v9236_v23  ;;  %10211 = vst [vmem:[#allocation52_spill] sm:$0xff] %v9241_v24  ;;  %v9251_v26 = vld [vmem:[%s10152_s5 + $0xd0] sm:$0xff]  ;;  %v9256_v27 = vld [vmem:[%s10152_s5 + $0xd8] sm:$0xff] }
  0x1a   :  { %10212 = vst [vmem:[#allocation53_spill] sm:$0xff] %v9246_v25  ;;  %10213 = vst [vmem:[#allocation54_spill] sm:$0xff] %v9251_v26  ;;  %v9261_v28 = vld [vmem:[%s10152_s5 + $0xe0] sm:$0xff]  ;;  %v9266_v29 = vld [vmem:[%s10152_s5 + $0xe8] sm:$0xff] }
  0x1b   :  { %10214 = vst [vmem:[#allocation55_spill] sm:$0xff] %v9256_v27  ;;  %10215 = vst [vmem:[#allocation56_spill] sm:$0xff] %v9261_v28  ;;  %v9271_v30 = vld [vmem:[%s10152_s5 + $0xf0] sm:$0xff]  ;;  %v9276_v31 = vld [vmem:[%s10152_s5 + $0xf8] sm:$0xff] }
  0x1c   :  { %v9281_v32 = vld [vmem:[%s10152_s5 + $0x100] sm:$0xff]  ;;  %v9286_v33 = vld [vmem:[%s10152_s5 + $0x108] sm:$0xff]  ;;  %v9291_v34 = vld [vmem:[%s10152_s5 + $0x110] sm:$0xff] }
  0x1d   :  { %v9296_v35 = vld [vmem:[%s10152_s5 + $0x118] sm:$0xff]  ;;  %v9301_v36 = vld [vmem:[%s10152_s5 + $0x120] sm:$0xff]  ;;  %v9306_v37 = vld [vmem:[%s10152_s5 + $0x128] sm:$0xff] }
  0x1e   :  { %v9311_v38 = vld [vmem:[%s10152_s5 + $0x130] sm:$0xff]  ;;  %v9316_v39 = vld [vmem:[%s10152_s5 + $0x138] sm:$0xff]  ;;  %v9321_v40 = vld [vmem:[%s10152_s5 + $0x140] sm:$0xff] }
  0x1f   :  { %v9326_v41 = vld [vmem:[%s10152_s5 + $0x148] sm:$0xff]  ;;  %v9331_v42 = vld [vmem:[%s10152_s5 + $0x150] sm:$0xff]  ;;  %v9336_v43 = vld [vmem:[%s10152_s5 + $0x158] sm:$0xff] }
  0x20   :  { %v9341_v44 = vld [vmem:[%s10152_s5 + $0x160] sm:$0xff]  ;;  %v9346_v45 = vld [vmem:[%s10152_s5 + $0x168] sm:$0xff]  ;;  %v9351_v46 = vld [vmem:[%s10152_s5 + $0x170] sm:$0xff] }
  0x21   :  { %v9356_v47 = vld [vmem:[%s10152_s5 + $0x178] sm:$0xff]  ;;  %v9361_v48 = vld [vmem:[%s10152_s5 + $0x180] sm:$0xff]  ;;  %v9366_v49 = vld [vmem:[%s10152_s5 + $0x188] sm:$0xff] }
  0x22   :  { %10216 = vst [vmem:[#allocation57_spill] sm:$0xff] %v9361_v48  ;;  %10217 = vst [vmem:[#allocation58_spill] sm:$0xff] %v9366_v49  ;;  %v9371_v50 = vld [vmem:[%s10152_s5 + $0x190] sm:$0xff]  ;;  %v9376_v51 = vld [vmem:[%s10152_s5 + $0x198] sm:$0xff] }
  0x23   :  { %10218 = vst [vmem:[#allocation59_spill] sm:$0xff] %v9371_v50  ;;  %10219 = vst [vmem:[#allocation60_spill] sm:$0xff] %v9376_v51  ;;  %v9381_v52 = vld [vmem:[%s10152_s5 + $0x1a0] sm:$0xff]  ;;  %v9386_v53 = vld [vmem:[%s10152_s5 + $0x1a8] sm:$0xff] }
  0x24   :  { %10220 = vst [vmem:[#allocation61_spill] sm:$0xff] %v9381_v52  ;;  %10221 = vst [vmem:[#allocation62_spill] sm:$0xff] %v9386_v53  ;;  %v9391_v54 = vld [vmem:[%s10152_s5 + $0x1b0] sm:$0xff]  ;;  %v9396_v55 = vld [vmem:[%s10152_s5 + $0x1b8] sm:$0xff] }
  0x25   :  { %10222 = vst [vmem:[#allocation63_spill] sm:$0xff] %v9391_v54  ;;  %10223 = vst [vmem:[#allocation64_spill] sm:$0xff] %v9396_v55  ;;  %v9401_v56 = vld [vmem:[%s10152_s5 + $0x1c0] sm:$0xff]  ;;  %v9406_v57 = vld [vmem:[%s10152_s5 + $0x1c8] sm:$0xff] }
  0x26   :  { %10224 = vst [vmem:[#allocation65_spill] sm:$0xff] %v9401_v56  ;;  %10225 = vst [vmem:[#allocation66_spill] sm:$0xff] %v9406_v57  ;;  %v9411_v58 = vld [vmem:[%s10152_s5 + $0x1d0] sm:$0xff]  ;;  %v9416_v59 = vld [vmem:[%s10152_s5 + $0x1d8] sm:$0xff] }
  0x27   :  { %10226 = vst [vmem:[#allocation67_spill] sm:$0xff] %v9411_v58  ;;  %10227 = vst [vmem:[#allocation68_spill] sm:$0xff] %v9416_v59  ;;  %v9421_v60 = vld [vmem:[%s10152_s5 + $0x1e0] sm:$0xff]  ;;  %v9426_v61 = vld [vmem:[%s10152_s5 + $0x1e8] sm:$0xff] }
  0x28   :  { %10228 = vst [vmem:[#allocation69_spill] sm:$0xff] %v9421_v60  ;;  %10229 = vst [vmem:[#allocation70_spill] sm:$0xff] %v9426_v61  ;;  %v9431_v62 = vld [vmem:[%s10152_s5 + $0x1f0] sm:$0xff]  ;;  %v9436_v63 = vld [vmem:[%s10152_s5 + $0x1f8] sm:$0xff] }
  0x29   :  { %218 = vsyncadd [#allocation12 + $0x2], 8192  ;;  %v265_v48 = vld [vmem:[%s10154_s7] sm:$0xff]  ;;  %v267_v49 = vld [vmem:[%s10154_s7 + $0x8] sm:$0xff]  ;;  %s9033_s21 = smov [#allocation5]  }
  0x2a   :  { %s227_s22 = sshll.u32 %s9033_s21, 4  ;;  %266 = vst [vmem:[#allocation6] sm:$0xff] %v265_v48  ;;  %268 = vst [vmem:[#allocation6 + $0x8] sm:$0xff] %v267_v49  ;;  %v269_v16 = vld [vmem:[%s10154_s7 + $0x10] sm:$0xff]  ;;  %v271_v17 = vld [vmem:[%s10154_s7 + $0x18] sm:$0xff]  ;;  %s228_s22 = int_to_ptr.vmem [resolvable:$true] %s227_s22 }
  0x2b   :  { %v273_v50 = vld [vmem:[%s10154_s7 + $0x20] sm:$0xff]  ;;  %270 = vst [vmem:[#allocation6 + $0x10] sm:$0xff] %v269_v16  ;;  %272 = vst [vmem:[#allocation6 + $0x18] sm:$0xff] %v271_v17  ;;  %v275_v48 = vld [vmem:[%s10154_s7 + $0x28] sm:$0xff]  ;;  %s8917_s15 = scalar_lea.vmem %s228_s22, 2048  ;;  %p8922_p11 = scmp.lt.s32.totalorder %s228_s22, %s228_s22 }
  0x2c   :  { %274 = vst [vmem:[#allocation6 + $0x20] sm:$0xff] %v273_v50  ;;  %v277_v49 = vld [vmem:[%s10154_s7 + $0x30] sm:$0xff]  ;;  %v279_v51 = vld [vmem:[%s10154_s7 + $0x38] sm:$0xff]  ;;  %p8918_p10 = scmp.ne.s32.totalorder %s228_s22, %s8917_s15  ;;  %p8923_p12 = scmp.lt.s32.totalorder %s8917_s15, %s8917_s15 }
  0x2e   :  { %p8924_p13 = por %p8923_p12, %p8922_p11 }
  0x30   :  { %p8925_p0 = pnand %p8924_p13, %p8918_p10 }
  0x32   :  { %8928 = shalt.err (!%p8925_p0)  }
  0x33   :  { %230 = dma.hbm_to_vmem [thread:$0]  %s10153_s6, 2048, %s228_s22, [#allocation12 + $0x3]  ;;  %276 = vst [vmem:[#allocation6 + $0x28] sm:$0xff] %v275_v48  ;;  %278 = vst [vmem:[#allocation6 + $0x30] sm:$0xff] %v277_v49 }
  0x34   :  { %280 = vst [vmem:[#allocation6 + $0x38] sm:$0xff] %v279_v51 }
  0x35   :  { %288 = vsyncadd [#allocation12 + $0x4], 1024  ;;  %v323_v16 = vld [vmem:[%s10155_s8] sm:$0xff] }
  0x36   :  { %324 = vst [vmem:[#allocation7] sm:$0xff] %v323_v16 }
  0x37   :  { %332 = vsyncadd [#allocation12 + $0x5], 128  ;;  %v403_v17 = vld [vmem:[%s10159_s12] sm:$0xff]  ;;  %v405_v50 = vld [vmem:[%s10159_s12 + $0x8] sm:$0xff]  ;;  %s9034_s30 = smov [#allocation8]   ;;  %s9035_s22 = smov [#allocation9]  }
  0x38   :  { %s341_s6 = sshll.u32 %s9034_s30, 4  ;;  %s353_s23 = sshll.u32 %s9035_s22, 4  ;;  %404 = vst [vmem:[#allocation11] sm:$0xff] %v403_v17  ;;  %406 = vst [vmem:[#allocation11 + $0x8] sm:$0xff] %v405_v50  ;;  %v407_v51 = vld [vmem:[%s10159_s12 + $0x10] sm:$0xff]  ;;  %v409_v48 = vld [vmem:[%s10159_s12 + $0x18] sm:$0xff]  ;;  %s342_s6 = int_to_ptr.vmem [resolvable:$true] %s341_s6  ;;  %s354_s23 = int_to_ptr.vmem [resolvable:$true] %s353_s23 }
  0x39   :  { %v411_v49 = vld [vmem:[%s10159_s12 + $0x20] sm:$0xff]  ;;  %408 = vst [vmem:[#allocation11 + $0x10] sm:$0xff] %v407_v51  ;;  %410 = vst [vmem:[#allocation11 + $0x18] sm:$0xff] %v409_v48  ;;  %v413_v16 = vld [vmem:[%s10159_s12 + $0x28] sm:$0xff]  ;;  %s8937_s17 = scalar_lea.vmem %s342_s6, 2048  ;;  %p8942_p2 = scmp.lt.s32.totalorder %s342_s6, %s342_s6 }
  0x3a   :  { %412 = vst [vmem:[#allocation11 + $0x20] sm:$0xff] %v411_v49  ;;  %v415_v17 = vld [vmem:[%s10159_s12 + $0x30] sm:$0xff]  ;;  %v417_v50 = vld [vmem:[%s10159_s12 + $0x38] sm:$0xff]  ;;  %p8938_p1 = scmp.ne.s32.totalorder %s342_s6, %s8937_s17  ;;  %p8943_p3 = scmp.lt.s32.totalorder %s8937_s17, %s8937_s17 }
  0x3c   :  { %p8944_p4 = por %p8943_p3, %p8942_p2 }
  0x3e   :  { %p8945_p5 = pnand %p8944_p4, %p8938_p1 }
  0x40   :  { %8948 = shalt.err (!%p8945_p5)  }
  0x41   :  { %344 = dma.hbm_to_vmem [thread:$0]  %s10156_s9, 2048, %s342_s6, [#allocation12 + $0x6]  ;;  %414 = vst [vmem:[#allocation11 + $0x28] sm:$0xff] %v413_v16  ;;  %416 = vst [vmem:[#allocation11 + $0x30] sm:$0xff] %v415_v17  ;;  %v419_v51 = vld [vmem:[%s10159_s12 + $0x40] sm:$0xff]  ;;  %v421_v48 = vld [vmem:[%s10159_s12 + $0x48] sm:$0xff] }
  0x42   :  { %418 = vst [vmem:[#allocation11 + $0x38] sm:$0xff] %v417_v50  ;;  %v423_v49 = vld [vmem:[%s10159_s12 + $0x50] sm:$0xff]  ;;  %s8957_s5 = scalar_lea.vmem %s354_s23, 8192  ;;  %p8962_p7 = scmp.lt.s32.totalorder %s354_s23, %s354_s23 }
  0x43   :  { %p8958_p6 = scmp.ne.s32.totalorder %s354_s23, %s8957_s5  ;;  %p8963_p8 = scmp.lt.s32.totalorder %s8957_s5, %s8957_s5 }
  0x45   :  { %p8964_p9 = por %p8963_p8, %p8962_p7 }
  0x47   :  { %p8965_p10 = pnand %p8964_p9, %p8958_p6 }
  0x49   :  { %8968 = shalt.err (!%p8965_p10)  }
  0x4a   :  { %356 = dma.hbm_to_vmem [thread:$0]  %s10157_s10, 8192, %s354_s23, [#allocation12 + $0x7]  ;;  %420 = vst [vmem:[#allocation11 + $0x40] sm:$0xff] %v419_v51  ;;  %422 = vst [vmem:[#allocation11 + $0x48] sm:$0xff] %v421_v48  ;;  %v425_v16 = vld [vmem:[%s10159_s12 + $0x58] sm:$0xff]  ;;  %v427_v17 = vld [vmem:[%s10159_s12 + $0x60] sm:$0xff] }
  0x4b   :  { %424 = vst [vmem:[#allocation11 + $0x50] sm:$0xff] %v423_v49  ;;  %v429_v50 = vld [vmem:[%s10159_s12 + $0x68] sm:$0xff]  ;;  %426 = vst [vmem:[#allocation11 + $0x58] sm:$0xff] %v425_v16  ;;  %v431_v51 = vld [vmem:[%s10159_s12 + $0x70] sm:$0xff]  ;;  %s9036_s16 = smov [#allocation10]  }
  0x4c   :  { %428 = vst [vmem:[#allocation11 + $0x60] sm:$0xff] %v427_v17  ;;  %430 = vst [vmem:[#allocation11 + $0x68] sm:$0xff] %v429_v50  ;;  %v433_v48 = vld [vmem:[%s10159_s12 + $0x78] sm:$0xff]  ;;  %v435_v49 = vld [vmem:[%s10159_s12 + $0x80] sm:$0xff]  ;;  %s365_s17 = sshll.u32 %s9036_s16, 4  ;;  %s366_s17 = int_to_ptr.vmem [resolvable:$true] %s365_s17 }
  0x4d   :  { %432 = vst [vmem:[#allocation11 + $0x70] sm:$0xff] %v431_v51  ;;  %434 = vst [vmem:[#allocation11 + $0x78] sm:$0xff] %v433_v48  ;;  %v437_v16 = vld [vmem:[%s10159_s12 + $0x88] sm:$0xff]  ;;  %v439_v17 = vld [vmem:[%s10159_s12 + $0x90] sm:$0xff]  ;;  %s8977_s8 = scalar_lea.vmem %s366_s17, 32768  ;;  %p8982_p12 = scmp.lt.s32.totalorder %s366_s17, %s366_s17 }
  0x4e   :  { %436 = vst [vmem:[#allocation11 + $0x80] sm:$0xff] %v435_v49  ;;  %v441_v50 = vld [vmem:[%s10159_s12 + $0x98] sm:$0xff]  ;;  %438 = vst [vmem:[#allocation11 + $0x88] sm:$0xff] %v437_v16  ;;  %v443_v51 = vld [vmem:[%s10159_s12 + $0xa0] sm:$0xff]  ;;  %p8978_p11 = scmp.ne.s32.totalorder %s366_s17, %s8977_s8  ;;  %p8983_p13 = scmp.lt.s32.totalorder %s8977_s8, %s8977_s8 }
  0x4f   :  { %440 = vst [vmem:[#allocation11 + $0x90] sm:$0xff] %v439_v17  ;;  %442 = vst [vmem:[#allocation11 + $0x98] sm:$0xff] %v441_v50  ;;  %v445_v48 = vld [vmem:[%s10159_s12 + $0xa8] sm:$0xff]  ;;  %v447_v49 = vld [vmem:[%s10159_s12 + $0xb0] sm:$0xff] }
  0x50   :  { %p8984_p0 = por %p8983_p13, %p8982_p12 }
  0x52   :  { %p8985_p1 = pnand %p8984_p0, %p8978_p11 }
  0x54   :  { %8988 = shalt.err (!%p8985_p1)  }
  0x55   :  { %368 = dma.hbm_to_vmem [thread:$0]  %s10158_s11, 32768, %s366_s17, [#allocation12 + $0x8]  ;;  %444 = vst [vmem:[#allocation11 + $0xa0] sm:$0xff] %v443_v51  ;;  %446 = vst [vmem:[#allocation11 + $0xa8] sm:$0xff] %v445_v48  ;;  %v449_v16 = vld [vmem:[%s10159_s12 + $0xb8] sm:$0xff]  ;;  %v451_v17 = vld [vmem:[%s10159_s12 + $0xc0] sm:$0xff] }
  0x56   :  { %448 = vst [vmem:[#allocation11 + $0xb0] sm:$0xff] %v447_v49  ;;  %v453_v50 = vld [vmem:[%s10159_s12 + $0xc8] sm:$0xff]  ;;  %450 = vst [vmem:[#allocation11 + $0xb8] sm:$0xff] %v449_v16  ;;  %v455_v51 = vld [vmem:[%s10159_s12 + $0xd0] sm:$0xff] }
  0x57   :  { %452 = vst [vmem:[#allocation11 + $0xc0] sm:$0xff] %v451_v17  ;;  %454 = vst [vmem:[#allocation11 + $0xc8] sm:$0xff] %v453_v50  ;;  %v457_v48 = vld [vmem:[%s10159_s12 + $0xd8] sm:$0xff]  ;;  %v459_v49 = vld [vmem:[%s10159_s12 + $0xe0] sm:$0xff] }
  0x58   :  { %456 = vst [vmem:[#allocation11 + $0xd0] sm:$0xff] %v455_v51  ;;  %458 = vst [vmem:[#allocation11 + $0xd8] sm:$0xff] %v457_v48  ;;  %v461_v16 = vld [vmem:[%s10159_s12 + $0xe8] sm:$0xff]  ;;  %v463_v17 = vld [vmem:[%s10159_s12 + $0xf0] sm:$0xff] }
  0x59   :  { %460 = vst [vmem:[#allocation11 + $0xe0] sm:$0xff] %v459_v49  ;;  %v465_v50 = vld [vmem:[%s10159_s12 + $0xf8] sm:$0xff]  ;;  %462 = vst [vmem:[#allocation11 + $0xe8] sm:$0xff] %v461_v16  ;;  %v467_v51 = vld [vmem:[%s10159_s12 + $0x100] sm:$0xff] }
  0x5a   :  { %464 = vst [vmem:[#allocation11 + $0xf0] sm:$0xff] %v463_v17  ;;  %466 = vst [vmem:[#allocation11 + $0xf8] sm:$0xff] %v465_v50  ;;  %v469_v48 = vld [vmem:[%s10159_s12 + $0x108] sm:$0xff]  ;;  %v471_v49 = vld [vmem:[%s10159_s12 + $0x110] sm:$0xff] }
  0x5b   :  { %468 = vst [vmem:[#allocation11 + $0x100] sm:$0xff] %v467_v51  ;;  %470 = vst [vmem:[#allocation11 + $0x108] sm:$0xff] %v469_v48  ;;  %v473_v16 = vld [vmem:[%s10159_s12 + $0x118] sm:$0xff]  ;;  %v475_v17 = vld [vmem:[%s10159_s12 + $0x120] sm:$0xff] }
  0x5c   :  { %472 = vst [vmem:[#allocation11 + $0x110] sm:$0xff] %v471_v49  ;;  %v477_v50 = vld [vmem:[%s10159_s12 + $0x128] sm:$0xff]  ;;  %474 = vst [vmem:[#allocation11 + $0x118] sm:$0xff] %v473_v16  ;;  %v479_v51 = vld [vmem:[%s10159_s12 + $0x130] sm:$0xff] }
  0x5d   :  { %476 = vst [vmem:[#allocation11 + $0x120] sm:$0xff] %v475_v17  ;;  %478 = vst [vmem:[#allocation11 + $0x128] sm:$0xff] %v477_v50  ;;  %v481_v48 = vld [vmem:[%s10159_s12 + $0x138] sm:$0xff]  ;;  %v483_v49 = vld [vmem:[%s10159_s12 + $0x140] sm:$0xff] }
  0x5e   :  { %480 = vst [vmem:[#allocation11 + $0x130] sm:$0xff] %v479_v51  ;;  %482 = vst [vmem:[#allocation11 + $0x138] sm:$0xff] %v481_v48  ;;  %v485_v16 = vld [vmem:[%s10159_s12 + $0x148] sm:$0xff]  ;;  %v487_v17 = vld [vmem:[%s10159_s12 + $0x150] sm:$0xff] }
  0x5f   :  { %484 = vst [vmem:[#allocation11 + $0x140] sm:$0xff] %v483_v49  ;;  %v489_v50 = vld [vmem:[%s10159_s12 + $0x158] sm:$0xff]  ;;  %486 = vst [vmem:[#allocation11 + $0x148] sm:$0xff] %v485_v16  ;;  %v491_v51 = vld [vmem:[%s10159_s12 + $0x160] sm:$0xff] }
  0x60   :  { %488 = vst [vmem:[#allocation11 + $0x150] sm:$0xff] %v487_v17  ;;  %490 = vst [vmem:[#allocation11 + $0x158] sm:$0xff] %v489_v50  ;;  %v493_v48 = vld [vmem:[%s10159_s12 + $0x168] sm:$0xff]  ;;  %v495_v49 = vld [vmem:[%s10159_s12 + $0x170] sm:$0xff] }
  0x61   :  { %492 = vst [vmem:[#allocation11 + $0x160] sm:$0xff] %v491_v51  ;;  %494 = vst [vmem:[#allocation11 + $0x168] sm:$0xff] %v493_v48  ;;  %v497_v16 = vld [vmem:[%s10159_s12 + $0x178] sm:$0xff]  ;;  %v499_v17 = vld [vmem:[%s10159_s12 + $0x180] sm:$0xff] }
  0x62   :  { %496 = vst [vmem:[#allocation11 + $0x170] sm:$0xff] %v495_v49  ;;  %v501_v50 = vld [vmem:[%s10159_s12 + $0x188] sm:$0xff]  ;;  %498 = vst [vmem:[#allocation11 + $0x178] sm:$0xff] %v497_v16  ;;  %v503_v51 = vld [vmem:[%s10159_s12 + $0x190] sm:$0xff] }
  0x63   :  { %500 = vst [vmem:[#allocation11 + $0x180] sm:$0xff] %v499_v17  ;;  %502 = vst [vmem:[#allocation11 + $0x188] sm:$0xff] %v501_v50  ;;  %v505_v48 = vld [vmem:[%s10159_s12 + $0x198] sm:$0xff]  ;;  %v507_v49 = vld [vmem:[%s10159_s12 + $0x1a0] sm:$0xff] }
  0x64   :  { %504 = vst [vmem:[#allocation11 + $0x190] sm:$0xff] %v503_v51  ;;  %506 = vst [vmem:[#allocation11 + $0x198] sm:$0xff] %v505_v48  ;;  %v509_v16 = vld [vmem:[%s10159_s12 + $0x1a8] sm:$0xff]  ;;  %v511_v17 = vld [vmem:[%s10159_s12 + $0x1b0] sm:$0xff] }
  0x65   :  { %508 = vst [vmem:[#allocation11 + $0x1a0] sm:$0xff] %v507_v49  ;;  %v513_v50 = vld [vmem:[%s10159_s12 + $0x1b8] sm:$0xff]  ;;  %510 = vst [vmem:[#allocation11 + $0x1a8] sm:$0xff] %v509_v16  ;;  %v515_v51 = vld [vmem:[%s10159_s12 + $0x1c0] sm:$0xff] }
  0x66   :  { %512 = vst [vmem:[#allocation11 + $0x1b0] sm:$0xff] %v511_v17  ;;  %514 = vst [vmem:[#allocation11 + $0x1b8] sm:$0xff] %v513_v50  ;;  %v517_v48 = vld [vmem:[%s10159_s12 + $0x1c8] sm:$0xff]  ;;  %v519_v49 = vld [vmem:[%s10159_s12 + $0x1d0] sm:$0xff] }
  0x67   :  { %516 = vst [vmem:[#allocation11 + $0x1c0] sm:$0xff] %v515_v51  ;;  %518 = vst [vmem:[#allocation11 + $0x1c8] sm:$0xff] %v517_v48  ;;  %v521_v16 = vld [vmem:[%s10159_s12 + $0x1d8] sm:$0xff]  ;;  %v523_v17 = vld [vmem:[%s10159_s12 + $0x1e0] sm:$0xff] }
  0x68   :  { %520 = vst [vmem:[#allocation11 + $0x1d0] sm:$0xff] %v519_v49  ;;  %v525_v50 = vld [vmem:[%s10159_s12 + $0x1e8] sm:$0xff]  ;;  %522 = vst [vmem:[#allocation11 + $0x1d8] sm:$0xff] %v521_v16  ;;  %v527_v51 = vld [vmem:[%s10159_s12 + $0x1f0] sm:$0xff] }
  0x69   :  { %524 = vst [vmem:[#allocation11 + $0x1e0] sm:$0xff] %v523_v17  ;;  %526 = vst [vmem:[#allocation11 + $0x1e8] sm:$0xff] %v525_v50  ;;  %v529_v48 = vld [vmem:[%s10159_s12 + $0x1f8] sm:$0xff] }
  0x6a   :  { %528 = vst [vmem:[#allocation11 + $0x1f0] sm:$0xff] %v527_v51  ;;  %530 = vst [vmem:[#allocation11 + $0x1f8] sm:$0xff] %v529_v48 }
  0x6b   :  { %538 = vsyncadd [#allocation12 + $0x9], 8192  ;;  %v539_v49 = vld [vmem:[%s10147_s0] sm:$0xff] }
  0x6c   :  { %9009 = dma.done.wait [#allocation12], 2048 }
  0x6d   :  { %9010 = vsyncadd [#allocation12], 4294965248  ;;  %v10180_v16 = vmov 0   ;;  %v552_v17 = vld [vmem:[#allocation2 + $0x40] sm:$0xff]  ;;  %v553_v51 = vld [vmem:[#allocation2 + $0x48] sm:$0xff]  ;;  %vm685_vm0 = vcmask 261120  }
  0x6e   :  { %721 = vmatprep.mubr.bf16.mxu0 %v10180_v16  ;;  %844 = vmatprep.mubr.bf16.mxu1 %v10180_v16  ;;  %v556_v50 = vld [vmem:[#allocation2 + $0x60] sm:$0xff]  ;;  %v557_v20 = vld [vmem:[#allocation2 + $0x68] sm:$0xff]  ;;  %v555_v21 = vld [vmem:[#allocation2 + $0x58] sm:$0xff] }
  0x6f   :  { %v544_v18 = vld [vmem:[#allocation2] sm:$0xff]  ;;  %v7295_v19 = vcombine.high %v552_v17, %v556_v50  ;;  %v7294_v52 = vcombine.low %v552_v17, %v556_v50  ;;  %v559_v54 = vld [vmem:[#allocation2 + $0x78] sm:$0xff]  ;;  %v7297_v16 = vcombine.high %v553_v51, %v557_v20  ;;  %v545_v25 = vld [vmem:[#allocation2 + $0x8] sm:$0xff]  ;;  %v563_v50 = vpack.c.bf16 %v539_v49, %v539_v49 }
  0x70   :  { %v548_v53 = vld [vmem:[#allocation2 + $0x20] sm:$0xff]  ;;  %v7301_v55 = vcombine.high %v555_v21, %v559_v54  ;;  %v7300_v22 = vcombine.low %v555_v21, %v559_v54  ;;  %v547_v23 = vld [vmem:[#allocation2 + $0x18] sm:$0xff]  ;;  %v549_v58 = vld [vmem:[#allocation2 + $0x28] sm:$0xff]  ;;  %v7296_v59 = vcombine.low %v553_v51, %v557_v20 }
  0x71   :  { %v7287_v48 = vcombine.high %v544_v18, %v548_v53  ;;  %701 = vmatprep.subr.bf16.mxu0 %v7295_v19  ;;  %v551_v56 = vld [vmem:[#allocation2 + $0x38] sm:$0xff]  ;;  %v7286_v57 = vcombine.low %v544_v18, %v548_v53  ;;  %v7289_v19 = vcombine.high %v545_v25, %v549_v58  ;;  %v554_v21 = vld [vmem:[#allocation2 + $0x50] sm:$0xff]  ;;  %v7288_v18 = vcombine.low %v545_v25, %v549_v58 }
  0x72   :  { %702 = vmatpush1.bf16.msra.mxu0 %v7294_v52  ;;  %v7293_v24 = vcombine.high %v547_v23, %v551_v56  ;;  %824 = vmatprep.subr.bf16.mxu1 %v7301_v55  ;;  %v7292_v17 = vcombine.low %v547_v23, %v551_v56  ;;  %v558_v54 = vld [vmem:[#allocation2 + $0x70] sm:$0xff]  ;;  %v10230_v52 = vmov 0   ;;  %v565_v25 = vlaneseq }
  0x73   :  { %703 = vmatprep.subr.bf16.mxu0 %v7287_v48  ;;  %825 = vmatpush1.bf16.msra.mxu1 %v7300_v22  ;;  %v7299_v53 = vcombine.high %v554_v21, %v558_v54  ;;  %v546_v22 = vld [vmem:[#allocation2 + $0x10] sm:$0xff] }
  0x74   :  { %826 = vmatprep.subr.bf16.mxu1 %v7293_v24  ;;  %v550_v23 = vld [vmem:[#allocation2 + $0x30] sm:$0xff]  ;;  %v7298_v24 = vcombine.low %v554_v21, %v558_v54  ;;  %v9680_v56 = vshrl.u32 %v565_v25, 7 }
  0x75   :  { %v7291_v20 = vcombine.high %v546_v22, %v550_v23  ;;  %v7290_v55 = vcombine.low %v546_v22, %v550_v23  ;;  %v561_v58 = vld [vmem:[%s10148_s1] ss:$8 sm:$0xf0] }
  0x76   :  { %704 = vmatpush1.bf16.msra.mxu0 %v7286_v57  ;;  %10231 = vst [vmem:[#allocation71_spill] sm:$0xff] %v9680_v56  ;;  %v560_v57 = vld [vmem:[%s10148_s1] ss:$8 sm:$0xf]  ;;  %v9689_v49 = vsub.s32 0, %v9680_v56  ;;  %v10185_v51 = vsub.s32 6, %v9680_v56 }
  0x77   :  { %742 = vmatprep.subr.bf16.mxu0 %v7297_v16  ;;  %827 = vmatpush1.bf16.msra.mxu1 %v7292_v17  ;;  %v9692_v16 = vsub.s32 1, %v9680_v56  ;;  %v10187_v17 = vsub.s32 7, %v9680_v56 }
  0x78   :  { %10232 = vst [vmem:[#allocation72_spill] sm:$0xff] %v9689_v49 }
  0x79   :  { %7302 = vmatmul.mubr.msk.bf16.vlgmr.msra.gmra.mxu0 %vm685_vm0, %v563_v50  ;;  %10233 = vst [vmem:[#allocation73_spill] sm:$0xff] %v9692_v16 }
  0x7a   :  { %743 = vmatpush1.bf16.msra.mxu0 %v7296_v59  ;;  %762 = vmatprep.mubr.bf16.mxu0 %v10230_v52  ;;  %v562_v59 = vor.u32 %v561_v58, %v560_v57 }
  0x7b   :  { %744 = vmatprep.subr.bf16.mxu0 %v7289_v19  ;;  %7305 = vmatmul.mubr.msk.bf16.vlgmr.msra.gmra.mxu1 %vm685_vm0, %v563_v50 }
  0x7c   :  { %v568_v48 = vrot.slane %v562_v59, %v9689_v49  ;;  %v592_v19 = vrot.slane %v562_v59, %v10185_v51  ;;  %v10193_v51 = vsub.s32 5, %v9680_v56 }
  0x7e   :  { %745 = vmatpush1.bf16.msra.mxu0 %v7288_v18  ;;  %v9703_v18 = vsub.s32 2, %v9680_v56 }
  0x7f   :  { %783 = vmatprep.subr.bf16.mxu0 %v7299_v53  ;;  %v596_v53 = vrot.slane %v562_v59, %v10187_v17 }
  0x80   :  { %10234 = vst [vmem:[#allocation74_spill] sm:$0xff] %v9703_v18 }
  0x81   :  { %7303 = vmatmul.mubr.msk.bf16.vlgmr.msra.gmra.mxu0 %vm685_vm0, %v563_v50 }
  0x82   :  { %784 = vmatpush1.bf16.msra.mxu0 %v7298_v24  ;;  %803 = vmatprep.mubr.bf16.mxu0 %v10230_v52 }
  0x83   :  { %785 = vmatprep.subr.bf16.mxu0 %v7291_v20 }
  0x86   :  { %786 = vmatpush1.bf16.msra.mxu0 %v7290_v55  ;;  %v9709_v55 = vsub.s32 3, %v9680_v56 }
  0x88   :  { %v580_v27 = vrot.slane %v562_v59, %v9709_v55 }
  0x89   :  { %7304 = vmatmul.mubr.msk.bf16.vlgmr.msra.gmra.mxu0 %vm685_vm0, %v563_v50  ;;  %v572_v50 = vrot.slane %v562_v59, %v9692_v16 }
 0x139   :  { %v723_v21 = vpop.f32.mrf.mxu0 }
 0x13a   :  { %v9700_v54 = vadd.f32 %v723_v21, %v568_v48  ;;  %v576_v21 = vrot.slane %v562_v59, %v9703_v18 }
 0x13b   :  { %v725_v22 = vpop.f32.mrf.mxu0  ;;  %v846_v23 = vpop.f32.mrf.mxu1 }
 0x13c   :  { %v726_v20 = vadd.f32 %v725_v22, %v572_v50  ;;  %v9711_v25 = vadd.f32 %v846_v23, %v592_v19  ;;  %v10194_v19 = vsub.s32 4, %v9680_v56  ;;  %v588_v50 = vrot.slane %v562_v59, %v10193_v51 }
 0x13d   :  { %v727_v57 = vpop.f32.mrf.mxu0  ;;  %v848_v58 = vpop.f32.mrf.mxu1 }
 0x13e   :  { %v854_v48 = vmax.f32 %v726_v20, 0.0  ;;  %v9715_v52 = vadd.f32 %v848_v58, %v596_v53 }
 0x13f   :  { %v728_v17 = vpop.f32.mrf.mxu0  ;;  %v850_v26 = vpop.f32.mrf.mxu1 }
 0x140   :  { %v584_v26 = vrot.slane %v562_v59, %v10194_v19 }
 0x141   :  { %v764_v22 = vpop.f32.mrf.mxu0  ;;  %v851_v24 = vpop.f32.mrf.mxu1 }
 0x142   :  { %v9719_v60 = vadd.f32 %v764_v22, %v576_v21 }
 0x143   :  { %v766_v23 = vpop.f32.mrf.mxu0 }
 0x144   :  { %v767_v57 = vadd.f32 %v766_v23, %v580_v27 }
 0x145   :  { %v768_v53 = vpop.f32.mrf.mxu0 }
 0x146   :  { %v856_v58 = vmax.f32 %v767_v57, 0.0 }
 0x147   :  { %v769_v17 = vpop.f32.mrf.mxu0 }
 0x149   :  { %v805_v24 = vpop.f32.mrf.mxu0 }
 0x14a   :  { %v9728_v21 = vadd.f32 %v805_v24, %v584_v26 }
 0x14b   :  { %v807_v22 = vpop.f32.mrf.mxu0 }
 0x14c   :  { %v9731_v28 = vadd.f32 %v807_v22, %v588_v50 }
 0x14d   :  { %v809_v27 = vpop.f32.mrf.mxu0 }
 0x14f   :  { %v810_v53 = vpop.f32.mrf.mxu0 }
 0x150   :  { %9011 = dma.done.wait [#allocation12 + $0x1], 32768 }
 0x151   :  { %9012 = vsyncadd [#allocation12 + $0x1], 4294934528  ;;  %v9734_v57 = vpack.c.bf16 %v854_v48, %v854_v48  ;;  %v9736_v17 = vpack.c.bf16 %v856_v58, %v856_v58  ;;  %v8262_v59 = vld [vmem:[#allocation3 + $0xe4] ss:$16 sps:$4 sm:$0xff]   ;;  %v8266_v24 = vld [vmem:[#allocation3 + $0xe0] ss:$16 sps:$4 sm:$0xff]  }
 0x152   :  { %v8264_v26 = vld [vmem:[#allocation3 + $0x2e4] ss:$16 sps:$4 sm:$0xff]   ;;  %2432 = vmatprep.subr.bf16.mxu0 %v8262_v59  ;;  %v8267_v50 = vld [vmem:[#allocation3 + $0x2e0] ss:$16 sps:$4 sm:$0xff]  }
 0x153   :  { %2464 = vmatprep.mubr.bf16.mxu0 %v9734_v57  ;;  %2505 = vmatprep.mubr.bf16.mxu1 %v9736_v17  ;;  %v8268_v22 = vld [vmem:[#allocation3 + $0xc4] ss:$16 sps:$4 sm:$0xff]   ;;  %v8272_v53 = vld [vmem:[#allocation3 + $0xc0] ss:$16 sps:$4 sm:$0xff]  }
 0x154   :  { %2473 = vmatprep.subr.bf16.mxu1 %v8264_v26  ;;  %2433 = vmatpush1.bf16.msra.mxu0 %v8266_v24  ;;  %v8270_v27 = vld [vmem:[#allocation3 + $0x2c4] ss:$16 sps:$4 sm:$0xff]   ;;  %v8273_v48 = vld [vmem:[#allocation3 + $0x2c0] ss:$16 sps:$4 sm:$0xff]  }
 0x155   :  { %2474 = vmatpush1.bf16.msra.mxu1 %v8267_v50  ;;  %2434 = vmatprep.subr.bf16.mxu0 %v8268_v22  ;;  %v8274_v58 = vld [vmem:[#allocation3 + $0xa4] ss:$16 sps:$4 sm:$0xff]   ;;  %v8278_v19 = vld [vmem:[#allocation3 + $0xa0] ss:$16 sps:$4 sm:$0xff]  }
 0x156   :  { %2475 = vmatprep.subr.bf16.mxu1 %v8270_v27  ;;  %v8276_v51 = vld [vmem:[#allocation3 + $0x2a4] ss:$16 sps:$4 sm:$0xff]   ;;  %v8279_v61 = vld [vmem:[#allocation3 + $0x2a0] ss:$16 sps:$4 sm:$0xff]  }
 0x157   :  { %v8280_v23 = vld [vmem:[#allocation3 + $0x84] ss:$16 sps:$4 sm:$0xff]   ;;  %v8284_v20 = vld [vmem:[#allocation3 + $0x80] ss:$16 sps:$4 sm:$0xff]  }
 0x158   :  { %2435 = vmatpush1.bf16.msra.mxu0 %v8272_v53  ;;  %v8282_v59 = vld [vmem:[#allocation3 + $0x284] ss:$16 sps:$4 sm:$0xff]   ;;  %v8285_v26 = vld [vmem:[#allocation3 + $0x280] ss:$16 sps:$4 sm:$0xff]  }
 0x159   :  { %2476 = vmatpush1.bf16.msra.mxu1 %v8273_v48  ;;  %2436 = vmatprep.subr.bf16.mxu0 %v8274_v58  ;;  %v8286_v24 = vld [vmem:[#allocation3 + $0x64] ss:$16 sps:$4 sm:$0xff]   ;;  %v8290_v22 = vld [vmem:[#allocation3 + $0x60] ss:$16 sps:$4 sm:$0xff]  }
 0x15a   :  { %2477 = vmatprep.subr.bf16.mxu1 %v8276_v51  ;;  %v8288_v50 = vld [vmem:[#allocation3 + $0x264] ss:$16 sps:$4 sm:$0xff]   ;;  %v8291_v27 = vld [vmem:[#allocation3 + $0x260] ss:$16 sps:$4 sm:$0xff]  }
 0x15b   :  { %v8292_v56 = vld [vmem:[#allocation3 + $0x44] ss:$16 sps:$4 sm:$0xff]   ;;  %v8296_v48 = vld [vmem:[#allocation3 + $0x40] ss:$16 sps:$4 sm:$0xff]  }
 0x15c   :  { %2437 = vmatpush1.bf16.msra.mxu0 %v8278_v19  ;;  %v8294_v53 = vld [vmem:[#allocation3 + $0x244] ss:$16 sps:$4 sm:$0xff]   ;;  %v8297_v51 = vld [vmem:[#allocation3 + $0x240] ss:$16 sps:$4 sm:$0xff]  }
 0x15d   :  { %2478 = vmatpush1.bf16.msra.mxu1 %v8279_v61  ;;  %2438 = vmatprep.subr.bf16.mxu0 %v8280_v23  ;;  %v8298_v58 = vld [vmem:[#allocation3 + $0x24] ss:$16 sps:$4 sm:$0xff]   ;;  %v8302_v19 = vld [vmem:[#allocation3 + $0x20] ss:$16 sps:$4 sm:$0xff]  }
 0x15e   :  { %2479 = vmatprep.subr.bf16.mxu1 %v8282_v59  ;;  %v8300_v61 = vld [vmem:[#allocation3 + $0x224] ss:$16 sps:$4 sm:$0xff]   ;;  %v8303_v23 = vld [vmem:[#allocation3 + $0x220] ss:$16 sps:$4 sm:$0xff]  }
 0x15f   :  { %v8304_v59 = vld [vmem:[#allocation3 + $0x4] ss:$16 sps:$4 sm:$0xff]  }
 0x160   :  { %2439 = vmatpush1.bf16.msra.mxu0 %v8284_v20  ;;  %v8306_v20 = vld [vmem:[#allocation3 + $0x204] ss:$16 sps:$4 sm:$0xff]  }
 0x161   :  { %2480 = vmatpush1.bf16.msra.mxu1 %v8285_v26  ;;  %2440 = vmatprep.subr.bf16.mxu0 %v8286_v24  ;;  %v8308_v26 = vld [vmem:[#allocation3] ss:$16 sps:$4 sm:$0xff]  }
 0x162   :  { %2481 = vmatprep.subr.bf16.mxu1 %v8288_v50  ;;  %v8309_v24 = vld [vmem:[#allocation3 + $0x200] ss:$16 sps:$4 sm:$0xff]   ;;  %v8310_v50 = vld [vmem:[#allocation3 + $0x1e4] ss:$16 sps:$4 sm:$0xff]  }
 0x164   :  { %2441 = vmatpush1.bf16.msra.mxu0 %v8290_v22  ;;  %v8312_v22 = vld [vmem:[#allocation3 + $0x3e4] ss:$16 sps:$4 sm:$0xff]  }
 0x165   :  { %2482 = vmatpush1.bf16.msra.mxu1 %v8291_v27  ;;  %2442 = vmatprep.subr.bf16.mxu0 %v8292_v56  ;;  %v8314_v27 = vld [vmem:[#allocation3 + $0x1e0] ss:$16 sps:$4 sm:$0xff]  }
 0x166   :  { %2483 = vmatprep.subr.bf16.mxu1 %v8294_v53  ;;  %v8315_v56 = vld [vmem:[#allocation3 + $0x3e0] ss:$16 sps:$4 sm:$0xff]   ;;  %v8316_v53 = vld [vmem:[#allocation3 + $0x1c4] ss:$16 sps:$4 sm:$0xff]  }
 0x168   :  { %2443 = vmatpush1.bf16.msra.mxu0 %v8296_v48  ;;  %v8318_v48 = vld [vmem:[#allocation3 + $0x3c4] ss:$16 sps:$4 sm:$0xff]  }
 0x169   :  { %2484 = vmatpush1.bf16.msra.mxu1 %v8297_v51  ;;  %2444 = vmatprep.subr.bf16.mxu0 %v8298_v58  ;;  %v8320_v51 = vld [vmem:[#allocation3 + $0x1c0] ss:$16 sps:$4 sm:$0xff]  }
 0x16a   :  { %2485 = vmatprep.subr.bf16.mxu1 %v8300_v61  ;;  %v8321_v58 = vld [vmem:[#allocation3 + $0x3c0] ss:$16 sps:$4 sm:$0xff]   ;;  %v8322_v61 = vld [vmem:[#allocation3 + $0x1a4] ss:$16 sps:$4 sm:$0xff]  }
 0x16c   :  { %2445 = vmatpush1.bf16.msra.mxu0 %v8302_v19  ;;  %v8324_v19 = vld [vmem:[#allocation3 + $0x3a4] ss:$16 sps:$4 sm:$0xff]  }
 0x16d   :  { %2486 = vmatpush1.bf16.msra.mxu1 %v8303_v23  ;;  %2446 = vmatprep.subr.bf16.mxu0 %v8304_v59  ;;  %v8326_v23 = vld [vmem:[#allocation3 + $0x1a0] ss:$16 sps:$4 sm:$0xff]  }
 0x16e   :  { %2487 = vmatprep.subr.bf16.mxu1 %v8306_v20  ;;  %v8327_v59 = vld [vmem:[#allocation3 + $0x3a0] ss:$16 sps:$4 sm:$0xff]   ;;  %v8328_v20 = vld [vmem:[#allocation3 + $0x184] ss:$16 sps:$4 sm:$0xff]  }
 0x170   :  { %2447 = vmatpush1.bf16.msra.mxu0 %v8308_v26  ;;  %v8330_v26 = vld [vmem:[#allocation3 + $0x384] ss:$16 sps:$4 sm:$0xff]  }
 0x171   :  { %2488 = vmatpush1.bf16.msra.mxu1 %v8309_v24  ;;  %2448 = vmatprep.subr.bf16.mxu0 %v8310_v50  ;;  %v8332_v24 = vld [vmem:[#allocation3 + $0x180] ss:$16 sps:$4 sm:$0xff]  }
 0x172   :  { %2489 = vmatprep.subr.bf16.mxu1 %v8312_v22  ;;  %v8333_v50 = vld [vmem:[#allocation3 + $0x380] ss:$16 sps:$4 sm:$0xff]   ;;  %v8334_v22 = vld [vmem:[#allocation3 + $0x164] ss:$16 sps:$4 sm:$0xff]  }
 0x174   :  { %2449 = vmatpush2.bf16.msra.mxu0 %v8314_v27  ;;  %v8336_v27 = vld [vmem:[#allocation3 + $0x364] ss:$16 sps:$4 sm:$0xff]  }
 0x175   :  { %2490 = vmatpush2.bf16.msra.mxu1 %v8315_v56  ;;  %2450 = vmatprep.subr.bf16.mxu0 %v8316_v53  ;;  %v8338_v56 = vld [vmem:[#allocation3 + $0x160] ss:$16 sps:$4 sm:$0xff]  }
 0x176   :  { %2491 = vmatprep.subr.bf16.mxu1 %v8318_v48  ;;  %v8339_v53 = vld [vmem:[#allocation3 + $0x360] ss:$16 sps:$4 sm:$0xff]   ;;  %v8340_v48 = vld [vmem:[#allocation3 + $0x144] ss:$16 sps:$4 sm:$0xff]  }
 0x178   :  { %2451 = vmatpush2.bf16.msra.mxu0 %v8320_v51  ;;  %v8342_v51 = vld [vmem:[#allocation3 + $0x344] ss:$16 sps:$4 sm:$0xff]  }
 0x179   :  { %2492 = vmatpush2.bf16.msra.mxu1 %v8321_v58  ;;  %2452 = vmatprep.subr.bf16.mxu0 %v8322_v61  ;;  %v8344_v58 = vld [vmem:[#allocation3 + $0x140] ss:$16 sps:$4 sm:$0xff]  }
 0x17a   :  { %2493 = vmatprep.subr.bf16.mxu1 %v8324_v19  ;;  %v8345_v61 = vld [vmem:[#allocation3 + $0x340] ss:$16 sps:$4 sm:$0xff]   ;;  %v8346_v19 = vld [vmem:[#allocation3 + $0x124] ss:$16 sps:$4 sm:$0xff]  }
 0x17c   :  { %2453 = vmatpush2.bf16.msra.mxu0 %v8326_v23  ;;  %v8348_v23 = vld [vmem:[#allocation3 + $0x324] ss:$16 sps:$4 sm:$0xff]  }
 0x17d   :  { %2494 = vmatpush2.bf16.msra.mxu1 %v8327_v59  ;;  %2454 = vmatprep.subr.bf16.mxu0 %v8328_v20  ;;  %v8350_v59 = vld [vmem:[#allocation3 + $0x120] ss:$16 sps:$4 sm:$0xff]  }
 0x17e   :  { %2495 = vmatprep.subr.bf16.mxu1 %v8330_v26  ;;  %v8351_v20 = vld [vmem:[#allocation3 + $0x320] ss:$16 sps:$4 sm:$0xff]   ;;  %v8352_v26 = vld [vmem:[#allocation3 + $0x104] ss:$16 sps:$4 sm:$0xff]  }
 0x180   :  { %2455 = vmatpush2.bf16.msra.mxu0 %v8332_v24  ;;  %v8354_v24 = vld [vmem:[#allocation3 + $0x304] ss:$16 sps:$4 sm:$0xff]  }
 0x181   :  { %2496 = vmatpush2.bf16.msra.mxu1 %v8333_v50  ;;  %2456 = vmatprep.subr.bf16.mxu0 %v8334_v22  ;;  %v8356_v50 = vld [vmem:[#allocation3 + $0x100] ss:$16 sps:$4 sm:$0xff]  }
 0x182   :  { %2497 = vmatprep.subr.bf16.mxu1 %v8336_v27  ;;  %v8357_v22 = vld [vmem:[#allocation3 + $0x300] ss:$16 sps:$4 sm:$0xff]   ;;  %v8360_v27 = vld [vmem:[#allocation3 + $0x4e4] ss:$16 sps:$4 sm:$0xff]  }
 0x184   :  { %2457 = vmatpush2.bf16.msra.mxu0 %v8338_v56  ;;  %v8363_v56 = vld [vmem:[#allocation3 + $0x6e4] ss:$16 sps:$4 sm:$0xff]  }
 0x185   :  { %2498 = vmatpush2.bf16.msra.mxu1 %v8339_v53  ;;  %2458 = vmatprep.subr.bf16.mxu0 %v8340_v48  ;;  %v10235_v53 = vmax.f32 %v9700_v54, 0.0 }
 0x186   :  { %2499 = vmatprep.subr.bf16.mxu1 %v8342_v51  ;;  %v10236_v51 = vmax.f32 %v9719_v60, 0.0 }
 0x187   :  { %v9743_v48 = vpack.c.bf16 %v10235_v53, %v10235_v53  ;;  %v8381_v53 = vld [vmem:[#allocation3 + $0x684] ss:$16 sps:$4 sm:$0xff]  }
 0x188   :  { %2459 = vmatpush2.bf16.msra.mxu0 %v8344_v58  ;;  %v9748_v58 = vpack.c.bf16 %v10236_v51, %v10236_v51  ;;  %v8376_v51 = vld [vmem:[#allocation3 + $0x480] ss:$16 sps:$4 sm:$0xff]  }
 0x189   :  { %2500 = vmatpush2.bf16.msra.mxu1 %v8345_v61  ;;  %2460 = vmatprep.subr.bf16.mxu0 %v8346_v19  ;;  %v8358_v61 = vld [vmem:[#allocation3 + $0x4e0] ss:$16 sps:$4 sm:$0xff]  }
 0x18a   :  { %2501 = vmatprep.subr.bf16.mxu1 %v8348_v23  ;;  %v8361_v19 = vld [vmem:[#allocation3 + $0x6e0] ss:$16 sps:$4 sm:$0xff]   ;;  %v8366_v23 = vld [vmem:[#allocation3 + $0x4c4] ss:$16 sps:$4 sm:$0xff]  }
 0x18c   :  { %2461 = vmatpush2.bf16.msra.mxu0 %v8350_v59  ;;  %v8369_v59 = vld [vmem:[#allocation3 + $0x6c4] ss:$16 sps:$4 sm:$0xff]  }
 0x18d   :  { %2502 = vmatpush2.bf16.msra.mxu1 %v8351_v20  ;;  %2462 = vmatprep.subr.bf16.mxu0 %v8352_v26  ;;  %v10237_v20 = vmax.f32 %v9731_v28, 0.0  ;;  %v10238_v26 = vmax.f32 %v9715_v52, 0.0  ;;  %v8375_v28 = vld [vmem:[#allocation3 + $0x6a4] ss:$16 sps:$4 sm:$0xff]   ;;  %v8370_v52 = vld [vmem:[#allocation3 + $0x4a0] ss:$16 sps:$4 sm:$0xff]  }
 0x18e   :  { %2503 = vmatprep.subr.bf16.mxu1 %v8354_v24  ;;  %v8364_v24 = vld [vmem:[#allocation3 + $0x4c0] ss:$16 sps:$4 sm:$0xff]  }
 0x18f   :  { %v9753_v54 = vpack.c.bf16 %v10237_v20, %v10237_v20  ;;  %v9758_v60 = vpack.c.bf16 %v10238_v26, %v10238_v26  ;;  %v8379_v20 = vld [vmem:[#allocation3 + $0x680] ss:$16 sps:$4 sm:$0xff]   ;;  %v8390_v26 = vld [vmem:[#allocation3 + $0x444] ss:$16 sps:$4 sm:$0xff]  }
 0x190   :  { %2463 = vmatpush2.bf16.msra.mxu0 %v8356_v50  ;;  %v8367_v50 = vld [vmem:[#allocation3 + $0x6c0] ss:$16 sps:$4 sm:$0xff]  }
 0x191   :  { %2504 = vmatpush2.bf16.msra.mxu1 %v8357_v22  ;;  %2514 = vmatprep.subr.bf16.mxu0 %v8360_v27  ;;  %v8372_v22 = vld [vmem:[#allocation3 + $0x4a4] ss:$16 sps:$4 sm:$0xff]   ;;  %v8373_v27 = vld [vmem:[#allocation3 + $0x6a0] ss:$16 sps:$4 sm:$0xff]  }
 0x192   :  { %2555 = vmatprep.subr.bf16.mxu1 %v8363_v56  ;;  %v8378_v56 = vld [vmem:[#allocation3 + $0x484] ss:$16 sps:$4 sm:$0xff]  }
 0x193   :  { %2465 = vmatmul.mubr.bf16.vlgmr.msra.gmra.mxu0 %v9743_v48 }
 0x194   :  { %2506 = vmatmul.mubr.bf16.vlgmr.msra.gmra.mxu1 %v9748_v58  ;;  %2515 = vmatpush1.bf16.msra.mxu0 %v8358_v61  ;;  %v8384_v61 = vld [vmem:[#allocation3 + $0x464] ss:$16 sps:$4 sm:$0xff]  }
 0x195   :  { %2556 = vmatpush1.bf16.msra.mxu1 %v8361_v19  ;;  %2516 = vmatprep.subr.bf16.mxu0 %v8366_v23  ;;  %v8387_v19 = vld [vmem:[#allocation3 + $0x664] ss:$16 sps:$4 sm:$0xff]   ;;  %v8382_v23 = vld [vmem:[#allocation3 + $0x460] ss:$16 sps:$4 sm:$0xff]  }
 0x196   :  { %2557 = vmatprep.subr.bf16.mxu1 %v8369_v59  ;;  %2546 = vmatprep.mubr.bf16.mxu0 %v9753_v54  ;;  %v8385_v59 = vld [vmem:[#allocation3 + $0x660] ss:$16 sps:$4 sm:$0xff]  }
 0x197   :  { %2587 = vmatprep.mubr.bf16.mxu1 %v9758_v60 }
 0x198   :  { %2517 = vmatpush1.bf16.msra.mxu0 %v8364_v24  ;;  %v8393_v24 = vld [vmem:[#allocation3 + $0x644] ss:$16 sps:$4 sm:$0xff]  }
 0x199   :  { %2558 = vmatpush1.bf16.msra.mxu1 %v8367_v50  ;;  %2518 = vmatprep.subr.bf16.mxu0 %v8372_v22  ;;  %v8388_v50 = vld [vmem:[#allocation3 + $0x440] ss:$16 sps:$4 sm:$0xff]  }
 0x19a   :  { %2559 = vmatprep.subr.bf16.mxu1 %v8375_v28  ;;  %v8391_v22 = vld [vmem:[#allocation3 + $0x640] ss:$16 sps:$4 sm:$0xff]   ;;  %v8396_v28 = vld [vmem:[#allocation3 + $0x424] ss:$16 sps:$4 sm:$0xff]  }
 0x19c   :  { %2519 = vmatpush1.bf16.msra.mxu0 %v8370_v52  ;;  %v8399_v52 = vld [vmem:[#allocation3 + $0x624] ss:$16 sps:$4 sm:$0xff]  }
 0x19d   :  { %2560 = vmatpush1.bf16.msra.mxu1 %v8373_v27  ;;  %2520 = vmatprep.subr.bf16.mxu0 %v8378_v56  ;;  %v8394_v27 = vld [vmem:[#allocation3 + $0x420] ss:$16 sps:$4 sm:$0xff]  }
 0x19e   :  { %2561 = vmatprep.subr.bf16.mxu1 %v8381_v53  ;;  %v8397_v56 = vld [vmem:[#allocation3 + $0x620] ss:$16 sps:$4 sm:$0xff]   ;;  %v8402_v53 = vld [vmem:[#allocation3 + $0x404] ss:$16 sps:$4 sm:$0xff]  }
 0x1a0   :  { %2521 = vmatpush1.bf16.msra.mxu0 %v8376_v51  ;;  %v8405_v51 = vld [vmem:[#allocation3 + $0x604] ss:$16 sps:$4 sm:$0xff]  }
 0x1a1   :  { %2562 = vmatpush1.bf16.msra.mxu1 %v8379_v20  ;;  %2522 = vmatprep.subr.bf16.mxu0 %v8384_v61  ;;  %v8400_v20 = vld [vmem:[#allocation3 + $0x400] ss:$16 sps:$4 sm:$0xff]  }
 0x1a2   :  { %2563 = vmatprep.subr.bf16.mxu1 %v8387_v19  ;;  %v8403_v61 = vld [vmem:[#allocation3 + $0x600] ss:$16 sps:$4 sm:$0xff]   ;;  %v8408_v19 = vld [vmem:[#allocation3 + $0x5e4] ss:$16 sps:$4 sm:$0xff]  }
 0x1a4   :  { %2523 = vmatpush1.bf16.msra.mxu0 %v8382_v23  ;;  %v8411_v23 = vld [vmem:[#allocation3 + $0x7e4] ss:$16 sps:$4 sm:$0xff]  }
 0x1a5   :  { %2564 = vmatpush1.bf16.msra.mxu1 %v8385_v59  ;;  %2524 = vmatprep.subr.bf16.mxu0 %v8390_v26  ;;  %v8406_v59 = vld [vmem:[#allocation3 + $0x5e0] ss:$16 sps:$4 sm:$0xff]  }
 0x1a6   :  { %2565 = vmatprep.subr.bf16.mxu1 %v8393_v24  ;;  %v8409_v26 = vld [vmem:[#allocation3 + $0x7e0] ss:$16 sps:$4 sm:$0xff]   ;;  %v8414_v24 = vld [vmem:[#allocation3 + $0x5c4] ss:$16 sps:$4 sm:$0xff]  }
 0x1a8   :  { %2525 = vmatpush1.bf16.msra.mxu0 %v8388_v50  ;;  %v8417_v50 = vld [vmem:[#allocation3 + $0x7c4] ss:$16 sps:$4 sm:$0xff]  }
 0x1a9   :  { %2566 = vmatpush1.bf16.msra.mxu1 %v8391_v22  ;;  %2526 = vmatprep.subr.bf16.mxu0 %v8396_v28  ;;  %v8412_v22 = vld [vmem:[#allocation3 + $0x5c0] ss:$16 sps:$4 sm:$0xff]  }
 0x1aa   :  { %2567 = vmatprep.subr.bf16.mxu1 %v8399_v52  ;;  %v8415_v28 = vld [vmem:[#allocation3 + $0x7c0] ss:$16 sps:$4 sm:$0xff]   ;;  %v8420_v52 = vld [vmem:[#allocation3 + $0x5a4] ss:$16 sps:$4 sm:$0xff]  }
 0x1ac   :  { %2527 = vmatpush1.bf16.msra.mxu0 %v8394_v27  ;;  %v8423_v27 = vld [vmem:[#allocation3 + $0x7a4] ss:$16 sps:$4 sm:$0xff]  }
 0x1ad   :  { %2568 = vmatpush1.bf16.msra.mxu1 %v8397_v56  ;;  %2528 = vmatprep.subr.bf16.mxu0 %v8402_v53  ;;  %v8418_v56 = vld [vmem:[#allocation3 + $0x5a0] ss:$16 sps:$4 sm:$0xff]  }
 0x1ae   :  { %2569 = vmatprep.subr.bf16.mxu1 %v8405_v51  ;;  %v8421_v53 = vld [vmem:[#allocation3 + $0x7a0] ss:$16 sps:$4 sm:$0xff]   ;;  %v8426_v51 = vld [vmem:[#allocation3 + $0x584] ss:$16 sps:$4 sm:$0xff]  }
 0x1b0   :  { %2529 = vmatpush1.bf16.msra.mxu0 %v8400_v20  ;;  %v8429_v20 = vld [vmem:[#allocation3 + $0x784] ss:$16 sps:$4 sm:$0xff]  }
 0x1b1   :  { %2570 = vmatpush1.bf16.msra.mxu1 %v8403_v61  ;;  %2530 = vmatprep.subr.bf16.mxu0 %v8408_v19  ;;  %v8424_v61 = vld [vmem:[#allocation3 + $0x580] ss:$16 sps:$4 sm:$0xff]  }
 0x1b2   :  { %2571 = vmatprep.subr.bf16.mxu1 %v8411_v23  ;;  %v8427_v19 = vld [vmem:[#allocation3 + $0x780] ss:$16 sps:$4 sm:$0xff]   ;;  %v8432_v23 = vld [vmem:[#allocation3 + $0x564] ss:$16 sps:$4 sm:$0xff]  }
 0x1b4   :  { %2531 = vmatpush2.bf16.msra.mxu0 %v8406_v59  ;;  %v8435_v59 = vld [vmem:[#allocation3 + $0x764] ss:$16 sps:$4 sm:$0xff]  }
 0x1b5   :  { %2572 = vmatpush2.bf16.msra.mxu1 %v8409_v26  ;;  %2532 = vmatprep.subr.bf16.mxu0 %v8414_v24  ;;  %v8430_v26 = vld [vmem:[#allocation3 + $0x560] ss:$16 sps:$4 sm:$0xff]  }
 0x1b6   :  { %2573 = vmatprep.subr.bf16.mxu1 %v8417_v50  ;;  %v8433_v24 = vld [vmem:[#allocation3 + $0x760] ss:$16 sps:$4 sm:$0xff]   ;;  %v8438_v50 = vld [vmem:[#allocation3 + $0x544] ss:$16 sps:$4 sm:$0xff]  }
 0x1b8   :  { %2533 = vmatpush2.bf16.msra.mxu0 %v8412_v22  ;;  %v8441_v22 = vld [vmem:[#allocation3 + $0x744] ss:$16 sps:$4 sm:$0xff]  }
 0x1b9   :  { %2574 = vmatpush2.bf16.msra.mxu1 %v8415_v28  ;;  %2534 = vmatprep.subr.bf16.mxu0 %v8420_v52  ;;  %v8436_v28 = vld [vmem:[#allocation3 + $0x540] ss:$16 sps:$4 sm:$0xff]  }
 0x1ba   :  { %2575 = vmatprep.subr.bf16.mxu1 %v8423_v27  ;;  %v8439_v52 = vld [vmem:[#allocation3 + $0x740] ss:$16 sps:$4 sm:$0xff]   ;;  %v8444_v27 = vld [vmem:[#allocation3 + $0x524] ss:$16 sps:$4 sm:$0xff]  }
 0x1bc   :  { %2535 = vmatpush2.bf16.msra.mxu0 %v8418_v56  ;;  %v8447_v56 = vld [vmem:[#allocation3 + $0x724] ss:$16 sps:$4 sm:$0xff]  }
 0x1bd   :  { %2576 = vmatpush2.bf16.msra.mxu1 %v8421_v53  ;;  %2536 = vmatprep.subr.bf16.mxu0 %v8426_v51  ;;  %v8442_v53 = vld [vmem:[#allocation3 + $0x520] ss:$16 sps:$4 sm:$0xff]  }
 0x1be   :  { %2577 = vmatprep.subr.bf16.mxu1 %v8429_v20  ;;  %v8445_v51 = vld [vmem:[#allocation3 + $0x720] ss:$16 sps:$4 sm:$0xff]   ;;  %v8450_v20 = vld [vmem:[#allocation3 + $0x504] ss:$16 sps:$4 sm:$0xff]  }
 0x1c0   :  { %2537 = vmatpush2.bf16.msra.mxu0 %v8424_v61  ;;  %v8453_v61 = vld [vmem:[#allocation3 + $0x704] ss:$16 sps:$4 sm:$0xff]  }
 0x1c1   :  { %2578 = vmatpush2.bf16.msra.mxu1 %v8427_v19  ;;  %2538 = vmatprep.subr.bf16.mxu0 %v8432_v23  ;;  %v8448_v19 = vld [vmem:[#allocation3 + $0x500] ss:$16 sps:$4 sm:$0xff]  }
 0x1c2   :  { %2579 = vmatprep.subr.bf16.mxu1 %v8435_v59  ;;  %v8451_v23 = vld [vmem:[#allocation3 + $0x700] ss:$16 sps:$4 sm:$0xff]   ;;  %v8456_v59 = vld [vmem:[#allocation3 + $0xec] ss:$16 sps:$4 sm:$0xff]  }
 0x1c4   :  { %2539 = vmatpush2.bf16.msra.mxu0 %v8430_v26  ;;  %v8459_v26 = vld [vmem:[#allocation3 + $0x2ec] ss:$16 sps:$4 sm:$0xff]  }
 0x1c5   :  { %2580 = vmatpush2.bf16.msra.mxu1 %v8433_v24  ;;  %2540 = vmatprep.subr.bf16.mxu0 %v8438_v50  ;;  %v10239_v24 = vmax.f32 %v9728_v21, 0.0  ;;  %v8460_v21 = vld [vmem:[#allocation3 + $0xc8] ss:$16 sps:$4 sm:$0xff]  }
 0x1c6   :  { %2581 = vmatprep.subr.bf16.mxu1 %v8441_v22  ;;  %v10240_v22 = vmax.f32 %v9711_v25, 0.0  ;;  %v8468_v25 = vld [vmem:[#allocation3 + $0xac] ss:$16 sps:$4 sm:$0xff]  }
 0x1c7   :  { %v9767_v50 = vpack.c.bf16 %v10239_v24, %v10239_v24  ;;  %v8475_v24 = vld [vmem:[#allocation3 + $0x288] ss:$16 sps:$4 sm:$0xff]  }
 0x1c8   :  { %2541 = vmatpush2.bf16.msra.mxu0 %v8436_v28  ;;  %v9772_v28 = vpack.c.bf16 %v10240_v22, %v10240_v22  ;;  %v8480_v22 = vld [vmem:[#allocation3 + $0x6c] ss:$16 sps:$4 sm:$0xff]  }
 0x1c9   :  { %2582 = vmatpush2.bf16.msra.mxu1 %v8439_v52  ;;  %2542 = vmatprep.subr.bf16.mxu0 %v8444_v27  ;;  %v8454_v52 = vld [vmem:[#allocation3 + $0xe8] ss:$16 sps:$4 sm:$0xff]  }
 0x1ca   :  { %2583 = vmatprep.subr.bf16.mxu1 %v8447_v56  ;;  %v8457_v27 = vld [vmem:[#allocation3 + $0x2e8] ss:$16 sps:$4 sm:$0xff]   ;;  %v8462_v56 = vld [vmem:[#allocation3 + $0xcc] ss:$16 sps:$4 sm:$0xff]  }
 0x1cc   :  { %2543 = vmatpush2.bf16.msra.mxu0 %v8442_v53  ;;  %v8465_v53 = vld [vmem:[#allocation3 + $0x2cc] ss:$16 sps:$4 sm:$0xff]  }
 0x1cd   :  { %2584 = vmatpush2.bf16.msra.mxu1 %v8445_v51  ;;  %2544 = vmatprep.subr.bf16.mxu0 %v8450_v20  ;;  %v8463_v51 = vld [vmem:[#allocation3 + $0x2c8] ss:$16 sps:$4 sm:$0xff]   ;;  %v8471_v20 = vld [vmem:[#allocation3 + $0x2ac] ss:$16 sps:$4 sm:$0xff]  }
 0x1ce   :  { %2585 = vmatprep.subr.bf16.mxu1 %v8453_v61  ;;  %v8466_v61 = vld [vmem:[#allocation3 + $0xa8] ss:$16 sps:$4 sm:$0xff]  }
 0x1d0   :  { %2545 = vmatpush2.bf16.msra.mxu0 %v8448_v19  ;;  %v8469_v19 = vld [vmem:[#allocation3 + $0x2a8] ss:$16 sps:$4 sm:$0xff]  }
 0x1d1   :  { %2586 = vmatpush2.bf16.msra.mxu1 %v8451_v23  ;;  %2596 = vmatprep.subr.bf16.mxu0 %v8456_v59  ;;  %v8474_v23 = vld [vmem:[#allocation3 + $0x8c] ss:$16 sps:$4 sm:$0xff]  }
 0x1d2   :  { %2637 = vmatprep.subr.bf16.mxu1 %v8459_v26  ;;  %v8477_v59 = vld [vmem:[#allocation3 + $0x28c] ss:$16 sps:$4 sm:$0xff]   ;;  %v8472_v26 = vld [vmem:[#allocation3 + $0x88] ss:$16 sps:$4 sm:$0xff]  }
 0x1d3   :  { %2547 = vmatmul.mubr.bf16.vlgmr.msra.gmra.mxu0 %v9767_v50 }
 0x1d4   :  { %2588 = vmatmul.mubr.bf16.vlgmr.msra.gmra.mxu1 %v9772_v28  ;;  %2597 = vmatpush1.bf16.msra.mxu0 %v8454_v52  ;;  %v8483_v52 = vld [vmem:[#allocation3 + $0x26c] ss:$16 sps:$4 sm:$0xff]  }
 0x1d5   :  { %2638 = vmatpush1.bf16.msra.mxu1 %v8457_v27  ;;  %2598 = vmatprep.subr.bf16.mxu0 %v8462_v56  ;;  %v8478_v27 = vld [vmem:[#allocation3 + $0x68] ss:$16 sps:$4 sm:$0xff]   ;;  %v8489_v56 = vld [vmem:[#allocation3 + $0x24c] ss:$16 sps:$4 sm:$0xff]  }
 0x1d6   :  { %2639 = vmatprep.subr.bf16.mxu1 %v8465_v53  ;;  %2628 = vmatprep.mubr.bf16.mxu0 %v9734_v57  ;;  %v8481_v57 = vld [vmem:[#allocation3 + $0x268] ss:$16 sps:$4 sm:$0xff]  }
 0x1d7   :  { %2669 = vmatprep.mubr.bf16.mxu1 %v9736_v17  ;;  %v8486_v17 = vld [vmem:[#allocation3 + $0x4c] ss:$16 sps:$4 sm:$0xff]   ;;  %v8484_v53 = vld [vmem:[#allocation3 + $0x48] ss:$16 sps:$4 sm:$0xff]  }
 0x1d8   :  { %2599 = vmatpush1.bf16.msra.mxu0 %v8460_v21  ;;  %v8487_v21 = vld [vmem:[#allocation3 + $0x248] ss:$16 sps:$4 sm:$0xff]  }
 0x1d9   :  { %2640 = vmatpush1.bf16.msra.mxu1 %v8463_v51  ;;  %2600 = vmatprep.subr.bf16.mxu0 %v8468_v25  ;;  %v8492_v51 = vld [vmem:[#allocation3 + $0x2c] ss:$16 sps:$4 sm:$0xff]  }
 0x1da   :  { %2641 = vmatprep.subr.bf16.mxu1 %v8471_v20  ;;  %v8495_v25 = vld [vmem:[#allocation3 + $0x22c] ss:$16 sps:$4 sm:$0xff]   ;;  %v8490_v20 = vld [vmem:[#allocation3 + $0x28] ss:$16 sps:$4 sm:$0xff]  }
 0x1dc   :  { %2601 = vmatpush1.bf16.msra.mxu0 %v8466_v61  ;;  %v8493_v61 = vld [vmem:[#allocation3 + $0x228] ss:$16 sps:$4 sm:$0xff]  }
 0x1dd   :  { %2642 = vmatpush1.bf16.msra.mxu1 %v8469_v19  ;;  %2602 = vmatprep.subr.bf16.mxu0 %v8474_v23  ;;  %v8498_v19 = vld [vmem:[#allocation3 + $0xc] ss:$16 sps:$4 sm:$0xff]  }
 0x1de   :  { %2643 = vmatprep.subr.bf16.mxu1 %v8477_v59  ;;  %v8501_v23 = vld [vmem:[#allocation3 + $0x20c] ss:$16 sps:$4 sm:$0xff]   ;;  %v8496_v59 = vld [vmem:[#allocation3 + $0x8] ss:$16 sps:$4 sm:$0xff]  }
 0x1e0   :  { %2603 = vmatpush1.bf16.msra.mxu0 %v8472_v26  ;;  %v8499_v26 = vld [vmem:[#allocation3 + $0x208] ss:$16 sps:$4 sm:$0xff]  }
 0x1e1   :  { %2644 = vmatpush1.bf16.msra.mxu1 %v8475_v24  ;;  %2604 = vmatprep.subr.bf16.mxu0 %v8480_v22  ;;  %v8504_v24 = vld [vmem:[#allocation3 + $0x1ec] ss:$16 sps:$4 sm:$0xff]  }
 0x1e2   :  { %2645 = vmatprep.subr.bf16.mxu1 %v8483_v52  ;;  %v8507_v22 = vld [vmem:[#allocation3 + $0x3ec] ss:$16 sps:$4 sm:$0xff]   ;;  %v8502_v52 = vld [vmem:[#allocation3 + $0x1e8] ss:$16 sps:$4 sm:$0xff]  }
 0x1e4   :  { %2605 = vmatpush1.bf16.msra.mxu0 %v8478_v27  ;;  %v8505_v27 = vld [vmem:[#allocation3 + $0x3e8] ss:$16 sps:$4 sm:$0xff]  }
 0x1e5   :  { %2646 = vmatpush1.bf16.msra.mxu1 %v8481_v57  ;;  %2606 = vmatprep.subr.bf16.mxu0 %v8486_v17  ;;  %v8510_v57 = vld [vmem:[#allocation3 + $0x1cc] ss:$16 sps:$4 sm:$0xff]  }
 0x1e6   :  { %2647 = vmatprep.subr.bf16.mxu1 %v8489_v56  ;;  %v8513_v17 = vld [vmem:[#allocation3 + $0x3cc] ss:$16 sps:$4 sm:$0xff]   ;;  %v8508_v56 = vld [vmem:[#allocation3 + $0x1c8] ss:$16 sps:$4 sm:$0xff]  }
 0x1e8   :  { %2607 = vmatpush1.bf16.msra.mxu0 %v8484_v53  ;;  %v8511_v53 = vld [vmem:[#allocation3 + $0x3c8] ss:$16 sps:$4 sm:$0xff]  }
 0x1e9   :  { %2648 = vmatpush1.bf16.msra.mxu1 %v8487_v21  ;;  %2608 = vmatprep.subr.bf16.mxu0 %v8492_v51  ;;  %v8516_v21 = vld [vmem:[#allocation3 + $0x1ac] ss:$16 sps:$4 sm:$0xff]  }
 0x1ea   :  { %2649 = vmatprep.subr.bf16.mxu1 %v8495_v25  ;;  %v8519_v51 = vld [vmem:[#allocation3 + $0x3ac] ss:$16 sps:$4 sm:$0xff]   ;;  %v8514_v25 = vld [vmem:[#allocation3 + $0x1a8] ss:$16 sps:$4 sm:$0xff]  }
 0x1ec   :  { %2609 = vmatpush1.bf16.msra.mxu0 %v8490_v20  ;;  %v8517_v20 = vld [vmem:[#allocation3 + $0x3a8] ss:$16 sps:$4 sm:$0xff]  }
 0x1ed   :  { %2650 = vmatpush1.bf16.msra.mxu1 %v8493_v61  ;;  %2610 = vmatprep.subr.bf16.mxu0 %v8498_v19  ;;  %v8522_v61 = vld [vmem:[#allocation3 + $0x18c] ss:$16 sps:$4 sm:$0xff]  }
 0x1ee   :  { %2651 = vmatprep.subr.bf16.mxu1 %v8501_v23  ;;  %v8525_v19 = vld [vmem:[#allocation3 + $0x38c] ss:$16 sps:$4 sm:$0xff]   ;;  %v8520_v23 = vld [vmem:[#allocation3 + $0x188] ss:$16 sps:$4 sm:$0xff]  }
 0x1f0   :  { %2611 = vmatpush1.bf16.msra.mxu0 %v8496_v59  ;;  %v8523_v59 = vld [vmem:[#allocation3 + $0x388] ss:$16 sps:$4 sm:$0xff]  }
 0x1f1   :  { %2652 = vmatpush1.bf16.msra.mxu1 %v8499_v26  ;;  %2612 = vmatprep.subr.bf16.mxu0 %v8504_v24  ;;  %v8528_v26 = vld [vmem:[#allocation3 + $0x16c] ss:$16 sps:$4 sm:$0xff]  }
 0x1f2   :  { %2653 = vmatprep.subr.bf16.mxu1 %v8507_v22  ;;  %v8531_v24 = vld [vmem:[#allocation3 + $0x36c] ss:$16 sps:$4 sm:$0xff]   ;;  %v8526_v22 = vld [vmem:[#allocation3 + $0x168] ss:$16 sps:$4 sm:$0xff]  }
 0x1f4   :  { %2613 = vmatpush2.bf16.msra.mxu0 %v8502_v52  ;;  %v8529_v52 = vld [vmem:[#allocation3 + $0x368] ss:$16 sps:$4 sm:$0xff]  }
 0x1f5   :  { %2654 = vmatpush2.bf16.msra.mxu1 %v8505_v27  ;;  %2614 = vmatprep.subr.bf16.mxu0 %v8510_v57  ;;  %v8534_v27 = vld [vmem:[#allocation3 + $0x14c] ss:$16 sps:$4 sm:$0xff]  }
 0x1f6   :  { %2655 = vmatprep.subr.bf16.mxu1 %v8513_v17  ;;  %v8537_v57 = vld [vmem:[#allocation3 + $0x34c] ss:$16 sps:$4 sm:$0xff]   ;;  %v8532_v17 = vld [vmem:[#allocation3 + $0x148] ss:$16 sps:$4 sm:$0xff]  }
 0x1f8   :  { %2615 = vmatpush2.bf16.msra.mxu0 %v8508_v56  ;;  %v8535_v56 = vld [vmem:[#allocation3 + $0x348] ss:$16 sps:$4 sm:$0xff]  }
 0x1f9   :  { %2656 = vmatpush2.bf16.msra.mxu1 %v8511_v53  ;;  %2616 = vmatprep.subr.bf16.mxu0 %v8516_v21  ;;  %v8540_v53 = vld [vmem:[#allocation3 + $0x12c] ss:$16 sps:$4 sm:$0xff]  }
 0x1fa   :  { %2657 = vmatprep.subr.bf16.mxu1 %v8519_v51  ;;  %v8543_v21 = vld [vmem:[#allocation3 + $0x32c] ss:$16 sps:$4 sm:$0xff]   ;;  %v8538_v51 = vld [vmem:[#allocation3 + $0x128] ss:$16 sps:$4 sm:$0xff]  }
 0x1fc   :  { %2617 = vmatpush2.bf16.msra.mxu0 %v8514_v25  ;;  %v8541_v25 = vld [vmem:[#allocation3 + $0x328] ss:$16 sps:$4 sm:$0xff]  }
 0x1fd   :  { %2658 = vmatpush2.bf16.msra.mxu1 %v8517_v20  ;;  %2618 = vmatprep.subr.bf16.mxu0 %v8522_v61  ;;  %v8546_v20 = vld [vmem:[#allocation3 + $0x10c] ss:$16 sps:$4 sm:$0xff]  }
 0x1fe   :  { %2659 = vmatprep.subr.bf16.mxu1 %v8525_v19  ;;  %v8549_v61 = vld [vmem:[#allocation3 + $0x30c] ss:$16 sps:$4 sm:$0xff]   ;;  %v8544_v19 = vld [vmem:[#allocation3 + $0x108] ss:$16 sps:$4 sm:$0xff]  }
 0x200   :  { %2619 = vmatpush2.bf16.msra.mxu0 %v8520_v23  ;;  %v8547_v23 = vld [vmem:[#allocation3 + $0x308] ss:$16 sps:$4 sm:$0xff]  }
 0x201   :  { %2660 = vmatpush2.bf16.msra.mxu1 %v8523_v59  ;;  %2620 = vmatprep.subr.bf16.mxu0 %v8528_v26  ;;  %v8552_v59 = vld [vmem:[#allocation3 + $0x4ec] ss:$16 sps:$4 sm:$0xff]  }
 0x202   :  { %2661 = vmatprep.subr.bf16.mxu1 %v8531_v24  ;;  %v8555_v26 = vld [vmem:[#allocation3 + $0x6ec] ss:$16 sps:$4 sm:$0xff]   ;;  %v8550_v24 = vld [vmem:[#allocation3 + $0x4e8] ss:$16 sps:$4 sm:$0xff]  }
 0x204   :  { %2621 = vmatpush2.bf16.msra.mxu0 %v8526_v22  ;;  %v8553_v22 = vld [vmem:[#allocation3 + $0x6e8] ss:$16 sps:$4 sm:$0xff]  }
 0x205   :  { %2662 = vmatpush2.bf16.msra.mxu1 %v8529_v52  ;;  %2622 = vmatprep.subr.bf16.mxu0 %v8534_v27  ;;  %v8558_v52 = vld [vmem:[#allocation3 + $0x4cc] ss:$16 sps:$4 sm:$0xff]  }
 0x206   :  { %2663 = vmatprep.subr.bf16.mxu1 %v8537_v57  ;;  %v8561_v27 = vld [vmem:[#allocation3 + $0x6cc] ss:$16 sps:$4 sm:$0xff]   ;;  %v8556_v57 = vld [vmem:[#allocation3 + $0x4c8] ss:$16 sps:$4 sm:$0xff]  }
 0x208   :  { %2623 = vmatpush2.bf16.msra.mxu0 %v8532_v17  ;;  %v8559_v17 = vld [vmem:[#allocation3 + $0x6c8] ss:$16 sps:$4 sm:$0xff]  }
 0x209   :  { %2664 = vmatpush2.bf16.msra.mxu1 %v8535_v56  ;;  %2624 = vmatprep.subr.bf16.mxu0 %v8540_v53  ;;  %v8564_v56 = vld [vmem:[#allocation3 + $0x4ac] ss:$16 sps:$4 sm:$0xff]  }
 0x20a   :  { %2665 = vmatprep.subr.bf16.mxu1 %v8543_v21  ;;  %v8567_v53 = vld [vmem:[#allocation3 + $0x6ac] ss:$16 sps:$4 sm:$0xff]   ;;  %v8562_v21 = vld [vmem:[#allocation3 + $0x4a8] ss:$16 sps:$4 sm:$0xff]  }
 0x20c   :  { %2625 = vmatpush2.bf16.msra.mxu0 %v8538_v51  ;;  %v8565_v51 = vld [vmem:[#allocation3 + $0x6a8] ss:$16 sps:$4 sm:$0xff]  }
 0x20d   :  { %2666 = vmatpush2.bf16.msra.mxu1 %v8541_v25  ;;  %2626 = vmatprep.subr.bf16.mxu0 %v8546_v20  ;;  %v8568_v25 = vld [vmem:[#allocation3 + $0x488] ss:$16 sps:$4 sm:$0xff]  }
 0x20e   :  { %2667 = vmatprep.subr.bf16.mxu1 %v8549_v61  ;;  %v8571_v20 = vld [vmem:[#allocation3 + $0x688] ss:$16 sps:$4 sm:$0xff]   ;;  %v8576_v61 = vld [vmem:[#allocation3 + $0x46c] ss:$16 sps:$4 sm:$0xff]  }
 0x210   :  { %2627 = vmatpush2.bf16.msra.mxu0 %v8544_v19  ;;  %v8579_v19 = vld [vmem:[#allocation3 + $0x66c] ss:$16 sps:$4 sm:$0xff]  }
 0x211   :  { %2668 = vmatpush2.bf16.msra.mxu1 %v8547_v23  ;;  %2678 = vmatprep.subr.bf16.mxu0 %v8552_v59  ;;  %v8582_v23 = vld [vmem:[#allocation3 + $0x44c] ss:$16 sps:$4 sm:$0xff]  }
 0x212   :  { %2719 = vmatprep.subr.bf16.mxu1 %v8555_v26  ;;  %v8585_v59 = vld [vmem:[#allocation3 + $0x64c] ss:$16 sps:$4 sm:$0xff]   ;;  %v8580_v26 = vld [vmem:[#allocation3 + $0x448] ss:$16 sps:$4 sm:$0xff]  }
 0x213   :  { %2629 = vmatmul.mubr.bf16.vlgmr.msra.gmra.mxu0 %v9743_v48  ;;  %v8570_v48 = vld [vmem:[#allocation3 + $0x48c] ss:$16 sps:$4 sm:$0xff]  }
 0x214   :  { %2670 = vmatmul.mubr.bf16.vlgmr.msra.gmra.mxu1 %v9748_v58  ;;  %2679 = vmatpush1.bf16.msra.mxu0 %v8550_v24  ;;  %v8573_v58 = vld [vmem:[#allocation3 + $0x68c] ss:$16 sps:$4 sm:$0xff]   ;;  %v8583_v24 = vld [vmem:[#allocation3 + $0x648] ss:$16 sps:$4 sm:$0xff]  }
 0x215   :  { %2720 = vmatpush1.bf16.msra.mxu1 %v8553_v22  ;;  %2680 = vmatprep.subr.bf16.mxu0 %v8558_v52  ;;  %v8588_v22 = vld [vmem:[#allocation3 + $0x42c] ss:$16 sps:$4 sm:$0xff]  }
 0x216   :  { %2721 = vmatprep.subr.bf16.mxu1 %v8561_v27  ;;  %2710 = vmatprep.mubr.bf16.mxu0 %v9753_v54  ;;  %v8574_v54 = vld [vmem:[#allocation3 + $0x468] ss:$16 sps:$4 sm:$0xff]   ;;  %v8591_v52 = vld [vmem:[#allocation3 + $0x62c] ss:$16 sps:$4 sm:$0xff]  }
 0x217   :  { %2751 = vmatprep.mubr.bf16.mxu1 %v9758_v60  ;;  %v8577_v60 = vld [vmem:[#allocation3 + $0x668] ss:$16 sps:$4 sm:$0xff]  }
 0x218   :  { %2681 = vmatpush1.bf16.msra.mxu0 %v8556_v57  ;;  %v8586_v27 = vld [vmem:[#allocation3 + $0x428] ss:$16 sps:$4 sm:$0xff]  }
 0x219   :  { %2722 = vmatpush1.bf16.msra.mxu1 %v8559_v17  ;;  %2682 = vmatprep.subr.bf16.mxu0 %v8564_v56  ;;  %v8589_v57 = vld [vmem:[#allocation3 + $0x628] ss:$16 sps:$4 sm:$0xff]   ;;  %v8594_v17 = vld [vmem:[#allocation3 + $0x40c] ss:$16 sps:$4 sm:$0xff]  }
 0x21a   :  { %2723 = vmatprep.subr.bf16.mxu1 %v8567_v53  ;;  %v8597_v56 = vld [vmem:[#allocation3 + $0x60c] ss:$16 sps:$4 sm:$0xff]   ;;  %v8592_v53 = vld [vmem:[#allocation3 + $0x408] ss:$16 sps:$4 sm:$0xff]  }
 0x21c   :  { %2683 = vmatpush1.bf16.msra.mxu0 %v8562_v21  ;;  %v8595_v21 = vld [vmem:[#allocation3 + $0x608] ss:$16 sps:$4 sm:$0xff]  }
 0x21d   :  { %2724 = vmatpush1.bf16.msra.mxu1 %v8565_v51  ;;  %2684 = vmatprep.subr.bf16.mxu0 %v8570_v48  ;;  %v8600_v51 = vld [vmem:[#allocation3 + $0x5ec] ss:$16 sps:$4 sm:$0xff]  }
 0x21e   :  { %2725 = vmatprep.subr.bf16.mxu1 %v8573_v58  ;;  %v8603_v48 = vld [vmem:[#allocation3 + $0x7ec] ss:$16 sps:$4 sm:$0xff]   ;;  %v8598_v58 = vld [vmem:[#allocation3 + $0x5e8] ss:$16 sps:$4 sm:$0xff]  }
 0x220   :  { %2685 = vmatpush1.bf16.msra.mxu0 %v8568_v25  ;;  %v8601_v25 = vld [vmem:[#allocation3 + $0x7e8] ss:$16 sps:$4 sm:$0xff]  }
 0x221   :  { %2726 = vmatpush1.bf16.msra.mxu1 %v8571_v20  ;;  %2686 = vmatprep.subr.bf16.mxu0 %v8576_v61  ;;  %v8606_v20 = vld [vmem:[#allocation3 + $0x5cc] ss:$16 sps:$4 sm:$0xff]  }
 0x222   :  { %2727 = vmatprep.subr.bf16.mxu1 %v8579_v19  ;;  %v8609_v61 = vld [vmem:[#allocation3 + $0x7cc] ss:$16 sps:$4 sm:$0xff]   ;;  %v8604_v19 = vld [vmem:[#allocation3 + $0x5c8] ss:$16 sps:$4 sm:$0xff]  }
 0x224   :  { %2687 = vmatpush1.bf16.msra.mxu0 %v8574_v54  ;;  %v8607_v54 = vld [vmem:[#allocation3 + $0x7c8] ss:$16 sps:$4 sm:$0xff]  }
 0x225   :  { %2728 = vmatpush1.bf16.msra.mxu1 %v8577_v60  ;;  %2688 = vmatprep.subr.bf16.mxu0 %v8582_v23  ;;  %v8612_v60 = vld [vmem:[#allocation3 + $0x5ac] ss:$16 sps:$4 sm:$0xff]  }
 0x226   :  { %2729 = vmatprep.subr.bf16.mxu1 %v8585_v59  ;;  %v8615_v23 = vld [vmem:[#allocation3 + $0x7ac] ss:$16 sps:$4 sm:$0xff]   ;;  %v8610_v59 = vld [vmem:[#allocation3 + $0x5a8] ss:$16 sps:$4 sm:$0xff]  }
 0x228   :  { %2689 = vmatpush1.bf16.msra.mxu0 %v8580_v26  ;;  %v8613_v26 = vld [vmem:[#allocation3 + $0x7a8] ss:$16 sps:$4 sm:$0xff]  }
 0x229   :  { %2730 = vmatpush1.bf16.msra.mxu1 %v8583_v24  ;;  %2690 = vmatprep.subr.bf16.mxu0 %v8588_v22  ;;  %v8618_v24 = vld [vmem:[#allocation3 + $0x58c] ss:$16 sps:$4 sm:$0xff]  }
 0x22a   :  { %2731 = vmatprep.subr.bf16.mxu1 %v8591_v52  ;;  %v8621_v22 = vld [vmem:[#allocation3 + $0x78c] ss:$16 sps:$4 sm:$0xff]   ;;  %v8616_v52 = vld [vmem:[#allocation3 + $0x588] ss:$16 sps:$4 sm:$0xff]  }
 0x22c   :  { %2691 = vmatpush1.bf16.msra.mxu0 %v8586_v27  ;;  %v8619_v27 = vld [vmem:[#allocation3 + $0x788] ss:$16 sps:$4 sm:$0xff]  }
 0x22d   :  { %2732 = vmatpush1.bf16.msra.mxu1 %v8589_v57  ;;  %2692 = vmatprep.subr.bf16.mxu0 %v8594_v17  ;;  %v8624_v57 = vld [vmem:[#allocation3 + $0x56c] ss:$16 sps:$4 sm:$0xff]  }
 0x22e   :  { %2733 = vmatprep.subr.bf16.mxu1 %v8597_v56  ;;  %v8627_v17 = vld [vmem:[#allocation3 + $0x76c] ss:$16 sps:$4 sm:$0xff]   ;;  %v8622_v56 = vld [vmem:[#allocation3 + $0x568] ss:$16 sps:$4 sm:$0xff]  }
 0x230   :  { %2693 = vmatpush1.bf16.msra.mxu0 %v8592_v53  ;;  %v8625_v53 = vld [vmem:[#allocation3 + $0x768] ss:$16 sps:$4 sm:$0xff]  }
 0x231   :  { %2734 = vmatpush1.bf16.msra.mxu1 %v8595_v21  ;;  %2694 = vmatprep.subr.bf16.mxu0 %v8600_v51  ;;  %v8630_v21 = vld [vmem:[#allocation3 + $0x54c] ss:$16 sps:$4 sm:$0xff]  }
 0x232   :  { %2735 = vmatprep.subr.bf16.mxu1 %v8603_v48  ;;  %v8633_v51 = vld [vmem:[#allocation3 + $0x74c] ss:$16 sps:$4 sm:$0xff]   ;;  %v8628_v48 = vld [vmem:[#allocation3 + $0x548] ss:$16 sps:$4 sm:$0xff]  }
 0x234   :  { %2695 = vmatpush2.bf16.msra.mxu0 %v8598_v58  ;;  %v8631_v58 = vld [vmem:[#allocation3 + $0x748] ss:$16 sps:$4 sm:$0xff]  }
 0x235   :  { %2736 = vmatpush2.bf16.msra.mxu1 %v8601_v25  ;;  %2696 = vmatprep.subr.bf16.mxu0 %v8606_v20  ;;  %v8636_v25 = vld [vmem:[#allocation3 + $0x52c] ss:$16 sps:$4 sm:$0xff]  }
 0x236   :  { %2737 = vmatprep.subr.bf16.mxu1 %v8609_v61  ;;  %v8639_v20 = vld [vmem:[#allocation3 + $0x72c] ss:$16 sps:$4 sm:$0xff]   ;;  %v8634_v61 = vld [vmem:[#allocation3 + $0x528] ss:$16 sps:$4 sm:$0xff]  }
 0x238   :  { %2697 = vmatpush2.bf16.msra.mxu0 %v8604_v19  ;;  %v8637_v19 = vld [vmem:[#allocation3 + $0x728] ss:$16 sps:$4 sm:$0xff]  }
 0x239   :  { %2738 = vmatpush2.bf16.msra.mxu1 %v8607_v54  ;;  %2698 = vmatprep.subr.bf16.mxu0 %v8612_v60  ;;  %v8642_v54 = vld [vmem:[#allocation3 + $0x50c] ss:$16 sps:$4 sm:$0xff]  }
 0x23a   :  { %2739 = vmatprep.subr.bf16.mxu1 %v8615_v23  ;;  %v8645_v60 = vld [vmem:[#allocation3 + $0x70c] ss:$16 sps:$4 sm:$0xff]   ;;  %v8640_v23 = vld [vmem:[#allocation3 + $0x508] ss:$16 sps:$4 sm:$0xff]  }
 0x23c   :  { %2699 = vmatpush2.bf16.msra.mxu0 %v8610_v59  ;;  %v8643_v59 = vld [vmem:[#allocation3 + $0x708] ss:$16 sps:$4 sm:$0xff]  }
 0x23d   :  { %2740 = vmatpush2.bf16.msra.mxu1 %v8613_v26  ;;  %2700 = vmatprep.subr.bf16.mxu0 %v8618_v24  ;;  %v7306_v26 = vld [vmem:[%s10148_s1 + $0x1] ss:$8 sm:$0xf] }
 0x23e   :  { %2741 = vmatprep.subr.bf16.mxu1 %v8621_v22  ;;  %v1135_v24 = vrot.slane %v7306_v26, %v9689_v49  ;;  %v1139_v22 = vrot.slane %v7306_v26, %v9692_v16 }
 0x240   :  { %2701 = vmatpush2.bf16.msra.mxu0 %v8616_v52 }
 0x241   :  { %2742 = vmatpush2.bf16.msra.mxu1 %v8619_v27  ;;  %2702 = vmatprep.subr.bf16.mxu0 %v8624_v57 }
 0x242   :  { %2743 = vmatprep.subr.bf16.mxu1 %v8627_v17 }
 0x244   :  { %2703 = vmatpush2.bf16.msra.mxu0 %v8622_v56 }
 0x245   :  { %2744 = vmatpush2.bf16.msra.mxu1 %v8625_v53  ;;  %2704 = vmatprep.subr.bf16.mxu0 %v8630_v21 }
 0x246   :  { %2745 = vmatprep.subr.bf16.mxu1 %v8633_v51 }
 0x248   :  { %2705 = vmatpush2.bf16.msra.mxu0 %v8628_v48 }
 0x249   :  { %2746 = vmatpush2.bf16.msra.mxu1 %v8631_v58  ;;  %2706 = vmatprep.subr.bf16.mxu0 %v8636_v25 }
 0x24a   :  { %2747 = vmatprep.subr.bf16.mxu1 %v8639_v20 }
 0x24c   :  { %2707 = vmatpush2.bf16.msra.mxu0 %v8634_v61 }
 0x24d   :  { %2748 = vmatpush2.bf16.msra.mxu1 %v8637_v19  ;;  %2708 = vmatprep.subr.bf16.mxu0 %v8642_v54 }
 0x24e   :  { %2749 = vmatprep.subr.bf16.mxu1 %v8645_v60 }
 0x250   :  { %2709 = vmatpush2.bf16.msra.mxu0 %v8640_v23 }
 0x251   :  { %2750 = vmatpush2.bf16.msra.mxu1 %v8643_v59 }
 0x253   :  { %v2466_v52 = vpop.f32.mrf.mxu0  ;;  %2711 = vmatmul.mubr.bf16.vlgmr.msra.gmra.mxu0 %v9767_v50 }
 0x254   :  { %v2507_v27 = vpop.f32.mrf.mxu1  ;;  %2752 = vmatmul.mubr.bf16.vlgmr.msra.gmra.mxu1 %v9772_v28  ;;  %v2467_v57 = vadd.f32 %v2466_v52, %v1135_v24 }
 0x255   :  { %v2468_v17 = vpop.f32.mrf.mxu0 }
 0x256   :  { %v2509_v56 = vpop.f32.mrf.mxu1  ;;  %v2508_v53 = vadd.f32 %v2507_v27, %v2467_v57  ;;  %v2469_v21 = vadd.f32 %v2468_v17, %v1139_v22 }
 0x257   :  { %v2470_v51 = vpop.f32.mrf.mxu0 }
 0x258   :  { %v2511_v48 = vpop.f32.mrf.mxu1  ;;  %v2510_v58 = vadd.f32 %v2509_v56, %v2469_v21 }
 0x259   :  { %v2471_v25 = vpop.f32.mrf.mxu0 }
 0x25a   :  { %v2512_v20 = vpop.f32.mrf.mxu1 }
 0x293   :  { %v2548_v61 = vpop.f32.mrf.mxu0 }
 0x294   :  { %v2589_v19 = vpop.f32.mrf.mxu1  ;;  %v2549_v54 = vadd.f32 %v2548_v61, %v2508_v53 }
 0x295   :  { %v2550_v60 = vpop.f32.mrf.mxu0 }
 0x296   :  { %v2591_v23 = vpop.f32.mrf.mxu1  ;;  %v9789_v59 = vadd.f32 %v2589_v19, %v2549_v54  ;;  %v2551_v50 = vadd.f32 %v2550_v60, %v2510_v58  ;;  %v1143_v58 = vrot.slane %v7306_v26, %v9703_v18 }
 0x297   :  { %v2552_v16 = vpop.f32.mrf.mxu0 }
 0x298   :  { %v2593_v28 = vpop.f32.mrf.mxu1  ;;  %v9792_v52 = vadd.f32 %v2591_v23, %v2551_v50  ;;  %v1147_v16 = vrot.slane %v7306_v26, %v9709_v55 }
 0x299   :  { %v2553_v22 = vpop.f32.mrf.mxu0 }
 0x29a   :  { %v2594_v27 = vpop.f32.mrf.mxu1 }
 0x2d3   :  { %v2630_v17 = vpop.f32.mrf.mxu0 }
 0x2d4   :  { %v2671_v56 = vpop.f32.mrf.mxu1  ;;  %v2631_v61 = vadd.f32 %v2630_v17, %v1143_v58  ;;  %v7579_v17 = vcombine.high %v9191_v14, %v9196_v15 }
 0x2d5   :  { %v2632_v21 = vpop.f32.mrf.mxu0 }
 0x2d6   :  { %v2673_v51 = vpop.f32.mrf.mxu1  ;;  %v2633_v19 = vadd.f32 %v2632_v21, %v1147_v16  ;;  %v2672_v54 = vadd.f32 %v2671_v56, %v2631_v61  ;;  %v7611_v56 = vcombine.high %v9351_v46, %v9356_v47  ;;  %v7578_v21 = vcombine.low %v9191_v14, %v9196_v15 }
 0x2d7   :  { %v2634_v53 = vpop.f32.mrf.mxu0 }
 0x2d8   :  { %v2675_v48 = vpop.f32.mrf.mxu1  ;;  %v2674_v50 = vadd.f32 %v2673_v51, %v2633_v19  ;;  %v7610_v51 = vcombine.low %v9351_v46, %v9356_v47 }
 0x2d9   :  { %v2635_v25 = vpop.f32.mrf.mxu0 }
 0x2da   :  { %v2676_v20 = vpop.f32.mrf.mxu1 }
 0x313   :  { %v2712_v60 = vpop.f32.mrf.mxu0 }
 0x314   :  { %v2753_v23 = vpop.f32.mrf.mxu1  ;;  %v2713_v28 = vadd.f32 %v2712_v60, %v2672_v54 }
 0x315   :  { %v2714_v22 = vpop.f32.mrf.mxu0 }
 0x316   :  { %v2755_v27 = vpop.f32.mrf.mxu1  ;;  %v9797_v24 = vadd.f32 %v2753_v23, %v2713_v28  ;;  %v2715_v57 = vadd.f32 %v2714_v22, %v2674_v50 }
 0x317   :  { %v2716_v53 = vpop.f32.mrf.mxu0 }
 0x318   :  { %v2757_v48 = vpop.f32.mrf.mxu1  ;;  %v2762_v25 = vmax.f32 %v9797_v24, 0.0  ;;  %v2756_v20 = vadd.f32 %v2755_v27, %v2715_v57 }
 0x319   :  { %v2717_v18 = vpop.f32.mrf.mxu0 }
 0x31a   :  { %v2758_v49 = vpop.f32.mrf.mxu1  ;;  %v2763_v26 = vmax.f32 %v2756_v20, 0.0 }
 0x31b   :  { %9013 = dma.done.wait [#allocation12 + $0x2], 8192 }
 0x31c   :  { %9014 = vsyncadd [#allocation12 + $0x2], 4294959104  ;;  %v7577_v57 = vcombine.high %v9181_v12, %v9186_v13  ;;  %v7609_v49 = vcombine.high %v9341_v44, %v9346_v45  ;;  %3169 = vmatprep.subr.bf16.mxu0 %v7579_v17  ;;  %3210 = vmatprep.subr.bf16.mxu1 %v7611_v56  ;;  %v7576_v18 = vcombine.low %v9181_v12, %v9186_v13  ;;  %v10248_v23 = vld [vmem:[#allocation67_spill] sm:$0xff]  ;;  %v10250_v27 = vld [vmem:[#allocation52_spill] sm:$0xff] }
 0x31d   :  { %3170 = vmatpush1.bf16.msra.mxu0 %v7578_v21  ;;  %3211 = vmatpush1.bf16.msra.mxu1 %v7610_v51  ;;  %v7608_v14 = vcombine.low %v9341_v44, %v9346_v45  ;;  %v7575_v15 = vcombine.high %v9168_v10, %v9176_v11  ;;  %v7607_v46 = vcombine.high %v9331_v42, %v9336_v43  ;;  %v10251_v48 = vld [vmem:[#allocation66_spill] sm:$0xff]  ;;  %v10252_v20 = vld [vmem:[#allocation65_spill] sm:$0xff]  ;;  %v10253_v21 = vld [vmem:[#allocation51_spill] sm:$0xff] }
 0x31e   :  { %3171 = vmatprep.subr.bf16.mxu0 %v7577_v57  ;;  %3212 = vmatprep.subr.bf16.mxu1 %v7609_v49  ;;  %v7574_v47 = vcombine.low %v9168_v10, %v9176_v11  ;;  %v7606_v58 = vcombine.low %v9331_v42, %v9336_v43  ;;  %v7573_v12 = vcombine.high %v9158_v8, %v9163_v9  ;;  %v10254_v51 = vld [vmem:[#allocation50_spill] sm:$0xff]  ;;  %v10255_v49 = vld [vmem:[#allocation64_spill] sm:$0xff] }
 0x31f   :  { %v7605_v13 = vcombine.high %v9321_v40, %v9326_v41  ;;  %v7572_v44 = vcombine.low %v9158_v8, %v9163_v9  ;;  %v7604_v45 = vcombine.low %v9321_v40, %v9326_v41  ;;  %v7571_v10 = vcombine.high %v9145_v6, %v9150_v7 }
 0x320   :  { %v7603_v11 = vcombine.high %v9311_v38, %v9316_v39  ;;  %v7570_v42 = vcombine.low %v9145_v6, %v9150_v7  ;;  %v7602_v43 = vcombine.low %v9311_v38, %v9316_v39  ;;  %v7569_v8 = vcombine.high %v9135_v4, %v9140_v5 }
 0x321   :  { %3172 = vmatpush1.bf16.msra.mxu0 %v7576_v18  ;;  %3213 = vmatpush1.bf16.msra.mxu1 %v7608_v14  ;;  %v7601_v9 = vcombine.high %v9301_v36, %v9306_v37  ;;  %v10241_v40 = vmax.f32 %v9792_v52, 0.0  ;;  %v2837_v16 = vpack.c.bf16 %v2763_v26, %v2763_v26  ;;  %v7568_v6 = vcombine.low %v9135_v4, %v9140_v5  ;;  %v10256_v18 = vld [vmem:[#allocation63_spill] sm:$0xff] }
 0x322   :  { %3173 = vmatprep.subr.bf16.mxu0 %v7575_v15  ;;  %3214 = vmatprep.subr.bf16.mxu1 %v7607_v46  ;;  %v7600_v7 = vcombine.low %v9301_v36, %v9306_v37  ;;  %v7567_v38 = vcombine.high %v9125_v2, %v9130_v3  ;;  %v7599_v39 = vcombine.high %v9291_v34, %v9296_v35 }
 0x323   :  { %v2835_v41 = vpack.c.bf16 %v10241_v40, %v10241_v40  ;;  %3242 = vmatprep.mubr.bf16.mxu1 %v2837_v16  ;;  %v7566_v52 = vcombine.low %v9125_v2, %v9130_v3  ;;  %v7598_v4 = vcombine.low %v9291_v34, %v9296_v35  ;;  %v7565_v5 = vcombine.high %v9115_v0, %v9120_v1  ;;  %v10264_v40 = vld [vmem:[#allocation59_spill] sm:$0xff] }
 0x324   :  { %v7597_v36 = vcombine.high %v9281_v32, %v9286_v33  ;;  %v7564_v37 = vcombine.low %v9115_v0, %v9120_v1  ;;  %v7596_v61 = vcombine.low %v9281_v32, %v9286_v33  ;;  %v7595_v2 = vcombine.high %v9271_v30, %v9276_v31  ;;  %v10242_v0 = vld [vmem:[#allocation56_spill] sm:$0xff]  ;;  %v10243_v32 = vld [vmem:[#allocation70_spill] sm:$0xff]  ;;  %v10244_v33 = vld [vmem:[#allocation69_spill] sm:$0xff] }
 0x325   :  { %3174 = vmatpush1.bf16.msra.mxu0 %v7574_v47  ;;  %3215 = vmatpush1.bf16.msra.mxu1 %v7606_v58  ;;  %v7627_v3 = vcombine.high %v9431_v62, %v9436_v63  ;;  %v7594_v34 = vcombine.low %v9271_v30, %v9276_v31  ;;  %v7626_v35 = vcombine.low %v9431_v62, %v9436_v63  ;;  %v10245_v30 = vld [vmem:[#allocation55_spill] sm:$0xff]  ;;  %v10246_v31 = vld [vmem:[#allocation54_spill] sm:$0xff]  ;;  %v10247_v63 = vld [vmem:[#allocation68_spill] sm:$0xff] }
 0x326   :  { %3175 = vmatprep.subr.bf16.mxu0 %v7573_v12  ;;  %3216 = vmatprep.subr.bf16.mxu1 %v7605_v13  ;;  %v7593_v1 = vcombine.high %v10242_v0, %v9266_v29  ;;  %v7625_v19 = vcombine.high %v10244_v33, %v10243_v32  ;;  %v7592_v54 = vcombine.low %v10242_v0, %v9266_v29  ;;  %v10249_v29 = vld [vmem:[#allocation53_spill] sm:$0xff]  ;;  %v10258_v58 = vld [vmem:[#allocation48_spill] sm:$0xff]  ;;  %v10259_v13 = vld [vmem:[#allocation62_spill] sm:$0xff] }
 0x327   :  { %3201 = vmatprep.mubr.bf16.mxu0 %v2835_v41  ;;  %v7624_v60 = vcombine.low %v10244_v33, %v10243_v32  ;;  %v7591_v62 = vcombine.high %v10246_v31, %v10245_v30  ;;  %v7623_v50 = vcombine.high %v10248_v23, %v10247_v63  ;;  %v7590_v28 = vcombine.low %v10246_v31, %v10245_v30  ;;  %v10257_v47 = vld [vmem:[#allocation49_spill] sm:$0xff] }
 0x328   :  { %v7622_v22 = vcombine.low %v10248_v23, %v10247_v63  ;;  %v7589_v53 = vcombine.high %v10250_v27, %v10249_v29  ;;  %v7621_v26 = vcombine.high %v10252_v20, %v10251_v48  ;;  %v7588_v17 = vcombine.low %v10250_v27, %v10249_v29 }
 0x329   :  { %3176 = vmatpush1.bf16.msra.mxu0 %v7572_v44  ;;  %3217 = vmatpush1.bf16.msra.mxu1 %v7604_v45  ;;  %v7620_v56 = vcombine.low %v10252_v20, %v10251_v48  ;;  %v7587_v57 = vcombine.high %v10254_v51, %v10253_v21  ;;  %v7619_v14 = vcombine.high %v10256_v18, %v10255_v49  ;;  %v10260_v44 = vld [vmem:[#allocation61_spill] sm:$0xff] }
 0x32a   :  { %3177 = vmatprep.subr.bf16.mxu0 %v7571_v10  ;;  %3218 = vmatprep.subr.bf16.mxu1 %v7603_v11  ;;  %v7586_v15 = vcombine.low %v10254_v51, %v10253_v21  ;;  %v7618_v46 = vcombine.low %v10256_v18, %v10255_v49  ;;  %v7585_v12 = vcombine.high %v10258_v58, %v10257_v47 }
 0x32b   :  { %v7617_v45 = vcombine.high %v10260_v44, %v10259_v13  ;;  %v7584_v10 = vcombine.low %v10258_v58, %v10257_v47  ;;  %v7616_v11 = vcombine.low %v10260_v44, %v10259_v13 }
 0x32d   :  { %3178 = vmatpush1.bf16.msra.mxu0 %v7570_v42  ;;  %3219 = vmatpush1.bf16.msra.mxu1 %v7602_v43  ;;  %v10261_v42 = vld [vmem:[#allocation47_spill] sm:$0xff]  ;;  %v10262_v43 = vld [vmem:[#allocation46_spill] sm:$0xff] }
 0x32e   :  { %3179 = vmatprep.subr.bf16.mxu0 %v7569_v8  ;;  %3220 = vmatprep.subr.bf16.mxu1 %v7601_v9  ;;  %v7583_v8 = vcombine.high %v10262_v43, %v10261_v42  ;;  %v10263_v9 = vld [vmem:[#allocation60_spill] sm:$0xff]  ;;  %v7582_v16 = vcombine.low %v10262_v43, %v10261_v42 }
 0x32f   :  { %v7615_v41 = vcombine.high %v10264_v40, %v10263_v9 }
 0x331   :  { %3180 = vmatpush1.bf16.msra.mxu0 %v7568_v6  ;;  %3221 = vmatpush1.bf16.msra.mxu1 %v7600_v7  ;;  %v7614_v6 = vcombine.low %v10264_v40, %v10263_v9  ;;  %v10265_v7 = vld [vmem:[#allocation45_spill] sm:$0xff] }
 0x332   :  { %3181 = vmatprep.subr.bf16.mxu0 %v7567_v38  ;;  %3222 = vmatprep.subr.bf16.mxu1 %v7599_v39  ;;  %v10266_v38 = vld [vmem:[#allocation44_spill] sm:$0xff] }
 0x333   :  { %v7581_v39 = vcombine.high %v10266_v38, %v10265_v7 }
 0x335   :  { %3182 = vmatpush1.bf16.msra.mxu0 %v7566_v52  ;;  %3223 = vmatpush1.bf16.msra.mxu1 %v7598_v4  ;;  %v10267_v52 = vld [vmem:[#allocation58_spill] sm:$0xff]  ;;  %v10268_v4 = vld [vmem:[#allocation57_spill] sm:$0xff] }
 0x336   :  { %3183 = vmatprep.subr.bf16.mxu0 %v7565_v5  ;;  %3224 = vmatprep.subr.bf16.mxu1 %v7597_v36  ;;  %v7613_v5 = vcombine.high %v10268_v4, %v10267_v52  ;;  %v7580_v36 = vcombine.low %v10266_v38, %v10265_v7 }
 0x339   :  { %3184 = vmatpush1.bf16.msra.mxu0 %v7564_v37  ;;  %3225 = vmatpush1.bf16.msra.mxu1 %v7596_v61  ;;  %v7612_v37 = vcombine.low %v10268_v4, %v10267_v52  ;;  %v10269_v61 = vmax.f32 %v9789_v59, 0.0 }
 0x33a   :  { %3185 = vmatprep.subr.bf16.mxu0 %v7595_v2  ;;  %3226 = vmatprep.subr.bf16.mxu1 %v7627_v3  ;;  %v2836_v3 = vpack.c.bf16 %v2762_v25, %v2762_v25 }
 0x33b   :  { %v2834_v2 = vpack.c.bf16 %v10269_v61, %v10269_v61 }
 0x33d   :  { %3186 = vmatpush2.bf16.msra.mxu0 %v7594_v34  ;;  %3227 = vmatpush2.bf16.msra.mxu1 %v7626_v35  ;;  %v7563_v34 = vld [vmem:[%s10148_s1 + $0x2] ss:$8 sm:$0x3]  ;;  %v10270_v35 = vld [vmem:[#allocation72_spill] sm:$0xff] }
 0x33e   :  { %3187 = vmatprep.subr.bf16.mxu0 %v7593_v1  ;;  %3228 = vmatprep.subr.bf16.mxu1 %v7625_v19  ;;  %v2842_v0 = vrot.slane %v7563_v34, %v10270_v35  ;;  %v10271_v1 = vld [vmem:[#allocation73_spill] sm:$0xff] }
 0x33f   :  { %v2846_v32 = vrot.slane %v7563_v34, %v10271_v1 }
 0x341   :  { %3188 = vmatpush2.bf16.msra.mxu0 %v7592_v54  ;;  %3229 = vmatpush2.bf16.msra.mxu1 %v7624_v60 }
 0x342   :  { %3189 = vmatprep.subr.bf16.mxu0 %v7591_v62  ;;  %3230 = vmatprep.subr.bf16.mxu1 %v7623_v50 }
 0x345   :  { %3190 = vmatpush2.bf16.msra.mxu0 %v7590_v28  ;;  %3231 = vmatpush2.bf16.msra.mxu1 %v7622_v22 }
 0x346   :  { %3191 = vmatprep.subr.bf16.mxu0 %v7589_v53  ;;  %3232 = vmatprep.subr.bf16.mxu1 %v7621_v26 }
 0x349   :  { %3192 = vmatpush2.bf16.msra.mxu0 %v7588_v17  ;;  %3233 = vmatpush2.bf16.msra.mxu1 %v7620_v56 }
 0x34a   :  { %3193 = vmatprep.subr.bf16.mxu0 %v7587_v57  ;;  %3234 = vmatprep.subr.bf16.mxu1 %v7619_v14 }
 0x34d   :  { %3194 = vmatpush2.bf16.msra.mxu0 %v7586_v15  ;;  %3235 = vmatpush2.bf16.msra.mxu1 %v7618_v46 }
 0x34e   :  { %3195 = vmatprep.subr.bf16.mxu0 %v7585_v12  ;;  %3236 = vmatprep.subr.bf16.mxu1 %v7617_v45 }
 0x351   :  { %3196 = vmatpush2.bf16.msra.mxu0 %v7584_v10  ;;  %3237 = vmatpush2.bf16.msra.mxu1 %v7616_v11 }
 0x352   :  { %3197 = vmatprep.subr.bf16.mxu0 %v7583_v8  ;;  %3238 = vmatprep.subr.bf16.mxu1 %v7615_v41 }
 0x355   :  { %3198 = vmatpush2.bf16.msra.mxu0 %v7582_v16  ;;  %3239 = vmatpush2.bf16.msra.mxu1 %v7614_v6 }
 0x356   :  { %3199 = vmatprep.subr.bf16.mxu0 %v7581_v39  ;;  %3240 = vmatprep.subr.bf16.mxu1 %v7613_v5 }
 0x359   :  { %3200 = vmatpush2.bf16.msra.mxu0 %v7580_v36  ;;  %3241 = vmatpush2.bf16.msra.mxu1 %v7612_v37 }
 0x35c   :  { %3202 = vmatmul.mubr.bf16.vlgmr.msra.gmra.mxu0 %v2834_v2  ;;  %3243 = vmatmul.mubr.bf16.vlgmr.msra.gmra.mxu1 %v2836_v3 }
 0x41c   :  { %v3203_v33 = vpop.f32.mrf.mxu0  ;;  %v3244_v59 = vpop.f32.mrf.mxu1 }
 0x41d   :  { %v3204_v19 = vadd.f32 %v3203_v33, %v2842_v0 }
 0x41e   :  { %v3205_v54 = vpop.f32.mrf.mxu0  ;;  %v3246_v60 = vpop.f32.mrf.mxu1 }
 0x41f   :  { %v3245_v24 = vadd.f32 %v3244_v59, %v3204_v19  ;;  %v3206_v30 = vadd.f32 %v3205_v54, %v2846_v32 }
 0x420   :  { %v3207_v25 = vpop.f32.mrf.mxu0  ;;  %v3248_v31 = vpop.f32.mrf.mxu1 }
 0x421   :  { %v3251_v62 = vmax.f32 %v3245_v24, 0.0  ;;  %v3247_v63 = vadd.f32 %v3246_v60, %v3206_v30 }
 0x422   :  { %v3208_v23 = vpop.f32.mrf.mxu0  ;;  %v3249_v50 = vpop.f32.mrf.mxu1 }
 0x423   :  { %v3252_v28 = vmax.f32 %v3247_v63, 0.0 }
 0x424   :  { %9015 = dma.done.wait [#allocation12 + $0x3], 2048 }
 0x425   :  { %9016 = vsyncadd [#allocation12 + $0x3], 4294965248  ;;  %v3291_v22 = vpack.c.bf16 %v3252_v28, %v3252_v28  ;;  %v8646_v29 = vld [vmem:[#allocation5 + $0x78] sm:$0xff]   ;;  %v8648_v53 = vld [vmem:[#allocation5 + $0x70] sm:$0xff]   ;;  %v3290_v47 = vpack.c.bf16 %v3251_v62, %v3251_v62 }
 0x426   :  { %v8647_v27 = vld [vmem:[#allocation5 + $0x38] sm:$0xff]   ;;  %8074 = vmatprep.subr.bf16.mxu0 %v8646_v29  ;;  %v8649_v48 = vld [vmem:[#allocation5 + $0x30] sm:$0xff]   ;;  %v8650_v20 = vld [vmem:[#allocation5 + $0x68] sm:$0xff]  }
 0x427   :  { %3420 = vmatprep.mubr.bf16.mxu0 %v3291_v22  ;;  %8075 = vmatpush3.bf16.msra.mxu0 %v8647_v27  ;;  %v8651_v26 = vld [vmem:[#allocation5 + $0x28] sm:$0xff]   ;;  %v8652_v17 = vld [vmem:[#allocation5 + $0x60] sm:$0xff]   ;;  %v8654_v21 = vld [vmem:[#allocation5 + $0x58] sm:$0xff]  }
 0x428   :  { %8076 = vmatprep.subr.bf16.mxu0 %v8648_v53  ;;  %v8653_v56 = vld [vmem:[#allocation5 + $0x20] sm:$0xff]   ;;  %v8655_v51 = vld [vmem:[#allocation5 + $0x18] sm:$0xff]   ;;  %v8656_v57 = vld [vmem:[#allocation5 + $0x50] sm:$0xff]  }
 0x429   :  { %v8657_v49 = vld [vmem:[#allocation5 + $0x10] sm:$0xff]   ;;  %v8658_v18 = vld [vmem:[#allocation5 + $0x48] sm:$0xff]   ;;  %v8660_v15 = vld [vmem:[#allocation5 + $0x40] sm:$0xff]  }
 0x42a   :  { %v8659_v14 = vld [vmem:[#allocation5 + $0x8] sm:$0xff]   ;;  %v8661_v46 = vld [vmem:[#allocation5] sm:$0xff]  }
 0x42b   :  { %8077 = vmatpush3.bf16.msra.mxu0 %v8649_v48  ;;  %v3289_v12 = vld [vmem:[%s10148_s1 + $0x3] ss:$0 sm:$0xff] }
 0x42c   :  { %8078 = vmatprep.subr.bf16.mxu0 %v8650_v20 }
 0x42f   :  { %8079 = vmatpush3.bf16.msra.mxu0 %v8651_v26 }
 0x430   :  { %8080 = vmatprep.subr.bf16.mxu0 %v8652_v17 }
 0x433   :  { %8081 = vmatpush3.bf16.msra.mxu0 %v8653_v56 }
 0x434   :  { %8082 = vmatprep.subr.bf16.mxu0 %v8654_v21 }
 0x437   :  { %8083 = vmatpush3.bf16.msra.mxu0 %v8655_v51 }
 0x438   :  { %8084 = vmatprep.subr.bf16.mxu0 %v8656_v57 }
 0x43b   :  { %8085 = vmatpush3.bf16.msra.mxu0 %v8657_v49 }
 0x43c   :  { %8086 = vmatprep.subr.bf16.mxu0 %v8658_v18 }
 0x43f   :  { %8087 = vmatpush3.bf16.msra.mxu0 %v8659_v14 }
 0x440   :  { %8088 = vmatprep.subr.bf16.mxu0 %v8660_v15 }
 0x443   :  { %8089 = vmatpush3.bf16.msra.mxu0 %v8661_v46 }
 0x446   :  { %3421 = vmatmul.mubr.bf16.vlgmr.msra.gmra.mxu0 %v3290_v47 }
 0x506   :  { %v8090_v58 = vpop.f32.mrf.mxu0 }
 0x508   :  { %v8091_v13 = vpop.f32.mrf.mxu0 }
 0x509   :  { %v8092_v44 = vadd.f32 %v8091_v13, %v8090_v58 }
 0x50a   :  { %v8093_v45 = vpop.f32.mrf.mxu0 }
 0x50b   :  { %v3423_v10 = vadd.f32 %v8092_v44, %v3289_v12 }
 0x50c   :  { %v8094_v11 = vpop.f32.mrf.mxu0 }
 0x50d   :  { %v3428_v42 = vmax.f32 %v3423_v10, 0.0 }
 0x50e   :  { %9017 = dma.done.wait [#allocation12 + $0x4], 1024 }
 0x50f   :  { %9018 = vsyncadd [#allocation12 + $0x4], 4294966272  ;;  %v9038_v43 = vmov 0.0   ;;  %vm9039_vm1 = vmmov 0   ;;  %v8662_v8 = vld [vmem:[#allocation6 + $0x38] sm:$0xff]   ;;  %v8663_v9 = vld [vmem:[#allocation6 + $0x30] sm:$0xff]   ;;  %v3450_v39 = vpack.c.bf16 %v3428_v42, %v3428_v42 }
 0x510   :  { %8204 = vmatprep.subr.bf16.mxu1 %v9038_v43  ;;  %8220 = vmatprep.mubr.msk.bf16.mxu1 %vm9039_vm1, %v9038_v43  ;;  %v8664_v40 = vld [vmem:[#allocation6 + $0x28] sm:$0xff]   ;;  %v8665_v41 = vld [vmem:[#allocation6 + $0x20] sm:$0xff]   ;;  %v8666_v16 = vld [vmem:[#allocation6 + $0x18] sm:$0xff]  }
 0x511   :  { %8205 = vmatpush3.bf16.msra.mxu1 %v8662_v8  ;;  %v8667_v6 = vld [vmem:[#allocation6 + $0x10] sm:$0xff]   ;;  %v8668_v7 = vld [vmem:[#allocation6 + $0x8] sm:$0xff]   ;;  %v8669_v38 = vld [vmem:[#allocation6] sm:$0xff]  }
 0x512   :  { %8206 = vmatprep.subr.bf16.mxu1 %v9038_v43  ;;  %v3449_v52 = vld [vmem:[%s10148_s1 + $0x4] ss:$0 sm:$0xff] }
 0x515   :  { %8207 = vmatpush3.bf16.msra.mxu1 %v8663_v9 }
 0x516   :  { %8208 = vmatprep.subr.bf16.mxu1 %v9038_v43 }
 0x519   :  { %8209 = vmatpush3.bf16.msra.mxu1 %v8664_v40 }
 0x51a   :  { %8210 = vmatprep.subr.bf16.mxu1 %v9038_v43 }
 0x51d   :  { %8211 = vmatpush3.bf16.msra.mxu1 %v8665_v41 }
 0x51e   :  { %8212 = vmatprep.subr.bf16.mxu1 %v9038_v43 }
 0x521   :  { %8213 = vmatpush3.bf16.msra.mxu1 %v8666_v16 }
 0x522   :  { %8214 = vmatprep.subr.bf16.mxu1 %v9038_v43 }
 0x525   :  { %8215 = vmatpush3.bf16.msra.mxu1 %v8667_v6 }
 0x526   :  { %8216 = vmatprep.subr.bf16.mxu1 %v9038_v43 }
 0x529   :  { %8217 = vmatpush3.bf16.msra.mxu1 %v8668_v7 }
 0x52a   :  { %8218 = vmatprep.subr.bf16.mxu1 %v9038_v43 }
 0x52d   :  { %8219 = vmatpush3.bf16.msra.mxu1 %v8669_v38 }
 0x530   :  { %8221 = vmatmul.mubr.bf16.vlgmr.msra.gmra.mxu1 %v3450_v39 }
 0x5f0   :  { %v3533_v4 = vpop.f32.mrf.mxu1 }
 0x5f1   :  { %v9958_v5 = vadd.f32 %v3533_v4, %v3449_v52 }
 0x5f2   :  { %v8222_v36 = vpop.f32.mrf.mxu1 }
 0x5f4   :  { %v3536_v37 = vpop.f32.mrf.mxu1 }
 0x5f6   :  { %v8223_v61 = vpop.f32.mrf.mxu1 }
 0x5f7   :  { %9019 = dma.done.wait [#allocation12 + $0x5], 128 }
 0x5f8   :  { %9020 = vsyncadd [#allocation12 + $0x5], 4294967168  ;;  %8224 = vmatprep.subr.bf16.mxu0 %v9038_v43  ;;  %8226 = vmatprep.mubr.msk.bf16.mxu0 %vm9039_vm1, %v9038_v43  ;;  %v8670_v2 = vld [vmem:[#allocation7] sm:$0xff]   ;;  %v3546_v3 = vpack.c.bf16 %v9958_v5, %v9958_v5  ;;  %vm3553_vm2 = vcmask 130048  }
 0x5f9   :  { %8225 = vmatpush3.bf16.msra.mxu0 %v8670_v2  ;;  %v3545_v34 = vld [vmem:[%s10148_s1 + $0x5] ss:$0 sm:$0xff] }
 0x5fc   :  { %8227 = vmatmul.mubr.msk.bf16.vlgmr.msra.gmra.mxu0 %vm3553_vm2, %v3546_v3 }
 0x6bc   :  { %v3591_v0 = vpop.f32.mrf.mxu0 }
 0x6bd   :  { %v3592_v32 = vadd.f32 %v3591_v0, %v3545_v34 }
 0x6be   :  { %v8228_v33 = vpop.f32.mrf.mxu0 }
 0x6bf   :  { %v3597_v59 = vmax.f32 %v3592_v32, 0.0 }
 0x6c0   :  { %v3594_v19 = vpop.f32.mrf.mxu0 }
 0x6c2   :  { %v8229_v54 = vpop.f32.mrf.mxu0 }
 0x6c3   :  { %9021 = dma.done.wait [#allocation12 + $0x6], 2048 }
 0x6c4   :  { %9022 = vsyncadd [#allocation12 + $0x6], 4294965248  ;;  %v10272_v60 = vmov 0   ;;  %v8671_v24 = vld [vmem:[#allocation8 + $0x74] ss:$8 sps:$4 sm:$0xff]   ;;  %v3619_v17 = vpack.c.bf16 %v3597_v59, %v3597_v59 }
 0x6c5   :  { %3743 = vmatprep.mubr.bf16.mxu1 %v10272_v60  ;;  %v8673_v30 = vld [vmem:[#allocation8 + $0x70] ss:$8 sps:$4 sm:$0xff]   ;;  %3711 = vmatprep.subr.bf16.mxu1 %v8671_v24  ;;  %v8674_v25 = vld [vmem:[#allocation8 + $0x64] ss:$8 sps:$4 sm:$0xff]   ;;  %v8676_v31 = vld [vmem:[#allocation8 + $0x60] ss:$8 sps:$4 sm:$0xff]  }
 0x6c6   :  { %3712 = vmatpush1.bf16.msra.mxu1 %v8673_v30  ;;  %v8677_v62 = vld [vmem:[#allocation8 + $0x54] ss:$8 sps:$4 sm:$0xff]   ;;  %v8679_v63 = vld [vmem:[#allocation8 + $0x50] ss:$8 sps:$4 sm:$0xff]   ;;  %v8680_v23 = vld [vmem:[#allocation8 + $0x44] ss:$8 sps:$4 sm:$0xff]  }
 0x6c7   :  { %3713 = vmatprep.subr.bf16.mxu1 %v8674_v25  ;;  %v8682_v50 = vld [vmem:[#allocation8 + $0x40] ss:$8 sps:$4 sm:$0xff]   ;;  %v8683_v28 = vld [vmem:[#allocation8 + $0x34] ss:$8 sps:$4 sm:$0xff]   ;;  %v8685_v22 = vld [vmem:[#allocation8 + $0x30] ss:$8 sps:$4 sm:$0xff]  }
 0x6c8   :  { %v8686_v29 = vld [vmem:[#allocation8 + $0x24] ss:$8 sps:$4 sm:$0xff]   ;;  %v8688_v27 = vld [vmem:[#allocation8 + $0x20] ss:$8 sps:$4 sm:$0xff]   ;;  %v8689_v53 = vld [vmem:[#allocation8 + $0x14] ss:$8 sps:$4 sm:$0xff]  }
 0x6c9   :  { %v8691_v48 = vld [vmem:[#allocation8 + $0x10] ss:$8 sps:$4 sm:$0xff]   ;;  %v8692_v20 = vld [vmem:[#allocation8 + $0x4] ss:$8 sps:$4 sm:$0xff]   ;;  %v8694_v26 = vld [vmem:[#allocation8] ss:$8 sps:$4 sm:$0xff]  }
 0x6ca   :  { %3714 = vmatpush1.bf16.msra.mxu1 %v8676_v31  ;;  %v7654_v56 = vld [vmem:[%s10148_s1 + $0x6] ss:$8 sm:$0x3] }
 0x6cb   :  { %3715 = vmatprep.subr.bf16.mxu1 %v8677_v62  ;;  %v3624_v21 = vrot.slane %v7654_v56, %v10270_v35  ;;  %v3628_v51 = vrot.slane %v7654_v56, %v10271_v1 }
 0x6ce   :  { %3716 = vmatpush1.bf16.msra.mxu1 %v8679_v63 }
 0x6cf   :  { %3717 = vmatprep.subr.bf16.mxu1 %v8680_v23 }
 0x6d2   :  { %3718 = vmatpush1.bf16.msra.mxu1 %v8682_v50 }
 0x6d3   :  { %3719 = vmatprep.subr.bf16.mxu1 %v8683_v28 }
 0x6d6   :  { %3720 = vmatpush1.bf16.msra.mxu1 %v8685_v22 }
 0x6d7   :  { %3721 = vmatprep.subr.bf16.mxu1 %v8686_v29 }
 0x6da   :  { %3722 = vmatpush1.bf16.msra.mxu1 %v8688_v27 }
 0x6db   :  { %3723 = vmatprep.subr.bf16.mxu1 %v8689_v53 }
 0x6de   :  { %3724 = vmatpush1.bf16.msra.mxu1 %v8691_v48 }
 0x6df   :  { %3725 = vmatprep.subr.bf16.mxu1 %v8692_v20 }
 0x6e2   :  { %3726 = vmatpush1.bf16.msra.mxu1 %v8694_v26 }
 0x6e5   :  { %3744 = vmatmul.mubr.bf16.vlgmr.msra.gmra.mxu1 %v3619_v17 }
 0x7a5   :  { %v3745_v57 = vpop.f32.mrf.mxu1 }
 0x7a6   :  { %v9975_v49 = vadd.f32 %v3745_v57, %v3624_v21 }
 0x7a7   :  { %v3747_v18 = vpop.f32.mrf.mxu1 }
 0x7a8   :  { %v3752_v14 = vmax.f32 %v9975_v49, 0.0  ;;  %v3748_v15 = vadd.f32 %v3747_v18, %v3628_v51 }
 0x7a9   :  { %v3749_v46 = vpop.f32.mrf.mxu1 }
 0x7aa   :  { %v3753_v47 = vmax.f32 %v3748_v15, 0.0 }
 0x7ab   :  { %v3750_v58 = vpop.f32.mrf.mxu1 }
 0x7ac   :  { %9023 = dma.done.wait [#allocation12 + $0x7], 8192 }
 0x7ad   :  { %9024 = vsyncadd [#allocation12 + $0x7], 4294959104  ;;  %v3824_v12 = vpack.c.bf16 %v3753_v47, %v3753_v47  ;;  %v8695_v13 = vld [vmem:[#allocation9 + $0xe4] ss:$16 sps:$4 sm:$0xff]   ;;  %v8697_v44 = vld [vmem:[#allocation9 + $0xec] ss:$16 sps:$4 sm:$0xff]  }
 0x7ae   :  { %4166 = vmatprep.subr.bf16.mxu0 %v8695_v13  ;;  %v8699_v45 = vld [vmem:[#allocation9 + $0xe0] ss:$16 sps:$4 sm:$0xff]   ;;  %v8700_v10 = vld [vmem:[#allocation9 + $0xe8] ss:$16 sps:$4 sm:$0xff]   ;;  %4207 = vmatprep.subr.bf16.mxu1 %v8697_v44  ;;  %v8701_v11 = vld [vmem:[#allocation9 + $0xc4] ss:$16 sps:$4 sm:$0xff]  }
 0x7af   :  { %4198 = vmatprep.mubr.bf16.mxu0 %v3824_v12  ;;  %4239 = vmatprep.mubr.bf16.mxu1 %v3824_v12  ;;  %v8703_v42 = vld [vmem:[#allocation9 + $0xcc] ss:$16 sps:$4 sm:$0xff]   ;;  %v8705_v8 = vld [vmem:[#allocation9 + $0xc0] ss:$16 sps:$4 sm:$0xff]   ;;  %v8706_v9 = vld [vmem:[#allocation9 + $0xc8] ss:$16 sps:$4 sm:$0xff]  }
 0x7b0   :  { %4167 = vmatpush1.bf16.msra.mxu0 %v8699_v45  ;;  %4208 = vmatpush1.bf16.msra.mxu1 %v8700_v10  ;;  %v8707_v40 = vld [vmem:[#allocation9 + $0xa4] ss:$16 sps:$4 sm:$0xff]   ;;  %v8709_v41 = vld [vmem:[#allocation9 + $0xac] ss:$16 sps:$4 sm:$0xff]   ;;  %v8711_v16 = vld [vmem:[#allocation9 + $0xa0] ss:$16 sps:$4 sm:$0xff]  }
 0x7b1   :  { %4168 = vmatprep.subr.bf16.mxu0 %v8701_v11  ;;  %4209 = vmatprep.subr.bf16.mxu1 %v8703_v42  ;;  %v8712_v6 = vld [vmem:[#allocation9 + $0xa8] ss:$16 sps:$4 sm:$0xff]   ;;  %v8713_v7 = vld [vmem:[#allocation9 + $0x84] ss:$16 sps:$4 sm:$0xff]   ;;  %v8715_v38 = vld [vmem:[#allocation9 + $0x8c] ss:$16 sps:$4 sm:$0xff]  }
 0x7b2   :  { %v8717_v39 = vld [vmem:[#allocation9 + $0x80] ss:$16 sps:$4 sm:$0xff]   ;;  %v8718_v52 = vld [vmem:[#allocation9 + $0x88] ss:$16 sps:$4 sm:$0xff]   ;;  %v8719_v4 = vld [vmem:[#allocation9 + $0x64] ss:$16 sps:$4 sm:$0xff]  }
 0x7b3   :  { %v8721_v36 = vld [vmem:[#allocation9 + $0x6c] ss:$16 sps:$4 sm:$0xff]   ;;  %v8723_v37 = vld [vmem:[#allocation9 + $0x60] ss:$16 sps:$4 sm:$0xff]   ;;  %v8724_v61 = vld [vmem:[#allocation9 + $0x68] ss:$16 sps:$4 sm:$0xff]  }
 0x7b4   :  { %4169 = vmatpush1.bf16.msra.mxu0 %v8705_v8  ;;  %4210 = vmatpush1.bf16.msra.mxu1 %v8706_v9  ;;  %v8725_v2 = vld [vmem:[#allocation9 + $0x44] ss:$16 sps:$4 sm:$0xff]   ;;  %v8727_v3 = vld [vmem:[#allocation9 + $0x4c] ss:$16 sps:$4 sm:$0xff]   ;;  %v8729_v34 = vld [vmem:[#allocation9 + $0x40] ss:$16 sps:$4 sm:$0xff]   ;;  %v3823_v9 = vpack.c.bf16 %v3752_v14, %v3752_v14 }
 0x7b5   :  { %4170 = vmatprep.subr.bf16.mxu0 %v8707_v40  ;;  %4211 = vmatprep.subr.bf16.mxu1 %v8709_v41  ;;  %v8730_v0 = vld [vmem:[#allocation9 + $0x48] ss:$16 sps:$4 sm:$0xff]   ;;  %v8731_v32 = vld [vmem:[#allocation9 + $0x24] ss:$16 sps:$4 sm:$0xff]   ;;  %v8733_v33 = vld [vmem:[#allocation9 + $0x2c] ss:$16 sps:$4 sm:$0xff]  }
 0x7b6   :  { %v8735_v59 = vld [vmem:[#allocation9 + $0x20] ss:$16 sps:$4 sm:$0xff]   ;;  %v8736_v19 = vld [vmem:[#allocation9 + $0x28] ss:$16 sps:$4 sm:$0xff]   ;;  %v8737_v54 = vld [vmem:[#allocation9 + $0x4] ss:$16 sps:$4 sm:$0xff]  }
 0x7b7   :  { %v8739_v60 = vld [vmem:[#allocation9 + $0xc] ss:$16 sps:$4 sm:$0xff]   ;;  %v8741_v24 = vld [vmem:[#allocation9] ss:$16 sps:$4 sm:$0xff]   ;;  %v8742_v30 = vld [vmem:[#allocation9 + $0x8] ss:$16 sps:$4 sm:$0xff]  }
 0x7b8   :  { %4171 = vmatpush1.bf16.msra.mxu0 %v8711_v16  ;;  %4212 = vmatpush1.bf16.msra.mxu1 %v8712_v6  ;;  %v8743_v25 = vld [vmem:[#allocation9 + $0x1e4] ss:$16 sps:$4 sm:$0xff]   ;;  %v8745_v31 = vld [vmem:[#allocation9 + $0x1ec] ss:$16 sps:$4 sm:$0xff]   ;;  %v8747_v62 = vld [vmem:[#allocation9 + $0x1e0] ss:$16 sps:$4 sm:$0xff]  }
 0x7b9   :  { %4172 = vmatprep.subr.bf16.mxu0 %v8713_v7  ;;  %4213 = vmatprep.subr.bf16.mxu1 %v8715_v38  ;;  %v8748_v63 = vld [vmem:[#allocation9 + $0x1e8] ss:$16 sps:$4 sm:$0xff]   ;;  %v8749_v23 = vld [vmem:[#allocation9 + $0x1c4] ss:$16 sps:$4 sm:$0xff]   ;;  %v8751_v50 = vld [vmem:[#allocation9 + $0x1cc] ss:$16 sps:$4 sm:$0xff]  }
 0x7ba   :  { %v8753_v28 = vld [vmem:[#allocation9 + $0x1c0] ss:$16 sps:$4 sm:$0xff]   ;;  %v8754_v22 = vld [vmem:[#allocation9 + $0x1c8] ss:$16 sps:$4 sm:$0xff]   ;;  %v8755_v29 = vld [vmem:[#allocation9 + $0x1a4] ss:$16 sps:$4 sm:$0xff]  }
 0x7bb   :  { %v8757_v27 = vld [vmem:[#allocation9 + $0x1ac] ss:$16 sps:$4 sm:$0xff]   ;;  %v8759_v53 = vld [vmem:[#allocation9 + $0x1a0] ss:$16 sps:$4 sm:$0xff]   ;;  %v8760_v48 = vld [vmem:[#allocation9 + $0x1a8] ss:$16 sps:$4 sm:$0xff]  }
 0x7bc   :  { %4173 = vmatpush1.bf16.msra.mxu0 %v8717_v39  ;;  %4214 = vmatpush1.bf16.msra.mxu1 %v8718_v52  ;;  %v8761_v20 = vld [vmem:[#allocation9 + $0x184] ss:$16 sps:$4 sm:$0xff]   ;;  %v8763_v26 = vld [vmem:[#allocation9 + $0x18c] ss:$16 sps:$4 sm:$0xff]   ;;  %v8765_v17 = vld [vmem:[#allocation9 + $0x180] ss:$16 sps:$4 sm:$0xff]  }
 0x7bd   :  { %4174 = vmatprep.subr.bf16.mxu0 %v8719_v4  ;;  %4215 = vmatprep.subr.bf16.mxu1 %v8721_v36  ;;  %v8766_v56 = vld [vmem:[#allocation9 + $0x188] ss:$16 sps:$4 sm:$0xff]   ;;  %v8767_v21 = vld [vmem:[#allocation9 + $0x164] ss:$16 sps:$4 sm:$0xff]   ;;  %v8769_v51 = vld [vmem:[#allocation9 + $0x16c] ss:$16 sps:$4 sm:$0xff]  }
 0x7be   :  { %v8771_v57 = vld [vmem:[#allocation9 + $0x160] ss:$16 sps:$4 sm:$0xff]   ;;  %v8772_v18 = vld [vmem:[#allocation9 + $0x168] ss:$16 sps:$4 sm:$0xff]   ;;  %v8773_v15 = vld [vmem:[#allocation9 + $0x144] ss:$16 sps:$4 sm:$0xff]  }
 0x7bf   :  { %v8775_v46 = vld [vmem:[#allocation9 + $0x14c] ss:$16 sps:$4 sm:$0xff]   ;;  %v8777_v47 = vld [vmem:[#allocation9 + $0x140] ss:$16 sps:$4 sm:$0xff]   ;;  %v8778_v58 = vld [vmem:[#allocation9 + $0x148] ss:$16 sps:$4 sm:$0xff]  }
 0x7c0   :  { %4175 = vmatpush1.bf16.msra.mxu0 %v8723_v37  ;;  %4216 = vmatpush1.bf16.msra.mxu1 %v8724_v61  ;;  %v8779_v12 = vld [vmem:[#allocation9 + $0x124] ss:$16 sps:$4 sm:$0xff]   ;;  %v8781_v13 = vld [vmem:[#allocation9 + $0x12c] ss:$16 sps:$4 sm:$0xff]   ;;  %v8783_v44 = vld [vmem:[#allocation9 + $0x120] ss:$16 sps:$4 sm:$0xff]  }
 0x7c1   :  { %4176 = vmatprep.subr.bf16.mxu0 %v8725_v2  ;;  %4217 = vmatprep.subr.bf16.mxu1 %v8727_v3  ;;  %v8784_v45 = vld [vmem:[#allocation9 + $0x128] ss:$16 sps:$4 sm:$0xff]   ;;  %v8785_v10 = vld [vmem:[#allocation9 + $0x104] ss:$16 sps:$4 sm:$0xff]   ;;  %v8787_v11 = vld [vmem:[#allocation9 + $0x10c] ss:$16 sps:$4 sm:$0xff]  }
 0x7c2   :  { %v8789_v42 = vld [vmem:[#allocation9 + $0x100] ss:$16 sps:$4 sm:$0xff]   ;;  %v8790_v8 = vld [vmem:[#allocation9 + $0x108] ss:$16 sps:$4 sm:$0xff]  }
 0x7c3   :  { %v7671_v40 = vld [vmem:[%s10148_s1 + $0x7] ss:$8 sm:$0xf] }
 0x7c4   :  { %4177 = vmatpush1.bf16.msra.mxu0 %v8729_v34  ;;  %4218 = vmatpush1.bf16.msra.mxu1 %v8730_v0  ;;  %v3829_v41 = vrot.slane %v7671_v40, %v10270_v35  ;;  %v10273_v16 = vld [vmem:[#allocation74_spill] sm:$0xff]  ;;  %v3833_v7 = vrot.slane %v7671_v40, %v10271_v1  ;;  %v3841_v38 = vrot.slane %v7671_v40, %v9709_v55 }
 0x7c5   :  { %4178 = vmatprep.subr.bf16.mxu0 %v8731_v32  ;;  %4219 = vmatprep.subr.bf16.mxu1 %v8733_v33  ;;  %v3837_v6 = vrot.slane %v7671_v40, %v10273_v16 }
 0x7c8   :  { %4179 = vmatpush1.bf16.msra.mxu0 %v8735_v59  ;;  %4220 = vmatpush1.bf16.msra.mxu1 %v8736_v19 }
 0x7c9   :  { %4180 = vmatprep.subr.bf16.mxu0 %v8737_v54  ;;  %4221 = vmatprep.subr.bf16.mxu1 %v8739_v60 }
 0x7cc   :  { %4181 = vmatpush1.bf16.msra.mxu0 %v8741_v24  ;;  %4222 = vmatpush1.bf16.msra.mxu1 %v8742_v30 }
 0x7cd   :  { %4182 = vmatprep.subr.bf16.mxu0 %v8743_v25  ;;  %4223 = vmatprep.subr.bf16.mxu1 %v8745_v31 }
 0x7d0   :  { %4183 = vmatpush2.bf16.msra.mxu0 %v8747_v62  ;;  %4224 = vmatpush2.bf16.msra.mxu1 %v8748_v63 }
 0x7d1   :  { %4184 = vmatprep.subr.bf16.mxu0 %v8749_v23  ;;  %4225 = vmatprep.subr.bf16.mxu1 %v8751_v50 }
 0x7d4   :  { %4185 = vmatpush2.bf16.msra.mxu0 %v8753_v28  ;;  %4226 = vmatpush2.bf16.msra.mxu1 %v8754_v22 }
 0x7d5   :  { %4186 = vmatprep.subr.bf16.mxu0 %v8755_v29  ;;  %4227 = vmatprep.subr.bf16.mxu1 %v8757_v27 }
 0x7d8   :  { %4187 = vmatpush2.bf16.msra.mxu0 %v8759_v53  ;;  %4228 = vmatpush2.bf16.msra.mxu1 %v8760_v48 }
 0x7d9   :  { %4188 = vmatprep.subr.bf16.mxu0 %v8761_v20  ;;  %4229 = vmatprep.subr.bf16.mxu1 %v8763_v26 }
 0x7dc   :  { %4189 = vmatpush2.bf16.msra.mxu0 %v8765_v17  ;;  %4230 = vmatpush2.bf16.msra.mxu1 %v8766_v56 }
 0x7dd   :  { %4190 = vmatprep.subr.bf16.mxu0 %v8767_v21  ;;  %4231 = vmatprep.subr.bf16.mxu1 %v8769_v51 }
 0x7e0   :  { %4191 = vmatpush2.bf16.msra.mxu0 %v8771_v57  ;;  %4232 = vmatpush2.bf16.msra.mxu1 %v8772_v18 }
 0x7e1   :  { %4192 = vmatprep.subr.bf16.mxu0 %v8773_v15  ;;  %4233 = vmatprep.subr.bf16.mxu1 %v8775_v46 }
 0x7e4   :  { %4193 = vmatpush2.bf16.msra.mxu0 %v8777_v47  ;;  %4234 = vmatpush2.bf16.msra.mxu1 %v8778_v58 }
 0x7e5   :  { %4194 = vmatprep.subr.bf16.mxu0 %v8779_v12  ;;  %4235 = vmatprep.subr.bf16.mxu1 %v8781_v13 }
 0x7e8   :  { %4195 = vmatpush2.bf16.msra.mxu0 %v8783_v44  ;;  %4236 = vmatpush2.bf16.msra.mxu1 %v8784_v45 }
 0x7e9   :  { %4196 = vmatprep.subr.bf16.mxu0 %v8785_v10  ;;  %4237 = vmatprep.subr.bf16.mxu1 %v8787_v11 }
 0x7ec   :  { %4197 = vmatpush2.bf16.msra.mxu0 %v8789_v42  ;;  %4238 = vmatpush2.bf16.msra.mxu1 %v8790_v8 }
 0x7ef   :  { %4199 = vmatmul.mubr.bf16.vlgmr.msra.gmra.mxu0 %v3823_v9  ;;  %4240 = vmatmul.mubr.bf16.vlgmr.msra.gmra.mxu1 %v3823_v9 }
 0x8af   :  { %v4200_v39 = vpop.f32.mrf.mxu0  ;;  %v4241_v49 = vpop.f32.mrf.mxu1 }
 0x8b0   :  { %v9988_v52 = vadd.f32 %v4200_v39, %v3829_v41  ;;  %v9990_v14 = vadd.f32 %v4241_v49, %v3837_v6 }
 0x8b1   :  { %v4202_v4 = vpop.f32.mrf.mxu0  ;;  %v4243_v36 = vpop.f32.mrf.mxu1 }
 0x8b2   :  { %v4248_v37 = vmax.f32 %v9988_v52, 0.0  ;;  %v4250_v61 = vmax.f32 %v9990_v14, 0.0  ;;  %v4203_v2 = vadd.f32 %v4202_v4, %v3833_v7  ;;  %v4244_v3 = vadd.f32 %v4243_v36, %v3841_v38 }
 0x8b3   :  { %v4204_v34 = vpop.f32.mrf.mxu0  ;;  %v4245_v0 = vpop.f32.mrf.mxu1 }
 0x8b4   :  { %v4249_v32 = vmax.f32 %v4203_v2, 0.0  ;;  %v4251_v33 = vmax.f32 %v4244_v3, 0.0 }
 0x8b5   :  { %v4205_v59 = vpop.f32.mrf.mxu0  ;;  %v4246_v19 = vpop.f32.mrf.mxu1 }
 0x8b6   :  { %9025 = dma.done.wait [#allocation12 + $0x8], 32768 }
 0x8b7   :  { %9026 = vsyncadd [#allocation12 + $0x8], 4294934528  ;;  %v9994_v54 = vpack.c.bf16 %v4249_v32, %v4249_v32  ;;  %v9996_v60 = vpack.c.bf16 %v4251_v33, %v4251_v33  ;;  %v4311_v24 = vld [vmem:[#allocation10 + $0x1c0] sm:$0xff]  ;;  %v4300_v52 = vld [vmem:[#allocation10 + $0x168] sm:$0xff] }
 0x8b8   :  { %v4315_v30 = vld [vmem:[#allocation10 + $0x1e0] sm:$0xff] }
 0x8b9   :  { %5872 = vmatprep.mubr.bf16.mxu0 %v9994_v54  ;;  %5913 = vmatprep.mubr.bf16.mxu1 %v9996_v60  ;;  %v4439_v25 = vld [vmem:[#allocation10 + $0x5c0] sm:$0xff]  ;;  %v7795_v31 = vcombine.high %v4311_v24, %v4315_v30  ;;  %v7794_v63 = vcombine.low %v4311_v24, %v4315_v30 }
 0x8ba   :  { %v4443_v62 = vld [vmem:[#allocation10 + $0x5e0] sm:$0xff] }
 0x8bb   :  { %v4303_v23 = vld [vmem:[#allocation10 + $0x180] sm:$0xff]  ;;  %v7923_v28 = vcombine.high %v4439_v25, %v4443_v62  ;;  %v7922_v22 = vcombine.low %v4439_v25, %v4443_v62  ;;  %5840 = vmatprep.subr.bf16.mxu0 %v7795_v31 }
 0x8bc   :  { %v4307_v50 = vld [vmem:[#allocation10 + $0x1a0] sm:$0xff]  ;;  %5841 = vmatpush1.bf16.msra.mxu0 %v7794_v63 }
 0x8bd   :  { %v7787_v29 = vcombine.high %v4303_v23, %v4307_v50  ;;  %v4431_v27 = vld [vmem:[#allocation10 + $0x580] sm:$0xff]  ;;  %5881 = vmatprep.subr.bf16.mxu1 %v7923_v28  ;;  %v7786_v21 = vcombine.low %v4303_v23, %v4307_v50 }
 0x8be   :  { %v4435_v53 = vld [vmem:[#allocation10 + $0x5a0] sm:$0xff]  ;;  %5882 = vmatpush1.bf16.msra.mxu1 %v7922_v22 }
 0x8bf   :  { %v4295_v48 = vld [vmem:[#allocation10 + $0x140] sm:$0xff]  ;;  %v7915_v20 = vcombine.high %v4431_v27, %v4435_v53  ;;  %5842 = vmatprep.subr.bf16.mxu0 %v7787_v29  ;;  %v7914_v51 = vcombine.low %v4431_v27, %v4435_v53 }
 0x8c0   :  { %v4299_v26 = vld [vmem:[#allocation10 + $0x160] sm:$0xff]  ;;  %5843 = vmatpush1.bf16.msra.mxu0 %v7786_v21 }
 0x8c1   :  { %v4423_v17 = vld [vmem:[#allocation10 + $0x540] sm:$0xff]  ;;  %v7779_v57 = vcombine.high %v4295_v48, %v4299_v26  ;;  %5883 = vmatprep.subr.bf16.mxu1 %v7915_v20  ;;  %v7778_v12 = vcombine.low %v4295_v48, %v4299_v26 }
 0x8c2   :  { %v4427_v56 = vld [vmem:[#allocation10 + $0x560] sm:$0xff]  ;;  %5884 = vmatpush1.bf16.msra.mxu1 %v7914_v51 }
 0x8c3   :  { %v7907_v18 = vcombine.high %v4423_v17, %v4427_v56  ;;  %v4287_v15 = vld [vmem:[#allocation10 + $0x100] sm:$0xff]  ;;  %5844 = vmatprep.subr.bf16.mxu0 %v7779_v57  ;;  %v7906_v13 = vcombine.low %v4423_v17, %v4427_v56 }
 0x8c4   :  { %v4291_v46 = vld [vmem:[#allocation10 + $0x120] sm:$0xff]  ;;  %5845 = vmatpush1.bf16.msra.mxu0 %v7778_v12 }
 0x8c5   :  { %v4415_v47 = vld [vmem:[#allocation10 + $0x500] sm:$0xff]  ;;  %v7771_v44 = vcombine.high %v4287_v15, %v4291_v46  ;;  %5885 = vmatprep.subr.bf16.mxu1 %v7907_v18  ;;  %v7770_v9 = vcombine.low %v4287_v15, %v4291_v46 }
 0x8c6   :  { %v4419_v58 = vld [vmem:[#allocation10 + $0x520] sm:$0xff]  ;;  %5886 = vmatpush1.bf16.msra.mxu1 %v7906_v13 }
 0x8c7   :  { %v7899_v45 = vcombine.high %v4415_v47, %v4419_v58  ;;  %v4279_v10 = vld [vmem:[#allocation10 + $0xc0] sm:$0xff]  ;;  %5846 = vmatprep.subr.bf16.mxu0 %v7771_v44  ;;  %v7898_v40 = vcombine.low %v4415_v47, %v4419_v58 }
 0x8c8   :  { %v4283_v11 = vld [vmem:[#allocation10 + $0xe0] sm:$0xff]  ;;  %5847 = vmatpush1.bf16.msra.mxu0 %v7770_v9 }
 0x8c9   :  { %v4407_v42 = vld [vmem:[#allocation10 + $0x4c0] sm:$0xff]  ;;  %v7763_v41 = vcombine.high %v4279_v10, %v4283_v11  ;;  %5887 = vmatprep.subr.bf16.mxu1 %v7899_v45  ;;  %v7762_v4 = vcombine.low %v4279_v10, %v4283_v11 }
 0x8ca   :  { %v4411_v8 = vld [vmem:[#allocation10 + $0x4e0] sm:$0xff]  ;;  %5888 = vmatpush1.bf16.msra.mxu1 %v7898_v40 }
 0x8cb   :  { %v7891_v6 = vcombine.high %v4407_v42, %v4411_v8  ;;  %v4271_v7 = vld [vmem:[#allocation10 + $0x80] sm:$0xff]  ;;  %5848 = vmatprep.subr.bf16.mxu0 %v7763_v41  ;;  %v7890_v36 = vcombine.low %v4407_v42, %v4411_v8 }
 0x8cc   :  { %v4275_v38 = vld [vmem:[#allocation10 + $0xa0] sm:$0xff]  ;;  %5849 = vmatpush1.bf16.msra.mxu0 %v7762_v4 }
 0x8cd   :  { %v4399_v39 = vld [vmem:[#allocation10 + $0x480] sm:$0xff]  ;;  %v7755_v2 = vcombine.high %v4271_v7, %v4275_v38  ;;  %5889 = vmatprep.subr.bf16.mxu1 %v7891_v6  ;;  %v7754_v59 = vcombine.low %v4271_v7, %v4275_v38 }
 0x8ce   :  { %v4403_v49 = vld [vmem:[#allocation10 + $0x4a0] sm:$0xff]  ;;  %5890 = vmatpush1.bf16.msra.mxu1 %v7890_v36 }
 0x8cf   :  { %v7883_v3 = vcombine.high %v4399_v39, %v4403_v49  ;;  %v4263_v34 = vld [vmem:[#allocation10 + $0x40] sm:$0xff]  ;;  %5850 = vmatprep.subr.bf16.mxu0 %v7755_v2  ;;  %v7882_v19 = vcombine.low %v4399_v39, %v4403_v49 }
 0x8d0   :  { %v4267_v0 = vld [vmem:[#allocation10 + $0x60] sm:$0xff]  ;;  %5851 = vmatpush1.bf16.msra.mxu0 %v7754_v59 }
 0x8d1   :  { %v4391_v32 = vld [vmem:[#allocation10 + $0x440] sm:$0xff]  ;;  %v7747_v24 = vcombine.high %v4263_v34, %v4267_v0  ;;  %5891 = vmatprep.subr.bf16.mxu1 %v7883_v3  ;;  %v7746_v23 = vcombine.low %v4263_v34, %v4267_v0 }
 0x8d2   :  { %v4395_v33 = vld [vmem:[#allocation10 + $0x460] sm:$0xff]  ;;  %5892 = vmatpush1.bf16.msra.mxu1 %v7882_v19 }
 0x8d3   :  { %v7875_v30 = vcombine.high %v4391_v32, %v4395_v33  ;;  %v4255_v25 = vld [vmem:[#allocation10] sm:$0xff]  ;;  %5852 = vmatprep.subr.bf16.mxu0 %v7747_v24  ;;  %v7874_v50 = vcombine.low %v4391_v32, %v4395_v33 }
 0x8d4   :  { %v4259_v31 = vld [vmem:[#allocation10 + $0x20] sm:$0xff]  ;;  %5853 = vmatpush1.bf16.msra.mxu0 %v7746_v23 }
 0x8d5   :  { %v4383_v62 = vld [vmem:[#allocation10 + $0x400] sm:$0xff]  ;;  %v7739_v28 = vcombine.high %v4255_v25, %v4259_v31  ;;  %5893 = vmatprep.subr.bf16.mxu1 %v7875_v30  ;;  %v7738_v20 = vcombine.low %v4255_v25, %v4259_v31 }
 0x8d6   :  { %v4387_v63 = vld [vmem:[#allocation10 + $0x420] sm:$0xff]  ;;  %5894 = vmatpush1.bf16.msra.mxu1 %v7874_v50 }
 0x8d7   :  { %v7867_v22 = vcombine.high %v4383_v62, %v4387_v63  ;;  %v4375_v29 = vld [vmem:[#allocation10 + $0x3c0] sm:$0xff]  ;;  %5854 = vmatprep.subr.bf16.mxu0 %v7739_v28  ;;  %v7866_v26 = vcombine.low %v4383_v62, %v4387_v63 }
 0x8d8   :  { %v4379_v27 = vld [vmem:[#allocation10 + $0x3e0] sm:$0xff]  ;;  %5855 = vmatpush1.bf16.msra.mxu0 %v7738_v20 }
 0x8d9   :  { %v4503_v53 = vld [vmem:[#allocation10 + $0x7c0] sm:$0xff]  ;;  %v7859_v17 = vcombine.high %v4375_v29, %v4379_v27  ;;  %5895 = vmatprep.subr.bf16.mxu1 %v7867_v22  ;;  %v7858_v15 = vcombine.low %v4375_v29, %v4379_v27 }
 0x8da   :  { %v4507_v48 = vld [vmem:[#allocation10 + $0x7e0] sm:$0xff]  ;;  %5896 = vmatpush1.bf16.msra.mxu1 %v7866_v26 }
 0x8db   :  { %v7987_v56 = vcombine.high %v4503_v53, %v4507_v48  ;;  %v4367_v21 = vld [vmem:[#allocation10 + $0x380] sm:$0xff]  ;;  %5856 = vmatprep.subr.bf16.mxu0 %v7859_v17  ;;  %v7986_v46 = vcombine.low %v4503_v53, %v4507_v48 }
 0x8dc   :  { %v4371_v51 = vld [vmem:[#allocation10 + $0x3a0] sm:$0xff]  ;;  %5857 = vmatpush2.bf16.msra.mxu0 %v7858_v15  ;;  %v4312_v15 = vld [vmem:[#allocation10 + $0x1c8] sm:$0xff] }
 0x8dd   :  { %v4495_v57 = vld [vmem:[#allocation10 + $0x780] sm:$0xff]  ;;  %v7851_v47 = vcombine.high %v4367_v21, %v4371_v51  ;;  %5897 = vmatprep.subr.bf16.mxu1 %v7987_v56  ;;  %v7850_v10 = vcombine.low %v4367_v21, %v4371_v51 }
 0x8de   :  { %v4499_v18 = vld [vmem:[#allocation10 + $0x7a0] sm:$0xff]  ;;  %5898 = vmatpush2.bf16.msra.mxu1 %v7986_v46  ;;  %v4316_v46 = vld [vmem:[#allocation10 + $0x1e8] sm:$0xff] }
 0x8df   :  { %v7979_v58 = vcombine.high %v4495_v57, %v4499_v18  ;;  %v4359_v12 = vld [vmem:[#allocation10 + $0x340] sm:$0xff]  ;;  %5858 = vmatprep.subr.bf16.mxu0 %v7851_v47  ;;  %v7978_v11 = vcombine.low %v4495_v57, %v4499_v18  ;;  %v4440_v47 = vld [vmem:[#allocation10 + $0x5c8] sm:$0xff] }
 0x8e0   :  { %v4363_v13 = vld [vmem:[#allocation10 + $0x360] sm:$0xff]  ;;  %5859 = vmatpush2.bf16.msra.mxu0 %v7850_v10  ;;  %v4304_v10 = vld [vmem:[#allocation10 + $0x188] sm:$0xff] }
 0x8e1   :  { %v4487_v44 = vld [vmem:[#allocation10 + $0x740] sm:$0xff]  ;;  %v7843_v42 = vcombine.high %v4359_v12, %v4363_v13  ;;  %5899 = vmatprep.subr.bf16.mxu1 %v7979_v58  ;;  %v7842_v7 = vcombine.low %v4359_v12, %v4363_v13  ;;  %v4444_v58 = vld [vmem:[#allocation10 + $0x5e8] sm:$0xff] }
 0x8e2   :  { %v4491_v45 = vld [vmem:[#allocation10 + $0x760] sm:$0xff]  ;;  %5900 = vmatpush2.bf16.msra.mxu1 %v7978_v11  ;;  %v4308_v11 = vld [vmem:[#allocation10 + $0x1a8] sm:$0xff] }
 0x8e3   :  { %v7971_v8 = vcombine.high %v4487_v44, %v4491_v45  ;;  %v4351_v9 = vld [vmem:[#allocation10 + $0x300] sm:$0xff]  ;;  %5860 = vmatprep.subr.bf16.mxu0 %v7843_v42  ;;  %v7970_v38 = vcombine.low %v4487_v44, %v4491_v45  ;;  %v7797_v44 = vcombine.high %v4312_v15, %v4316_v46  ;;  %v7925_v45 = vcombine.high %v4440_v47, %v4444_v58 }
 0x8e4   :  { %v4355_v40 = vld [vmem:[#allocation10 + $0x320] sm:$0xff]  ;;  %5861 = vmatpush2.bf16.msra.mxu0 %v7842_v7  ;;  %v10003_v42 = vpack.c.bf16 %v4248_v37, %v4248_v37  ;;  %v7789_v7 = vcombine.high %v4304_v10, %v4308_v11  ;;  %v4424_v37 = vld [vmem:[#allocation10 + $0x548] sm:$0xff]  ;;  %v7788_v14 = vcombine.low %v4304_v10, %v4308_v11 }
 0x8e5   :  { %v4479_v41 = vld [vmem:[#allocation10 + $0x700] sm:$0xff]  ;;  %v7835_v39 = vcombine.high %v4351_v9, %v4355_v40  ;;  %5901 = vmatprep.subr.bf16.mxu1 %v7971_v8  ;;  %v7834_v34 = vcombine.low %v4351_v9, %v4355_v40  ;;  %v4432_v8 = vld [vmem:[#allocation10 + $0x588] sm:$0xff]  ;;  %v10008_v40 = vpack.c.bf16 %v4250_v61, %v4250_v61 }
 0x8e6   :  { %v4483_v6 = vld [vmem:[#allocation10 + $0x720] sm:$0xff]  ;;  %5902 = vmatpush2.bf16.msra.mxu1 %v7970_v38  ;;  %v4436_v9 = vld [vmem:[#allocation10 + $0x5a8] sm:$0xff] }
 0x8e7   :  { %v7963_v49 = vcombine.high %v4479_v41, %v4483_v6  ;;  %v4343_v4 = vld [vmem:[#allocation10 + $0x2c0] sm:$0xff]  ;;  %5862 = vmatprep.subr.bf16.mxu0 %v7835_v39  ;;  %v7962_v0 = vcombine.low %v4479_v41, %v4483_v6  ;;  %v7796_v41 = vcombine.low %v4312_v15, %v4316_v46  ;;  %v7924_v6 = vcombine.low %v4440_v47, %v4444_v58  ;;  %v4296_v39 = vld [vmem:[#allocation10 + $0x148] sm:$0xff] }
 0x8e8   :  { %v4347_v36 = vld [vmem:[#allocation10 + $0x2e0] sm:$0xff]  ;;  %5863 = vmatpush2.bf16.msra.mxu0 %v7834_v34  ;;  %v7917_v38 = vcombine.high %v4432_v8, %v4436_v9  ;;  %v7916_v61 = vcombine.low %v4432_v8, %v4436_v9  ;;  %v4416_v34 = vld [vmem:[#allocation10 + $0x508] sm:$0xff] }
 0x8e9   :  { %v4471_v2 = vld [vmem:[#allocation10 + $0x6c0] sm:$0xff]  ;;  %v7827_v32 = vcombine.high %v4343_v4, %v4347_v36  ;;  %5903 = vmatprep.subr.bf16.mxu1 %v7963_v49  ;;  %v7826_v25 = vcombine.low %v4343_v4, %v4347_v36  ;;  %v4428_v49 = vld [vmem:[#allocation10 + $0x568] sm:$0xff]  ;;  %v7781_v4 = vcombine.high %v4296_v39, %v4300_v52 }
 0x8ea   :  { %v4475_v3 = vld [vmem:[#allocation10 + $0x6e0] sm:$0xff]  ;;  %5904 = vmatpush2.bf16.msra.mxu1 %v7962_v0  ;;  %v7909_v36 = vcombine.high %v4424_v37, %v4428_v49  ;;  %v4420_v0 = vld [vmem:[#allocation10 + $0x528] sm:$0xff] }
 0x8eb   :  { %v7955_v33 = vcombine.high %v4471_v2, %v4475_v3  ;;  %v4335_v59 = vld [vmem:[#allocation10 + $0x280] sm:$0xff]  ;;  %5864 = vmatprep.subr.bf16.mxu0 %v7827_v32  ;;  %v7954_v31 = vcombine.low %v4471_v2, %v4475_v3  ;;  %v4288_v2 = vld [vmem:[#allocation10 + $0x108] sm:$0xff]  ;;  %v7780_v32 = vcombine.low %v4296_v39, %v4300_v52 }
 0x8ec   :  { %v4339_v19 = vld [vmem:[#allocation10 + $0x2a0] sm:$0xff]  ;;  %5865 = vmatpush2.bf16.msra.mxu0 %v7826_v25  ;;  %v4292_v3 = vld [vmem:[#allocation10 + $0x128] sm:$0xff] }
 0x8ed   :  { %v4463_v24 = vld [vmem:[#allocation10 + $0x680] sm:$0xff]  ;;  %v7819_v62 = vcombine.high %v4335_v59, %v4339_v19  ;;  %5905 = vmatprep.subr.bf16.mxu1 %v7955_v33  ;;  %v7818_v29 = vcombine.low %v4335_v59, %v4339_v19  ;;  %v7908_v33 = vcombine.low %v4424_v37, %v4428_v49  ;;  %v7773_v59 = vcombine.high %v4288_v2, %v4292_v3  ;;  %v4408_v25 = vld [vmem:[#allocation10 + $0x4c8] sm:$0xff] }
 0x8ee   :  { %v4467_v30 = vld [vmem:[#allocation10 + $0x6a0] sm:$0xff]  ;;  %5906 = vmatpush2.bf16.msra.mxu1 %v7954_v31  ;;  %v7901_v19 = vcombine.high %v4416_v34, %v4420_v0  ;;  %v4412_v31 = vld [vmem:[#allocation10 + $0x4e8] sm:$0xff] }
 0x8ef   :  { %v7947_v63 = vcombine.high %v4463_v24, %v4467_v30  ;;  %v4327_v23 = vld [vmem:[#allocation10 + $0x240] sm:$0xff]  ;;  %5866 = vmatprep.subr.bf16.mxu0 %v7819_v62  ;;  %v7946_v27 = vcombine.low %v4463_v24, %v4467_v30  ;;  %v4280_v24 = vld [vmem:[#allocation10 + $0xc8] sm:$0xff]  ;;  %v7772_v62 = vcombine.low %v4288_v2, %v4292_v3 }
 0x8f0   :  { %v4331_v50 = vld [vmem:[#allocation10 + $0x260] sm:$0xff]  ;;  %5867 = vmatpush2.bf16.msra.mxu0 %v7818_v29  ;;  %v4284_v30 = vld [vmem:[#allocation10 + $0xe8] sm:$0xff] }
 0x8f1   :  { %v4455_v28 = vld [vmem:[#allocation10 + $0x640] sm:$0xff]  ;;  %v7811_v53 = vcombine.high %v4327_v23, %v4331_v50  ;;  %5907 = vmatprep.subr.bf16.mxu1 %v7947_v63  ;;  %v7810_v21 = vcombine.low %v4327_v23, %v4331_v50  ;;  %v7900_v63 = vcombine.low %v4416_v34, %v4420_v0  ;;  %v7765_v23 = vcombine.high %v4280_v24, %v4284_v30  ;;  %v4400_v29 = vld [vmem:[#allocation10 + $0x488] sm:$0xff] }
 0x8f2   :  { %v4459_v22 = vld [vmem:[#allocation10 + $0x660] sm:$0xff]  ;;  %5908 = vmatpush2.bf16.msra.mxu1 %v7946_v27  ;;  %v7893_v50 = vcombine.high %v4408_v25, %v4412_v31  ;;  %v4404_v27 = vld [vmem:[#allocation10 + $0x4a8] sm:$0xff] }
 0x8f3   :  { %v7939_v48 = vcombine.high %v4455_v28, %v4459_v22  ;;  %v4319_v20 = vld [vmem:[#allocation10 + $0x200] sm:$0xff]  ;;  %5868 = vmatprep.subr.bf16.mxu0 %v7811_v53  ;;  %v7938_v51 = vcombine.low %v4455_v28, %v4459_v22  ;;  %v4272_v28 = vld [vmem:[#allocation10 + $0x88] sm:$0xff]  ;;  %v7764_v53 = vcombine.low %v4280_v24, %v4284_v30 }
 0x8f4   :  { %v4323_v26 = vld [vmem:[#allocation10 + $0x220] sm:$0xff]  ;;  %5869 = vmatpush2.bf16.msra.mxu0 %v7810_v21  ;;  %v4276_v22 = vld [vmem:[#allocation10 + $0xa8] sm:$0xff] }
 0x8f5   :  { %v4447_v17 = vld [vmem:[#allocation10 + $0x600] sm:$0xff]  ;;  %v7803_v57 = vcombine.high %v4319_v20, %v4323_v26  ;;  %5909 = vmatprep.subr.bf16.mxu1 %v7939_v48  ;;  %v7802_v12 = vcombine.low %v4319_v20, %v4323_v26  ;;  %v7892_v48 = vcombine.low %v4408_v25, %v4412_v31  ;;  %v7757_v20 = vcombine.high %v4272_v28, %v4276_v22  ;;  %v4392_v21 = vld [vmem:[#allocation10 + $0x448] sm:$0xff] }
 0x8f6   :  { %v4451_v56 = vld [vmem:[#allocation10 + $0x620] sm:$0xff]  ;;  %5910 = vmatpush2.bf16.msra.mxu1 %v7938_v51  ;;  %v7885_v26 = vcombine.high %v4400_v29, %v4404_v27  ;;  %v4396_v51 = vld [vmem:[#allocation10 + $0x468] sm:$0xff] }
 0x8f7   :  { %v7931_v18 = vcombine.high %v4447_v17, %v4451_v56  ;;  %5870 = vmatprep.subr.bf16.mxu0 %v7803_v57  ;;  %v7930_v13 = vcombine.low %v4447_v17, %v4451_v56  ;;  %v4264_v17 = vld [vmem:[#allocation10 + $0x48] sm:$0xff]  ;;  %v7756_v57 = vcombine.low %v4272_v28, %v4276_v22  ;;  %v7877_v46 = vcombine.high %v4392_v21, %v4396_v51 }
 0x8f8   :  { %5871 = vmatpush2.bf16.msra.mxu0 %v7802_v12  ;;  %v4268_v56 = vld [vmem:[#allocation10 + $0x68] sm:$0xff] }
 0x8f9   :  { %5911 = vmatprep.subr.bf16.mxu1 %v7931_v18  ;;  %5922 = vmatprep.subr.bf16.mxu0 %v7797_v44  ;;  %v7884_v18 = vcombine.low %v4400_v29, %v4404_v27  ;;  %v7749_v15 = vcombine.high %v4264_v17, %v4268_v56  ;;  %v4256_v47 = vld [vmem:[#allocation10 + $0x8] sm:$0xff]  ;;  %v7748_v44 = vcombine.low %v4264_v17, %v4268_v56 }
 0x8fa   :  { %5912 = vmatpush2.bf16.msra.mxu1 %v7930_v13  ;;  %v4260_v58 = vld [vmem:[#allocation10 + $0x28] sm:$0xff] }
 0x8fb   :  { %5963 = vmatprep.subr.bf16.mxu1 %v7925_v45  ;;  %5873 = vmatmul.mubr.bf16.vlgmr.msra.gmra.mxu0 %v10003_v42  ;;  %v4384_v12 = vld [vmem:[#allocation10 + $0x408] sm:$0xff]  ;;  %v7876_v45 = vcombine.low %v4392_v21, %v4396_v51  ;;  %v7741_v10 = vcombine.high %v4256_v47, %v4260_v58 }
 0x8fc   :  { %5923 = vmatpush1.bf16.msra.mxu0 %v7796_v41  ;;  %5954 = vmatprep.mubr.bf16.mxu0 %v9994_v54  ;;  %v4388_v13 = vld [vmem:[#allocation10 + $0x428] sm:$0xff] }
 0x8fd   :  { %5914 = vmatmul.mubr.bf16.vlgmr.msra.gmra.mxu1 %v10008_v40  ;;  %5924 = vmatprep.subr.bf16.mxu0 %v7789_v7  ;;  %v7869_v11 = vcombine.high %v4384_v12, %v4388_v13  ;;  %v4376_v8 = vld [vmem:[#allocation10 + $0x3c8] sm:$0xff]  ;;  %v7740_v7 = vcombine.low %v4256_v47, %v4260_v58 }
 0x8fe   :  { %5964 = vmatpush1.bf16.msra.mxu1 %v7924_v6  ;;  %5995 = vmatprep.mubr.bf16.mxu1 %v9996_v60  ;;  %v4380_v9 = vld [vmem:[#allocation10 + $0x3e8] sm:$0xff] }
 0x8ff   :  { %5965 = vmatprep.subr.bf16.mxu1 %v7917_v38  ;;  %v4504_v41 = vld [vmem:[#allocation10 + $0x7c8] sm:$0xff]  ;;  %v7868_v38 = vcombine.low %v4384_v12, %v4388_v13  ;;  %v7861_v39 = vcombine.high %v4376_v8, %v4380_v9 }
 0x900   :  { %5925 = vmatpush1.bf16.msra.mxu0 %v7788_v14  ;;  %v4508_v6 = vld [vmem:[#allocation10 + $0x7e8] sm:$0xff] }
 0x901   :  { %5926 = vmatprep.subr.bf16.mxu0 %v7781_v4  ;;  %v7989_v52 = vcombine.high %v4504_v41, %v4508_v6  ;;  %v4368_v37 = vld [vmem:[#allocation10 + $0x388] sm:$0xff]  ;;  %v7860_v4 = vcombine.low %v4376_v8, %v4380_v9 }
 0x902   :  { %5966 = vmatpush1.bf16.msra.mxu1 %v7916_v61  ;;  %v4372_v49 = vld [vmem:[#allocation10 + $0x3a8] sm:$0xff] }
 0x903   :  { %5967 = vmatprep.subr.bf16.mxu1 %v7909_v36  ;;  %v4496_v14 = vld [vmem:[#allocation10 + $0x788] sm:$0xff]  ;;  %v7988_v36 = vcombine.low %v4504_v41, %v4508_v6  ;;  %v7853_v2 = vcombine.high %v4368_v37, %v4372_v49 }
 0x904   :  { %5927 = vmatpush1.bf16.msra.mxu0 %v7780_v32  ;;  %v4500_v61 = vld [vmem:[#allocation10 + $0x7a8] sm:$0xff] }
 0x905   :  { %5928 = vmatprep.subr.bf16.mxu0 %v7773_v59  ;;  %v7981_v3 = vcombine.high %v4496_v14, %v4500_v61  ;;  %v4360_v34 = vld [vmem:[#allocation10 + $0x348] sm:$0xff]  ;;  %v7852_v59 = vcombine.low %v4368_v37, %v4372_v49 }
 0x906   :  { %5968 = vmatpush1.bf16.msra.mxu1 %v7908_v33  ;;  %v4364_v0 = vld [vmem:[#allocation10 + $0x368] sm:$0xff] }
 0x907   :  { %5969 = vmatprep.subr.bf16.mxu1 %v7901_v19  ;;  %v4488_v32 = vld [vmem:[#allocation10 + $0x748] sm:$0xff]  ;;  %v7980_v19 = vcombine.low %v4496_v14, %v4500_v61  ;;  %v7845_v24 = vcombine.high %v4360_v34, %v4364_v0  ;;  %v4313_v14 = vld [vmem:[#allocation10 + $0x1d0] sm:$0xff] }
 0x908   :  { %5929 = vmatpush1.bf16.msra.mxu0 %v7772_v62  ;;  %v4492_v33 = vld [vmem:[#allocation10 + $0x768] sm:$0xff]  ;;  %v4317_v61 = vld [vmem:[#allocation10 + $0x1f0] sm:$0xff] }
 0x909   :  { %5930 = vmatprep.subr.bf16.mxu0 %v7765_v23  ;;  %v7973_v30 = vcombine.high %v4488_v32, %v4492_v33  ;;  %v4352_v25 = vld [vmem:[#allocation10 + $0x308] sm:$0xff]  ;;  %v7844_v23 = vcombine.low %v4360_v34, %v4364_v0  ;;  %v7799_v34 = vcombine.high %v4313_v14, %v4317_v61 }
 0x90a   :  { %5970 = vmatpush1.bf16.msra.mxu1 %v7900_v63  ;;  %v4356_v31 = vld [vmem:[#allocation10 + $0x328] sm:$0xff] }
 0x90b   :  { %5971 = vmatprep.subr.bf16.mxu1 %v7893_v50  ;;  %v4480_v62 = vld [vmem:[#allocation10 + $0x708] sm:$0xff]  ;;  %v7972_v50 = vcombine.low %v4488_v32, %v4492_v33  ;;  %v7837_v28 = vcombine.high %v4352_v25, %v4356_v31  ;;  %v4305_v32 = vld [vmem:[#allocation10 + $0x190] sm:$0xff] }
 0x90c   :  { %5931 = vmatpush1.bf16.msra.mxu0 %v7764_v53  ;;  %v4484_v63 = vld [vmem:[#allocation10 + $0x728] sm:$0xff]  ;;  %v4309_v33 = vld [vmem:[#allocation10 + $0x1b0] sm:$0xff] }
 0x90d   :  { %5932 = vmatprep.subr.bf16.mxu0 %v7757_v20  ;;  %v7965_v22 = vcombine.high %v4480_v62, %v4484_v63  ;;  %v4344_v29 = vld [vmem:[#allocation10 + $0x2c8] sm:$0xff]  ;;  %v7836_v20 = vcombine.low %v4352_v25, %v4356_v31  ;;  %v7791_v25 = vcombine.high %v4305_v32, %v4309_v33 }
 0x90e   :  { %5972 = vmatpush1.bf16.msra.mxu1 %v7892_v48  ;;  %v4348_v27 = vld [vmem:[#allocation10 + $0x2e8] sm:$0xff] }
 0x90f   :  { %5973 = vmatprep.subr.bf16.mxu1 %v7885_v26  ;;  %v4472_v53 = vld [vmem:[#allocation10 + $0x6c8] sm:$0xff]  ;;  %v7964_v26 = vcombine.low %v4480_v62, %v4484_v63  ;;  %v7829_v17 = vcombine.high %v4344_v29, %v4348_v27  ;;  %v4297_v62 = vld [vmem:[#allocation10 + $0x150] sm:$0xff] }
 0x910   :  { %5933 = vmatpush1.bf16.msra.mxu0 %v7756_v57  ;;  %v4476_v48 = vld [vmem:[#allocation10 + $0x6e8] sm:$0xff]  ;;  %v4301_v63 = vld [vmem:[#allocation10 + $0x170] sm:$0xff] }
 0x911   :  { %5934 = vmatprep.subr.bf16.mxu0 %v7749_v15  ;;  %v7957_v56 = vcombine.high %v4472_v53, %v4476_v48  ;;  %v4336_v21 = vld [vmem:[#allocation10 + $0x288] sm:$0xff]  ;;  %v7828_v15 = vcombine.low %v4344_v29, %v4348_v27  ;;  %v7783_v29 = vcombine.high %v4297_v62, %v4301_v63 }
 0x912   :  { %5974 = vmatpush1.bf16.msra.mxu1 %v7884_v18  ;;  %v4340_v51 = vld [vmem:[#allocation10 + $0x2a8] sm:$0xff] }
 0x913   :  { %5975 = vmatprep.subr.bf16.mxu1 %v7877_v46  ;;  %v4464_v57 = vld [vmem:[#allocation10 + $0x688] sm:$0xff]  ;;  %v7956_v46 = vcombine.low %v4472_v53, %v4476_v48  ;;  %v7821_v47 = vcombine.high %v4336_v21, %v4340_v51  ;;  %v4289_v53 = vld [vmem:[#allocation10 + $0x110] sm:$0xff] }
 0x914   :  { %5935 = vmatpush1.bf16.msra.mxu0 %v7748_v44  ;;  %v4468_v18 = vld [vmem:[#allocation10 + $0x6a8] sm:$0xff]  ;;  %v4293_v48 = vld [vmem:[#allocation10 + $0x130] sm:$0xff] }
 0x915   :  { %5936 = vmatprep.subr.bf16.mxu0 %v7741_v10  ;;  %v7949_v58 = vcombine.high %v4464_v57, %v4468_v18  ;;  %v4328_v12 = vld [vmem:[#allocation10 + $0x248] sm:$0xff]  ;;  %v7820_v10 = vcombine.low %v4336_v21, %v4340_v51  ;;  %v7775_v21 = vcombine.high %v4289_v53, %v4293_v48 }
 0x916   :  { %5976 = vmatpush1.bf16.msra.mxu1 %v7876_v45  ;;  %v4332_v13 = vld [vmem:[#allocation10 + $0x268] sm:$0xff] }
 0x917   :  { %5977 = vmatprep.subr.bf16.mxu1 %v7869_v11  ;;  %v4456_v44 = vld [vmem:[#allocation10 + $0x648] sm:$0xff]  ;;  %v7948_v11 = vcombine.low %v4464_v57, %v4468_v18  ;;  %v7813_v8 = vcombine.high %v4328_v12, %v4332_v13  ;;  %v4281_v57 = vld [vmem:[#allocation10 + $0xd0] sm:$0xff] }
 0x918   :  { %5937 = vmatpush1.bf16.msra.mxu0 %v7740_v7  ;;  %v4460_v45 = vld [vmem:[#allocation10 + $0x668] sm:$0xff]  ;;  %v4285_v18 = vld [vmem:[#allocation10 + $0xf0] sm:$0xff] }
 0x919   :  { %5938 = vmatprep.subr.bf16.mxu0 %v7861_v39  ;;  %v7941_v9 = vcombine.high %v4456_v44, %v4460_v45  ;;  %v4320_v41 = vld [vmem:[#allocation10 + $0x208] sm:$0xff]  ;;  %v7812_v39 = vcombine.low %v4328_v12, %v4332_v13  ;;  %v7767_v12 = vcombine.high %v4281_v57, %v4285_v18 }
 0x91a   :  { %5978 = vmatpush1.bf16.msra.mxu1 %v7868_v38  ;;  %v4324_v6 = vld [vmem:[#allocation10 + $0x228] sm:$0xff] }
 0x91b   :  { %5979 = vmatprep.subr.bf16.mxu1 %v7989_v52  ;;  %v4448_v7 = vld [vmem:[#allocation10 + $0x608] sm:$0xff]  ;;  %v7940_v52 = vcombine.low %v4456_v44, %v4460_v45  ;;  %v7805_v37 = vcombine.high %v4320_v41, %v4324_v6  ;;  %v4273_v44 = vld [vmem:[#allocation10 + $0x90] sm:$0xff] }
 0x91c   :  { %5939 = vmatpush2.bf16.msra.mxu0 %v7860_v4  ;;  %v4452_v38 = vld [vmem:[#allocation10 + $0x628] sm:$0xff]  ;;  %v4441_v4 = vld [vmem:[#allocation10 + $0x5d0] sm:$0xff] }
 0x91d   :  { %5940 = vmatprep.subr.bf16.mxu0 %v7853_v2  ;;  %v7933_v49 = vcombine.high %v4448_v7, %v4452_v38  ;;  %v7804_v2 = vcombine.low %v4320_v41, %v4324_v6  ;;  %v4277_v45 = vld [vmem:[#allocation10 + $0xb0] sm:$0xff] }
 0x91e   :  { %5980 = vmatpush2.bf16.msra.mxu1 %v7988_v36  ;;  %v4445_v36 = vld [vmem:[#allocation10 + $0x5f0] sm:$0xff]  ;;  %v7759_v41 = vcombine.high %v4273_v44, %v4277_v45 }
 0x91f   :  { %5981 = vmatprep.subr.bf16.mxu1 %v7981_v3  ;;  %v7932_v3 = vcombine.low %v4448_v7, %v4452_v38  ;;  %v7927_v0 = vcombine.high %v4441_v4, %v4445_v36  ;;  %v4265_v7 = vld [vmem:[#allocation10 + $0x50] sm:$0xff] }
 0x920   :  { %5941 = vmatpush2.bf16.msra.mxu0 %v7852_v59  ;;  %v4433_v59 = vld [vmem:[#allocation10 + $0x590] sm:$0xff] }
 0x921   :  { %5942 = vmatprep.subr.bf16.mxu0 %v7845_v24  ;;  %v7798_v24 = vcombine.low %v4313_v14, %v4317_v61  ;;  %v4269_v38 = vld [vmem:[#allocation10 + $0x70] sm:$0xff] }
 0x922   :  { %5982 = vmatpush2.bf16.msra.mxu1 %v7980_v19  ;;  %v4437_v19 = vld [vmem:[#allocation10 + $0x5b0] sm:$0xff]  ;;  %v7751_v14 = vcombine.high %v4265_v7, %v4269_v38 }
 0x923   :  { %5983 = vmatprep.subr.bf16.mxu1 %v7973_v30  ;;  %v7926_v30 = vcombine.low %v4441_v4, %v4445_v36  ;;  %v7919_v31 = vcombine.high %v4433_v59, %v4437_v19  ;;  %v4257_v4 = vld [vmem:[#allocation10 + $0x10] sm:$0xff] }
 0x924   :  { %5943 = vmatpush2.bf16.msra.mxu0 %v7844_v23  ;;  %v4425_v23 = vld [vmem:[#allocation10 + $0x550] sm:$0xff] }
 0x925   :  { %5944 = vmatprep.subr.bf16.mxu0 %v7837_v28  ;;  %v7790_v28 = vcombine.low %v4305_v32, %v4309_v33  ;;  %v4261_v36 = vld [vmem:[#allocation10 + $0x30] sm:$0xff] }
 0x926   :  { %5984 = vmatpush2.bf16.msra.mxu1 %v7972_v50  ;;  %v4429_v50 = vld [vmem:[#allocation10 + $0x570] sm:$0xff]  ;;  %v7743_v32 = vcombine.high %v4257_v4, %v4261_v36 }
 0x927   :  { %5985 = vmatprep.subr.bf16.mxu1 %v7965_v22  ;;  %v7918_v22 = vcombine.low %v4433_v59, %v4437_v19  ;;  %v7911_v27 = vcombine.high %v4425_v23, %v4429_v50  ;;  %v4377_v59 = vld [vmem:[#allocation10 + $0x3d0] sm:$0xff] }
 0x928   :  { %5945 = vmatpush2.bf16.msra.mxu0 %v7836_v20  ;;  %v4417_v20 = vld [vmem:[#allocation10 + $0x510] sm:$0xff] }
 0x929   :  { %5946 = vmatprep.subr.bf16.mxu0 %v7829_v17  ;;  %v7782_v17 = vcombine.low %v4297_v62, %v4301_v63  ;;  %v4381_v19 = vld [vmem:[#allocation10 + $0x3f0] sm:$0xff] }
 0x92a   :  { %5986 = vmatpush2.bf16.msra.mxu1 %v7964_v26  ;;  %v4421_v26 = vld [vmem:[#allocation10 + $0x530] sm:$0xff]  ;;  %v7863_v62 = vcombine.high %v4377_v59, %v4381_v19 }
 0x92b   :  { %5987 = vmatprep.subr.bf16.mxu1 %v7957_v56  ;;  %v7910_v56 = vcombine.low %v4425_v23, %v4429_v50  ;;  %v7903_v51 = vcombine.high %v4417_v20, %v4421_v26  ;;  %v4369_v23 = vld [vmem:[#allocation10 + $0x390] sm:$0xff] }
 0x92c   :  { %5947 = vmatpush2.bf16.msra.mxu0 %v7828_v15  ;;  %v4409_v15 = vld [vmem:[#allocation10 + $0x4d0] sm:$0xff] }
 0x92d   :  { %5948 = vmatprep.subr.bf16.mxu0 %v7821_v47  ;;  %v7774_v47 = vcombine.low %v4289_v53, %v4293_v48  ;;  %v4373_v50 = vld [vmem:[#allocation10 + $0x3b0] sm:$0xff] }
 0x92e   :  { %5988 = vmatpush2.bf16.msra.mxu1 %v7956_v46  ;;  %v4413_v46 = vld [vmem:[#allocation10 + $0x4f0] sm:$0xff]  ;;  %v7855_v53 = vcombine.high %v4369_v23, %v4373_v50 }
 0x92f   :  { %5989 = vmatprep.subr.bf16.mxu1 %v7949_v58  ;;  %v7902_v58 = vcombine.low %v4417_v20, %v4421_v26  ;;  %v7895_v13 = vcombine.high %v4409_v15, %v4413_v46  ;;  %v4361_v20 = vld [vmem:[#allocation10 + $0x350] sm:$0xff] }
 0x930   :  { %5949 = vmatpush2.bf16.msra.mxu0 %v7820_v10  ;;  %v4401_v10 = vld [vmem:[#allocation10 + $0x490] sm:$0xff] }
 0x931   :  { %5950 = vmatprep.subr.bf16.mxu0 %v7813_v8  ;;  %v7766_v8 = vcombine.low %v4281_v57, %v4285_v18  ;;  %v4365_v26 = vld [vmem:[#allocation10 + $0x370] sm:$0xff] }
 0x932   :  { %5990 = vmatpush2.bf16.msra.mxu1 %v7948_v11  ;;  %v4405_v11 = vld [vmem:[#allocation10 + $0x4b0] sm:$0xff]  ;;  %v7847_v57 = vcombine.high %v4361_v20, %v4365_v26 }
 0x933   :  { %5991 = vmatprep.subr.bf16.mxu1 %v7941_v9  ;;  %v7894_v9 = vcombine.low %v4409_v15, %v4413_v46  ;;  %v7887_v6 = vcombine.high %v4401_v10, %v4405_v11  ;;  %v4353_v15 = vld [vmem:[#allocation10 + $0x310] sm:$0xff] }
 0x934   :  { %5951 = vmatpush2.bf16.msra.mxu0 %v7812_v39  ;;  %v4393_v39 = vld [vmem:[#allocation10 + $0x450] sm:$0xff] }
 0x935   :  { %5952 = vmatprep.subr.bf16.mxu0 %v7805_v37  ;;  %v7758_v37 = vcombine.low %v4273_v44, %v4277_v45  ;;  %v4357_v46 = vld [vmem:[#allocation10 + $0x330] sm:$0xff] }
 0x936   :  { %5992 = vmatpush2.bf16.msra.mxu1 %v7940_v52  ;;  %v4397_v52 = vld [vmem:[#allocation10 + $0x470] sm:$0xff]  ;;  %v7839_v44 = vcombine.high %v4353_v15, %v4357_v46 }
 0x937   :  { %5993 = vmatprep.subr.bf16.mxu1 %v7933_v49  ;;  %v7886_v49 = vcombine.low %v4401_v10, %v4405_v11  ;;  %v7879_v61 = vcombine.high %v4393_v39, %v4397_v52  ;;  %v4345_v10 = vld [vmem:[#allocation10 + $0x2d0] sm:$0xff] }
 0x938   :  { %5953 = vmatpush2.bf16.msra.mxu0 %v7804_v2  ;;  %v4385_v2 = vld [vmem:[#allocation10 + $0x410] sm:$0xff] }
 0x939   :  { %6004 = vmatprep.subr.bf16.mxu0 %v7799_v34  ;;  %v7750_v34 = vcombine.low %v4265_v7, %v4269_v38  ;;  %v4349_v11 = vld [vmem:[#allocation10 + $0x2f0] sm:$0xff] }
 0x93a   :  { %5994 = vmatpush2.bf16.msra.mxu1 %v7932_v3  ;;  %v4389_v3 = vld [vmem:[#allocation10 + $0x430] sm:$0xff]  ;;  %v7831_v7 = vcombine.high %v4345_v10, %v4349_v11 }
 0x93b   :  { %6045 = vmatprep.subr.bf16.mxu1 %v7927_v0  ;;  %5955 = vmatmul.mubr.bf16.vlgmr.msra.gmra.mxu0 %v10003_v42  ;;  %v7878_v0 = vcombine.low %v4393_v39, %v4397_v52  ;;  %v7871_v33 = vcombine.high %v4385_v2, %v4389_v3  ;;  %v4337_v39 = vld [vmem:[#allocation10 + $0x290] sm:$0xff] }
 0x93c   :  { %6005 = vmatpush1.bf16.msra.mxu0 %v7798_v24  ;;  %6036 = vmatprep.mubr.bf16.mxu0 %v9994_v54  ;;  %v4505_v24 = vld [vmem:[#allocation10 + $0x7d0] sm:$0xff] }
 0x93d   :  { %5996 = vmatmul.mubr.bf16.vlgmr.msra.gmra.mxu1 %v10008_v40  ;;  %6006 = vmatprep.subr.bf16.mxu0 %v7791_v25  ;;  %v7742_v25 = vcombine.low %v4257_v4, %v4261_v36  ;;  %v4341_v52 = vld [vmem:[#allocation10 + $0x2b0] sm:$0xff] }
 0x93e   :  { %6046 = vmatpush1.bf16.msra.mxu1 %v7926_v30  ;;  %6077 = vmatprep.mubr.bf16.mxu1 %v9996_v60  ;;  %v4509_v30 = vld [vmem:[#allocation10 + $0x7f0] sm:$0xff]  ;;  %v7823_v4 = vcombine.high %v4337_v39, %v4341_v52 }
 0x93f   :  { %6047 = vmatprep.subr.bf16.mxu1 %v7919_v31  ;;  %v7870_v31 = vcombine.low %v4385_v2, %v4389_v3  ;;  %v7991_v63 = vcombine.high %v4505_v24, %v4509_v30  ;;  %v4329_v2 = vld [vmem:[#allocation10 + $0x250] sm:$0xff] }
 0x940   :  { %6007 = vmatpush1.bf16.msra.mxu0 %v7790_v28  ;;  %v4497_v28 = vld [vmem:[#allocation10 + $0x790] sm:$0xff] }
 0x941   :  { %6008 = vmatprep.subr.bf16.mxu0 %v7783_v29  ;;  %v7862_v29 = vcombine.low %v4377_v59, %v4381_v19  ;;  %v4333_v3 = vld [vmem:[#allocation10 + $0x270] sm:$0xff] }
 0x942   :  { %6048 = vmatpush1.bf16.msra.mxu1 %v7918_v22  ;;  %v4501_v22 = vld [vmem:[#allocation10 + $0x7b0] sm:$0xff]  ;;  %v7815_v59 = vcombine.high %v4329_v2, %v4333_v3 }
 0x943   :  { %6049 = vmatprep.subr.bf16.mxu1 %v7911_v27  ;;  %v7990_v27 = vcombine.low %v4505_v24, %v4509_v30  ;;  %v7983_v48 = vcombine.high %v4497_v28, %v4501_v22  ;;  %v4321_v24 = vld [vmem:[#allocation10 + $0x210] sm:$0xff] }
 0x944   :  { %6009 = vmatpush1.bf16.msra.mxu0 %v7782_v17  ;;  %v4489_v17 = vld [vmem:[#allocation10 + $0x750] sm:$0xff] }
 0x945   :  { %6010 = vmatprep.subr.bf16.mxu0 %v7775_v21  ;;  %v7854_v21 = vcombine.low %v4369_v23, %v4373_v50  ;;  %v4325_v30 = vld [vmem:[#allocation10 + $0x230] sm:$0xff] }
 0x946   :  { %6050 = vmatpush1.bf16.msra.mxu1 %v7910_v56  ;;  %v4493_v56 = vld [vmem:[#allocation10 + $0x770] sm:$0xff]  ;;  %v7807_v23 = vcombine.high %v4321_v24, %v4325_v30 }
 0x947   :  { %6051 = vmatprep.subr.bf16.mxu1 %v7903_v51  ;;  %v7982_v51 = vcombine.low %v4497_v28, %v4501_v22  ;;  %v7975_v18 = vcombine.high %v4489_v17, %v4493_v56  ;;  %v4314_v28 = vld [vmem:[#allocation10 + $0x1d8] sm:$0xff] }
 0x948   :  { %6011 = vmatpush1.bf16.msra.mxu0 %v7774_v47  ;;  %v4481_v47 = vld [vmem:[#allocation10 + $0x710] sm:$0xff]  ;;  %v4318_v22 = vld [vmem:[#allocation10 + $0x1f8] sm:$0xff] }
 0x949   :  { %6012 = vmatprep.subr.bf16.mxu0 %v7767_v12  ;;  %v7846_v12 = vcombine.low %v4361_v20, %v4365_v26  ;;  %v7801_v20 = vcombine.high %v4314_v28, %v4318_v22 }
 0x94a   :  { %6052 = vmatpush1.bf16.msra.mxu1 %v7902_v58  ;;  %v4485_v58 = vld [vmem:[#allocation10 + $0x730] sm:$0xff] }
 0x94b   :  { %6053 = vmatprep.subr.bf16.mxu1 %v7895_v13  ;;  %v7974_v13 = vcombine.low %v4489_v17, %v4493_v56  ;;  %v7967_v45 = vcombine.high %v4481_v47, %v4485_v58  ;;  %v4306_v17 = vld [vmem:[#allocation10 + $0x198] sm:$0xff] }
 0x94c   :  { %6013 = vmatpush1.bf16.msra.mxu0 %v7766_v8  ;;  %v4473_v8 = vld [vmem:[#allocation10 + $0x6d0] sm:$0xff]  ;;  %v4310_v56 = vld [vmem:[#allocation10 + $0x1b8] sm:$0xff] }
 0x94d   :  { %6014 = vmatprep.subr.bf16.mxu0 %v7759_v41  ;;  %v7838_v41 = vcombine.low %v4353_v15, %v4357_v46  ;;  %v7793_v15 = vcombine.high %v4306_v17, %v4310_v56 }
 0x94e   :  { %6054 = vmatpush1.bf16.msra.mxu1 %v7894_v9  ;;  %v4477_v9 = vld [vmem:[#allocation10 + $0x6f0] sm:$0xff] }
 0x94f   :  { %6055 = vmatprep.subr.bf16.mxu1 %v7887_v6  ;;  %v7966_v6 = vcombine.low %v4481_v47, %v4485_v58  ;;  %v7959_v38 = vcombine.high %v4473_v8, %v4477_v9  ;;  %v4298_v47 = vld [vmem:[#allocation10 + $0x158] sm:$0xff] }
 0x950   :  { %6015 = vmatpush1.bf16.msra.mxu0 %v7758_v37  ;;  %v4465_v37 = vld [vmem:[#allocation10 + $0x690] sm:$0xff]  ;;  %v4302_v58 = vld [vmem:[#allocation10 + $0x178] sm:$0xff] }
 0x951   :  { %6016 = vmatprep.subr.bf16.mxu0 %v7751_v14  ;;  %v7830_v14 = vcombine.low %v4345_v10, %v4349_v11  ;;  %v7785_v10 = vcombine.high %v4298_v47, %v4302_v58 }
 0x952   :  { %6056 = vmatpush1.bf16.msra.mxu1 %v7886_v49  ;;  %v4469_v49 = vld [vmem:[#allocation10 + $0x6b0] sm:$0xff] }
 0x953   :  { %6057 = vmatprep.subr.bf16.mxu1 %v7879_v61  ;;  %v7958_v61 = vcombine.low %v4473_v8, %v4477_v9  ;;  %v7951_v36 = vcombine.high %v4465_v37, %v4469_v49  ;;  %v4290_v8 = vld [vmem:[#allocation10 + $0x118] sm:$0xff] }
 0x954   :  { %6017 = vmatpush1.bf16.msra.mxu0 %v7750_v34  ;;  %v4457_v34 = vld [vmem:[#allocation10 + $0x650] sm:$0xff]  ;;  %v4294_v9 = vld [vmem:[#allocation10 + $0x138] sm:$0xff] }
 0x955   :  { %6018 = vmatprep.subr.bf16.mxu0 %v7743_v32  ;;  %v7822_v32 = vcombine.low %v4337_v39, %v4341_v52  ;;  %v7777_v39 = vcombine.high %v4290_v8, %v4294_v9 }
 0x956   :  { %6058 = vmatpush1.bf16.msra.mxu1 %v7878_v0  ;;  %v4461_v0 = vld [vmem:[#allocation10 + $0x670] sm:$0xff] }
 0x957   :  { %6059 = vmatprep.subr.bf16.mxu1 %v7871_v33  ;;  %v7950_v33 = vcombine.low %v4465_v37, %v4469_v49  ;;  %v7943_v19 = vcombine.high %v4457_v34, %v4461_v0  ;;  %v4282_v37 = vld [vmem:[#allocation10 + $0xd8] sm:$0xff] }
 0x958   :  { %6019 = vmatpush1.bf16.msra.mxu0 %v7742_v25  ;;  %v4449_v25 = vld [vmem:[#allocation10 + $0x610] sm:$0xff]  ;;  %v4286_v49 = vld [vmem:[#allocation10 + $0xf8] sm:$0xff] }
 0x959   :  { %6020 = vmatprep.subr.bf16.mxu0 %v7863_v62  ;;  %v7814_v62 = vcombine.low %v4329_v2, %v4333_v3  ;;  %v4274_v2 = vld [vmem:[#allocation10 + $0x98] sm:$0xff] }
 0x95a   :  { %6060 = vmatpush1.bf16.msra.mxu1 %v7870_v31  ;;  %v4453_v31 = vld [vmem:[#allocation10 + $0x630] sm:$0xff]  ;;  %v4278_v3 = vld [vmem:[#allocation10 + $0xb8] sm:$0xff] }
 0x95b   :  { %6061 = vmatprep.subr.bf16.mxu1 %v7991_v63  ;;  %v7942_v63 = vcombine.low %v4457_v34, %v4461_v0  ;;  %v7935_v50 = vcombine.high %v4449_v25, %v4453_v31  ;;  %v4402_v34 = vld [vmem:[#allocation10 + $0x498] sm:$0xff] }
 0x95c   :  { %6021 = vmatpush2.bf16.msra.mxu0 %v7862_v29  ;;  %v4442_v29 = vld [vmem:[#allocation10 + $0x5d8] sm:$0xff] }
 0x95d   :  { %6022 = vmatprep.subr.bf16.mxu0 %v7855_v53  ;;  %v7806_v53 = vcombine.low %v4321_v24, %v4325_v30  ;;  %v4406_v0 = vld [vmem:[#allocation10 + $0x4b8] sm:$0xff] }
 0x95e   :  { %6062 = vmatpush2.bf16.msra.mxu1 %v7990_v27  ;;  %v4446_v27 = vld [vmem:[#allocation10 + $0x5f8] sm:$0xff] }
 0x95f   :  { %6063 = vmatprep.subr.bf16.mxu1 %v7983_v48  ;;  %v7934_v48 = vcombine.low %v4449_v25, %v4453_v31  ;;  %v7929_v26 = vcombine.high %v4442_v29, %v4446_v27  ;;  %v4266_v24 = vld [vmem:[#allocation10 + $0x58] sm:$0xff] }
 0x960   :  { %6023 = vmatpush2.bf16.msra.mxu0 %v7854_v21  ;;  %v4434_v21 = vld [vmem:[#allocation10 + $0x598] sm:$0xff] }
 0x961   :  { %6024 = vmatprep.subr.bf16.mxu0 %v7847_v57  ;;  %v7800_v57 = vcombine.low %v4314_v28, %v4318_v22  ;;  %v4270_v30 = vld [vmem:[#allocation10 + $0x78] sm:$0xff] }
 0x962   :  { %6064 = vmatpush2.bf16.msra.mxu1 %v7982_v51  ;;  %v4438_v51 = vld [vmem:[#allocation10 + $0x5b8] sm:$0xff] }
 0x963   :  { %6065 = vmatprep.subr.bf16.mxu1 %v7975_v18  ;;  %v7928_v18 = vcombine.low %v4442_v29, %v4446_v27  ;;  %v7921_v46 = vcombine.high %v4434_v21, %v4438_v51  ;;  %v4394_v25 = vld [vmem:[#allocation10 + $0x458] sm:$0xff] }
 0x964   :  { %6025 = vmatpush2.bf16.msra.mxu0 %v7846_v12  ;;  %v4426_v12 = vld [vmem:[#allocation10 + $0x558] sm:$0xff] }
 0x965   :  { %6026 = vmatprep.subr.bf16.mxu0 %v7839_v44  ;;  %v7792_v44 = vcombine.low %v4306_v17, %v4310_v56  ;;  %v4398_v31 = vld [vmem:[#allocation10 + $0x478] sm:$0xff] }
 0x966   :  { %6066 = vmatpush2.bf16.msra.mxu1 %v7974_v13  ;;  %v4430_v13 = vld [vmem:[#allocation10 + $0x578] sm:$0xff] }
 0x967   :  { %6067 = vmatprep.subr.bf16.mxu1 %v7967_v45  ;;  %v7920_v45 = vcombine.low %v4434_v21, %v4438_v51  ;;  %v7913_v11 = vcombine.high %v4426_v12, %v4430_v13  ;;  %v4258_v28 = vld [vmem:[#allocation10 + $0x18] sm:$0xff] }
 0x968   :  { %6027 = vmatpush2.bf16.msra.mxu0 %v7838_v41  ;;  %v4418_v41 = vld [vmem:[#allocation10 + $0x518] sm:$0xff] }
 0x969   :  { %6028 = vmatprep.subr.bf16.mxu0 %v7831_v7  ;;  %v7784_v7 = vcombine.low %v4298_v47, %v4302_v58  ;;  %v4262_v22 = vld [vmem:[#allocation10 + $0x38] sm:$0xff] }
 0x96a   :  { %6068 = vmatpush2.bf16.msra.mxu1 %v7966_v6  ;;  %v4422_v6 = vld [vmem:[#allocation10 + $0x538] sm:$0xff] }
 0x96b   :  { %6069 = vmatprep.subr.bf16.mxu1 %v7959_v38  ;;  %v7912_v38 = vcombine.low %v4426_v12, %v4430_v13  ;;  %v7905_v52 = vcombine.high %v4418_v41, %v4422_v6  ;;  %v4386_v29 = vld [vmem:[#allocation10 + $0x418] sm:$0xff] }
 0x96c   :  { %6029 = vmatpush2.bf16.msra.mxu0 %v7830_v14  ;;  %v4410_v14 = vld [vmem:[#allocation10 + $0x4d8] sm:$0xff] }
 0x96d   :  { %6030 = vmatprep.subr.bf16.mxu0 %v7823_v4  ;;  %v7776_v4 = vcombine.low %v4290_v8, %v4294_v9  ;;  %v4390_v27 = vld [vmem:[#allocation10 + $0x438] sm:$0xff] }
 0x96e   :  { %6070 = vmatpush2.bf16.msra.mxu1 %v7958_v61  ;;  %v4414_v61 = vld [vmem:[#allocation10 + $0x4f8] sm:$0xff] }
 0x96f   :  { %6071 = vmatprep.subr.bf16.mxu1 %v7951_v36  ;;  %v7769_v36 = vcombine.high %v4282_v37, %v4286_v49  ;;  %v4378_v17 = vld [vmem:[#allocation10 + $0x3d8] sm:$0xff] }
 0x970   :  { %6031 = vmatpush2.bf16.msra.mxu0 %v7822_v32  ;;  %v7768_v32 = vcombine.low %v4282_v37, %v4286_v49  ;;  %v4382_v56 = vld [vmem:[#allocation10 + $0x3f8] sm:$0xff] }
 0x971   :  { %6032 = vmatprep.subr.bf16.mxu0 %v7815_v59  ;;  %v7761_v59 = vcombine.high %v4274_v2, %v4278_v3  ;;  %v4506_v21 = vld [vmem:[#allocation10 + $0x7d8] sm:$0xff] }
 0x972   :  { %6072 = vmatpush2.bf16.msra.mxu1 %v7950_v33  ;;  %v7896_v33 = vcombine.low %v4410_v14, %v4414_v61  ;;  %v4510_v51 = vld [vmem:[#allocation10 + $0x7f8] sm:$0xff] }
 0x973   :  { %6073 = vmatprep.subr.bf16.mxu1 %v7943_v19  ;;  %v7889_v19 = vcombine.high %v4402_v34, %v4406_v0  ;;  %v4370_v47 = vld [vmem:[#allocation10 + $0x398] sm:$0xff] }
 0x974   :  { %6033 = vmatpush2.bf16.msra.mxu0 %v7814_v62  ;;  %v7760_v62 = vcombine.low %v4274_v2, %v4278_v3  ;;  %v4374_v58 = vld [vmem:[#allocation10 + $0x3b8] sm:$0xff] }
 0x975   :  { %6034 = vmatprep.subr.bf16.mxu0 %v7807_v23  ;;  %v7753_v23 = vcombine.high %v4266_v24, %v4270_v30  ;;  %v4498_v12 = vld [vmem:[#allocation10 + $0x798] sm:$0xff] }
 0x976   :  { %6074 = vmatpush2.bf16.msra.mxu1 %v7942_v63  ;;  %v7888_v63 = vcombine.low %v4402_v34, %v4406_v0  ;;  %v4502_v13 = vld [vmem:[#allocation10 + $0x7b8] sm:$0xff] }
 0x977   :  { %6075 = vmatprep.subr.bf16.mxu1 %v7935_v50  ;;  %v7881_v50 = vcombine.high %v4394_v25, %v4398_v31  ;;  %v4362_v8 = vld [vmem:[#allocation10 + $0x358] sm:$0xff] }
 0x978   :  { %6035 = vmatpush2.bf16.msra.mxu0 %v7806_v53  ;;  %v7752_v53 = vcombine.low %v4266_v24, %v4270_v30  ;;  %v4366_v9 = vld [vmem:[#allocation10 + $0x378] sm:$0xff] }
 0x979   :  { %6086 = vmatprep.subr.bf16.mxu0 %v7801_v20  ;;  %v7745_v20 = vcombine.high %v4258_v28, %v4262_v22  ;;  %v4354_v37 = vld [vmem:[#allocation10 + $0x318] sm:$0xff] }
 0x97a   :  { %6076 = vmatpush2.bf16.msra.mxu1 %v7934_v48  ;;  %v7880_v48 = vcombine.low %v4394_v25, %v4398_v31  ;;  %v4358_v49 = vld [vmem:[#allocation10 + $0x338] sm:$0xff] }
 0x97b   :  { %6127 = vmatprep.subr.bf16.mxu1 %v7929_v26  ;;  %6037 = vmatmul.mubr.bf16.vlgmr.msra.gmra.mxu0 %v10003_v42  ;;  %v7873_v26 = vcombine.high %v4386_v29, %v4390_v27  ;;  %v4346_v2 = vld [vmem:[#allocation10 + $0x2d8] sm:$0xff] }
 0x97c   :  { %6087 = vmatpush1.bf16.msra.mxu0 %v7800_v57  ;;  %6118 = vmatprep.mubr.bf16.mxu0 %v9994_v54  ;;  %v7904_v54 = vcombine.low %v4418_v41, %v4422_v6  ;;  %v7744_v57 = vcombine.low %v4258_v28, %v4262_v22  ;;  %v4490_v41 = vld [vmem:[#allocation10 + $0x758] sm:$0xff] }
 0x97d   :  { %6078 = vmatmul.mubr.bf16.vlgmr.msra.gmra.mxu1 %v10008_v40  ;;  %6088 = vmatprep.subr.bf16.mxu0 %v7793_v15  ;;  %v7865_v15 = vcombine.high %v4378_v17, %v4382_v56  ;;  %v4494_v6 = vld [vmem:[#allocation10 + $0x778] sm:$0xff] }
 0x97e   :  { %6128 = vmatpush1.bf16.msra.mxu1 %v7928_v18  ;;  %6159 = vmatprep.mubr.bf16.mxu1 %v9996_v60  ;;  %v7897_v60 = vcombine.high %v4410_v14, %v4414_v61  ;;  %v7872_v18 = vcombine.low %v4386_v29, %v4390_v27  ;;  %v4482_v14 = vld [vmem:[#allocation10 + $0x718] sm:$0xff] }
 0x97f   :  { %6129 = vmatprep.subr.bf16.mxu1 %v7921_v46  ;;  %v7993_v46 = vcombine.high %v4506_v21, %v4510_v51  ;;  %v4486_v61 = vld [vmem:[#allocation10 + $0x738] sm:$0xff] }
 0x980   :  { %6089 = vmatpush1.bf16.msra.mxu0 %v7792_v44  ;;  %v7864_v44 = vcombine.low %v4378_v17, %v4382_v56  ;;  %v4350_v3 = vld [vmem:[#allocation10 + $0x2f8] sm:$0xff] }
 0x981   :  { %6090 = vmatprep.subr.bf16.mxu0 %v7785_v10  ;;  %v7857_v10 = vcombine.high %v4370_v47, %v4374_v58  ;;  %v4474_v34 = vld [vmem:[#allocation10 + $0x6d8] sm:$0xff] }
 0x982   :  { %6130 = vmatpush1.bf16.msra.mxu1 %v7920_v45  ;;  %v7992_v45 = vcombine.low %v4506_v21, %v4510_v51  ;;  %v4478_v0 = vld [vmem:[#allocation10 + $0x6f8] sm:$0xff] }
 0x983   :  { %6131 = vmatprep.subr.bf16.mxu1 %v7913_v11  ;;  %v7985_v11 = vcombine.high %v4498_v12, %v4502_v13  ;;  %v4338_v24 = vld [vmem:[#allocation10 + $0x298] sm:$0xff] }
 0x984   :  { %6091 = vmatpush1.bf16.msra.mxu0 %v7784_v7  ;;  %v7856_v7 = vcombine.low %v4370_v47, %v4374_v58  ;;  %v4342_v30 = vld [vmem:[#allocation10 + $0x2b8] sm:$0xff] }
 0x985   :  { %6092 = vmatprep.subr.bf16.mxu0 %v7777_v39  ;;  %v7849_v39 = vcombine.high %v4362_v8, %v4366_v9  ;;  %v4466_v25 = vld [vmem:[#allocation10 + $0x698] sm:$0xff] }
 0x986   :  { %6132 = vmatpush1.bf16.msra.mxu1 %v7912_v38  ;;  %v7984_v38 = vcombine.low %v4498_v12, %v4502_v13  ;;  %v4470_v31 = vld [vmem:[#allocation10 + $0x6b8] sm:$0xff] }
 0x987   :  { %6133 = vmatprep.subr.bf16.mxu1 %v7905_v52  ;;  %v7977_v52 = vcombine.high %v4490_v41, %v4494_v6  ;;  %v4330_v28 = vld [vmem:[#allocation10 + $0x258] sm:$0xff] }
 0x988   :  { %6093 = vmatpush1.bf16.msra.mxu0 %v7776_v4  ;;  %v7848_v4 = vcombine.low %v4362_v8, %v4366_v9  ;;  %v4334_v22 = vld [vmem:[#allocation10 + $0x278] sm:$0xff] }
 0x989   :  { %6094 = vmatprep.subr.bf16.mxu0 %v7769_v36  ;;  %v7841_v36 = vcombine.high %v4354_v37, %v4358_v49  ;;  %v4458_v29 = vld [vmem:[#allocation10 + $0x658] sm:$0xff] }
 0x98a   :  { %6134 = vmatpush1.bf16.msra.mxu1 %v7904_v54  ;;  %v7976_v54 = vcombine.low %v4490_v41, %v4494_v6  ;;  %v4462_v27 = vld [vmem:[#allocation10 + $0x678] sm:$0xff] }
 0x98b   :  { %6135 = vmatprep.subr.bf16.mxu1 %v7897_v60  ;;  %v7969_v60 = vcombine.high %v4482_v14, %v4486_v61  ;;  %v4322_v17 = vld [vmem:[#allocation10 + $0x218] sm:$0xff] }
 0x98c   :  { %6095 = vmatpush1.bf16.msra.mxu0 %v7768_v32  ;;  %v7840_v32 = vcombine.low %v4354_v37, %v4358_v49  ;;  %v4326_v56 = vld [vmem:[#allocation10 + $0x238] sm:$0xff] }
 0x98d   :  { %6096 = vmatprep.subr.bf16.mxu0 %v7761_v59  ;;  %v7833_v59 = vcombine.high %v4346_v2, %v4350_v3  ;;  %v4450_v21 = vld [vmem:[#allocation10 + $0x618] sm:$0xff]  ;;  %v7808_v12 = vcombine.low %v4322_v17, %v4326_v56 }
 0x98e   :  { %6136 = vmatpush1.bf16.msra.mxu1 %v7896_v33  ;;  %v7968_v33 = vcombine.low %v4482_v14, %v4486_v61  ;;  %v4454_v51 = vld [vmem:[#allocation10 + $0x638] sm:$0xff] }
 0x98f   :  { %6137 = vmatprep.subr.bf16.mxu1 %v7889_v19  ;;  %v7961_v19 = vcombine.high %v4474_v34, %v4478_v0  ;;  %v7737_v47 = vld [vmem:[%s10148_s1 + $0x40] ss:$8 sm:$0xf0]  ;;  %v7937_v58 = vcombine.high %v4450_v21, %v4454_v51 }
 0x990   :  { %6097 = vmatpush1.bf16.msra.mxu0 %v7760_v62  ;;  %v7832_v62 = vcombine.low %v4346_v2, %v4350_v3 }
 0x991   :  { %6098 = vmatprep.subr.bf16.mxu0 %v7753_v23  ;;  %v7825_v23 = vcombine.high %v4338_v24, %v4342_v30 }
 0x992   :  { %6138 = vmatpush1.bf16.msra.mxu1 %v7888_v63  ;;  %v7960_v63 = vcombine.low %v4474_v34, %v4478_v0 }
 0x993   :  { %6139 = vmatprep.subr.bf16.mxu1 %v7881_v50  ;;  %v7953_v50 = vcombine.high %v4466_v25, %v4470_v31 }
 0x994   :  { %6099 = vmatpush1.bf16.msra.mxu0 %v7752_v53  ;;  %v7824_v53 = vcombine.low %v4338_v24, %v4342_v30  ;;  %v10274_v30 = vld [vmem:[#allocation71_spill] sm:$0xff] }
 0x995   :  { %6100 = vmatprep.subr.bf16.mxu0 %v7745_v20  ;;  %v7817_v20 = vcombine.high %v4330_v28, %v4334_v22 }
 0x996   :  { %6140 = vmatpush1.bf16.msra.mxu1 %v7880_v48  ;;  %v7952_v48 = vcombine.low %v4466_v25, %v4470_v31 }
 0x997   :  { %6141 = vmatprep.subr.bf16.mxu1 %v7873_v26  ;;  %v7945_v26 = vcombine.high %v4458_v29, %v4462_v27 }
 0x998   :  { %6101 = vmatpush1.bf16.msra.mxu0 %v7744_v57  ;;  %v7816_v57 = vcombine.low %v4330_v28, %v4334_v22 }
 0x999   :  { %6102 = vmatprep.subr.bf16.mxu0 %v7865_v15  ;;  %v7809_v15 = vcombine.high %v4322_v17, %v4326_v56 }
 0x99a   :  { %6142 = vmatpush1.bf16.msra.mxu1 %v7872_v18  ;;  %v7944_v18 = vcombine.low %v4458_v29, %v4462_v27 }
 0x99b   :  { %6143 = vmatprep.subr.bf16.mxu1 %v7993_v46  ;;  %v7736_v46 = vld [vmem:[%s10148_s1 + $0x40] ss:$8 sm:$0xf] }
 0x99c   :  { %6103 = vmatpush2.bf16.msra.mxu0 %v7864_v44  ;;  %v4514_v13 = vor.u32 %v7737_v47, %v7736_v46  ;;  %v7936_v44 = vcombine.low %v4450_v21, %v4454_v51  ;;  %v10277_v21 = vsub.s32 6, %v10274_v30 }
 0x99d   :  { %6104 = vmatprep.subr.bf16.mxu0 %v7857_v10 }
 0x99e   :  { %6144 = vmatpush2.bf16.msra.mxu1 %v7992_v45  ;;  %v4523_v45 = vrot.slane %v4514_v13, %v10270_v35  ;;  %v4527_v10 = vrot.slane %v4514_v13, %v10271_v1  ;;  %v4531_v61 = vrot.slane %v4514_v13, %v10273_v16  ;;  %v10275_v16 = vsub.s32 4, %v10274_v30 }
 0x99f   :  { %6145 = vmatprep.subr.bf16.mxu1 %v7985_v11  ;;  %v4547_v51 = vrot.slane %v4514_v13, %v10277_v21 }
 0x9a0   :  { %6105 = vmatpush2.bf16.msra.mxu0 %v7856_v7  ;;  %v4539_v25 = vrot.slane %v4514_v13, %v10275_v16 }
 0x9a1   :  { %6106 = vmatprep.subr.bf16.mxu0 %v7849_v39 }
 0x9a2   :  { %6146 = vmatpush2.bf16.msra.mxu1 %v7984_v38 }
 0x9a3   :  { %6147 = vmatprep.subr.bf16.mxu1 %v7977_v52 }
 0x9a4   :  { %6107 = vmatpush2.bf16.msra.mxu0 %v7848_v4 }
 0x9a5   :  { %6108 = vmatprep.subr.bf16.mxu0 %v7841_v36 }
 0x9a6   :  { %6148 = vmatpush2.bf16.msra.mxu1 %v7976_v54 }
 0x9a7   :  { %6149 = vmatprep.subr.bf16.mxu1 %v7969_v60 }
 0x9a8   :  { %6109 = vmatpush2.bf16.msra.mxu0 %v7840_v32 }
 0x9a9   :  { %6110 = vmatprep.subr.bf16.mxu0 %v7833_v59 }
 0x9aa   :  { %6150 = vmatpush2.bf16.msra.mxu1 %v7968_v33 }
 0x9ab   :  { %6151 = vmatprep.subr.bf16.mxu1 %v7961_v19 }
 0x9ac   :  { %6111 = vmatpush2.bf16.msra.mxu0 %v7832_v62 }
 0x9ad   :  { %6112 = vmatprep.subr.bf16.mxu0 %v7825_v23 }
 0x9ae   :  { %6152 = vmatpush2.bf16.msra.mxu1 %v7960_v63 }
 0x9af   :  { %6153 = vmatprep.subr.bf16.mxu1 %v7953_v50 }
 0x9b0   :  { %6113 = vmatpush2.bf16.msra.mxu0 %v7824_v53 }
 0x9b1   :  { %6114 = vmatprep.subr.bf16.mxu0 %v7817_v20 }
 0x9b2   :  { %6154 = vmatpush2.bf16.msra.mxu1 %v7952_v48 }
 0x9b3   :  { %6155 = vmatprep.subr.bf16.mxu1 %v7945_v26 }
 0x9b4   :  { %6115 = vmatpush2.bf16.msra.mxu0 %v7816_v57  ;;  %v10278_v57 = vsub.s32 7, %v10274_v30 }
 0x9b5   :  { %6116 = vmatprep.subr.bf16.mxu0 %v7809_v15 }
 0x9b6   :  { %6156 = vmatpush2.bf16.msra.mxu1 %v7944_v18  ;;  %v4551_v18 = vrot.slane %v4514_v13, %v10278_v57 }
 0x9b7   :  { %6157 = vmatprep.subr.bf16.mxu1 %v7937_v58 }
 0x9b8   :  { %6117 = vmatpush2.bf16.msra.mxu0 %v7808_v12 }
 0x9ba   :  { %6158 = vmatpush2.bf16.msra.mxu1 %v7936_v44 }
 0x9bb   :  { %v5874_v11 = vpop.f32.mrf.mxu0  ;;  %6119 = vmatmul.mubr.bf16.vlgmr.msra.gmra.mxu0 %v10003_v42  ;;  %v4535_v42 = vrot.slane %v4514_v13, %v9709_v55  ;;  %v10276_v55 = vsub.s32 5, %v10274_v30 }
 0x9bc   :  { %v5875_v8 = vadd.f32 %v5874_v11, %v4523_v45 }
 0x9bd   :  { %v5915_v9 = vpop.f32.mrf.mxu1  ;;  %6160 = vmatmul.mubr.bf16.vlgmr.msra.gmra.mxu1 %v10008_v40  ;;  %v5876_v41 = vpop.f32.mrf.mxu0  ;;  %v4543_v31 = vrot.slane %v4514_v13, %v10276_v55 }
 0x9be   :  { %v10032_v6 = vadd.f32 %v5915_v9, %v5875_v8  ;;  %v5877_v7 = vadd.f32 %v5876_v41, %v4527_v10 }
 0x9bf   :  { %v5917_v38 = vpop.f32.mrf.mxu1  ;;  %v5878_v39 = vpop.f32.mrf.mxu0 }
 0x9c0   :  { %v6168_v52 = vmax.f32 %v10032_v6, 0.0  ;;  %v5918_v37 = vadd.f32 %v5917_v38, %v5877_v7 }
 0x9c1   :  { %v5919_v35 = vpop.f32.mrf.mxu1  ;;  %v5879_v49 = vpop.f32.mrf.mxu0 }
 0x9c2   :  { %v6169_v14 = vmax.f32 %v5918_v37, 0.0 }
 0x9c3   :  { %v5920_v1 = vpop.f32.mrf.mxu1 }
 0x9fb   :  { %v5956_v4 = vpop.f32.mrf.mxu0 }
 0x9fc   :  { %v5957_v54 = vadd.f32 %v5956_v4, %v4531_v61 }
 0x9fd   :  { %v5997_v40 = vpop.f32.mrf.mxu1  ;;  %v5958_v36 = vpop.f32.mrf.mxu0 }
 0x9fe   :  { %v10037_v60 = vadd.f32 %v5997_v40, %v5957_v54  ;;  %v5959_v2 = vadd.f32 %v5958_v36, %v4535_v42 }
 0x9ff   :  { %v5999_v3 = vpop.f32.mrf.mxu1  ;;  %v5960_v34 = vpop.f32.mrf.mxu0 }
 0xa00   :  { %v6170_v0 = vmax.f32 %v10037_v60, 0.0  ;;  %v6000_v32 = vadd.f32 %v5999_v3, %v5959_v2 }
 0xa01   :  { %v6001_v33 = vpop.f32.mrf.mxu1  ;;  %v5961_v59 = vpop.f32.mrf.mxu0 }
 0xa02   :  { %v6171_v19 = vmax.f32 %v6000_v32, 0.0 }
 0xa03   :  { %v6002_v24 = vpop.f32.mrf.mxu1 }
 0xa3b   :  { %v6038_v62 = vpop.f32.mrf.mxu0 }
 0xa3c   :  { %v6039_v63 = vadd.f32 %v6038_v62, %v4539_v25 }
 0xa3d   :  { %v6079_v23 = vpop.f32.mrf.mxu1  ;;  %v6040_v50 = vpop.f32.mrf.mxu0 }
 0xa3e   :  { %v10044_v28 = vadd.f32 %v6079_v23, %v6039_v63  ;;  %v6041_v22 = vadd.f32 %v6040_v50, %v4543_v31 }
 0xa3f   :  { %v6081_v29 = vpop.f32.mrf.mxu1  ;;  %v6042_v27 = vpop.f32.mrf.mxu0 }
 0xa40   :  { %v6172_v53 = vmax.f32 %v10044_v28, 0.0  ;;  %v10047_v48 = vadd.f32 %v6081_v29, %v6041_v22 }
 0xa41   :  { %v6083_v20 = vpop.f32.mrf.mxu1  ;;  %v6043_v26 = vpop.f32.mrf.mxu0 }
 0xa42   :  { %v6173_v17 = vmax.f32 %v10047_v48, 0.0 }
 0xa43   :  { %v6084_v56 = vpop.f32.mrf.mxu1 }
 0xa7b   :  { %v6120_v15 = vpop.f32.mrf.mxu0 }
 0xa7c   :  { %v6121_v46 = vadd.f32 %v6120_v15, %v4547_v51 }
 0xa7d   :  { %v6161_v47 = vpop.f32.mrf.mxu1  ;;  %v6122_v58 = vpop.f32.mrf.mxu0 }
 0xa7e   :  { %v10054_v12 = vadd.f32 %v6161_v47, %v6121_v46  ;;  %v6123_v44 = vadd.f32 %v6122_v58, %v4551_v18 }
 0xa7f   :  { %v6163_v45 = vpop.f32.mrf.mxu1  ;;  %v6124_v10 = vpop.f32.mrf.mxu0 }
 0xa80   :  { %v6174_v11 = vmax.f32 %v10054_v12, 0.0  ;;  %v10057_v8 = vadd.f32 %v6163_v45, %v6123_v44 }
 0xa81   :  { %v6165_v9 = vpop.f32.mrf.mxu1  ;;  %v6125_v41 = vpop.f32.mrf.mxu0 }
 0xa82   :  { %v6175_v7 = vmax.f32 %v10057_v8, 0.0 }
 0xa83   :  { %v6166_v38 = vpop.f32.mrf.mxu1 }
 0xa84   :  { %9027 = dma.done.wait [#allocation12 + $0x9], 8192 }
 0xa85   :  { %9028 = vsyncadd [#allocation12 + $0x9], 4294959104  ;;  %v6309_v13 = vpack.c.bf16 %v6169_v14, %v6169_v14  ;;  %v6311_v39 = vpack.c.bf16 %v6171_v19, %v6171_v19  ;;  %7163 = vst [vmem:[#allocation13] sm:$0xff] %v9038_v43  ;;  %v8791_v37 = vld [vmem:[#allocation11 + $0x78] sm:$0xff]   ;;  %v8795_v61 = vld [vmem:[#allocation11 + $0x70] sm:$0xff]   ;;  %v6308_v20 = vpack.c.bf16 %v6168_v52, %v6168_v52  ;;  %v6313_v56 = vpack.c.bf16 %v6173_v17, %v6173_v17  ;;  %s9040_s26 = smov 32  }
 0xa86   :  { %v8792_v35 = vld [vmem:[#allocation11 + $0x38] sm:$0xff]   ;;  %8107 = vmatprep.subr.bf16.mxu0 %v8791_v37  ;;  %v8796_v42 = vld [vmem:[#allocation11 + $0x30] sm:$0xff]   ;;  %v8799_v14 = vld [vmem:[#allocation11 + $0x68] sm:$0xff]   ;;  %v6310_v51 = vpack.c.bf16 %v6170_v0, %v6170_v0  ;;  %v6315_v6 = vpack.c.bf16 %v6175_v7, %v6175_v7  ;;  %vm6985_vm3 = vcmask 1046528   ;;  %vm6951_vm4 = vcmask 121856   ;;  %s9041_s27 = smov [#allocation13]  }
 0xa87   :  { %6732 = vmatprep.mubr.bf16.mxu0 %v6309_v13  ;;  %6772 = vmatprep.mubr.bf16.mxu1 %v6311_v39  ;;  %v8793_v49 = vld [vmem:[#allocation11 + $0xf8] sm:$0xff]   ;;  %v8797_v4 = vld [vmem:[#allocation11 + $0xf0] sm:$0xff]   ;;  %v8800_v40 = vld [vmem:[#allocation11 + $0x28] sm:$0xff]   ;;  %s7177_s28 = sshll.u32 %s9041_s27, 4  ;;  %vm7169_vm6 = vcmask 294144   ;;  %s7178_s28 = int_to_ptr.vmem [resolvable:$true] %s7177_s28 }
 0xa88   :  { %8108 = vmatpush3.bf16.msra.mxu0 %v8792_v35  ;;  %v8794_v1 = vld [vmem:[#allocation11 + $0xb8] sm:$0xff]   ;;  %8129 = vmatprep.subr.bf16.mxu1 %v8793_v49  ;;  %v8798_v54 = vld [vmem:[#allocation11 + $0xb0] sm:$0xff]   ;;  %v8801_v36 = vld [vmem:[#allocation11 + $0xe8] sm:$0xff]   ;;  %s8989_s29 = scalar_lea.vmem %s7178_s28, 128  ;;  %p8994_p3 = scmp.lt.s32.totalorder %s7178_s28, %s7178_s28 }
 0xa89   :  { %8130 = vmatpush3.bf16.msra.mxu1 %v8794_v1  ;;  %8109 = vmatprep.subr.bf16.mxu0 %v8795_v61  ;;  %v8802_v2 = vld [vmem:[#allocation11 + $0xa8] sm:$0xff]   ;;  %v8803_v3 = vld [vmem:[#allocation11 + $0x60] sm:$0xff]   ;;  %v8807_v59 = vld [vmem:[#allocation11 + $0x58] sm:$0xff]   ;;  %p8990_p2 = scmp.ne.s32.totalorder %s7178_s28, %s8989_s29  ;;  %p8995_p4 = scmp.lt.s32.totalorder %s8989_s29, %s8989_s29 }
 0xa8a   :  { %8131 = vmatprep.subr.bf16.mxu1 %v8797_v4  ;;  %v8804_v34 = vld [vmem:[#allocation11 + $0x20] sm:$0xff]   ;;  %v8808_v19 = vld [vmem:[#allocation11 + $0x18] sm:$0xff]   ;;  %v8811_v16 = vld [vmem:[#allocation11 + $0x50] sm:$0xff]  }
 0xa8b   :  { %v8805_v32 = vld [vmem:[#allocation11 + $0xe0] sm:$0xff]   ;;  %v8809_v24 = vld [vmem:[#allocation11 + $0xd8] sm:$0xff]   ;;  %v8812_v25 = vld [vmem:[#allocation11 + $0x10] sm:$0xff]   ;;  %p8996_p5 = por %p8995_p4, %p8994_p3 }
 0xa8c   :  { %8110 = vmatpush3.bf16.msra.mxu0 %v8796_v42  ;;  %v8806_v33 = vld [vmem:[#allocation11 + $0xa0] sm:$0xff]   ;;  %v8810_v30 = vld [vmem:[#allocation11 + $0x98] sm:$0xff]   ;;  %v8813_v55 = vld [vmem:[#allocation11 + $0xd0] sm:$0xff]  }
 0xa8d   :  { %8132 = vmatpush3.bf16.msra.mxu1 %v8798_v54  ;;  %8111 = vmatprep.subr.bf16.mxu0 %v8799_v14  ;;  %v8814_v31 = vld [vmem:[#allocation11 + $0x90] sm:$0xff]   ;;  %v8815_v62 = vld [vmem:[#allocation11 + $0x48] sm:$0xff]   ;;  %v8819_v22 = vld [vmem:[#allocation11 + $0x40] sm:$0xff]   ;;  %p8997_p6 = pnand %p8996_p5, %p8990_p2 }
 0xa8e   :  { %8133 = vmatprep.subr.bf16.mxu1 %v8801_v36  ;;  %v8816_v63 = vld [vmem:[#allocation11 + $0x8] sm:$0xff]   ;;  %v8820_v29 = vld [vmem:[#allocation11] sm:$0xff]   ;;  %v8823_v21 = vld [vmem:[#allocation11 + $0x178] sm:$0xff]  }
 0xa8f   :  { %v8817_v23 = vld [vmem:[#allocation11 + $0xc8] sm:$0xff]   ;;  %v8821_v27 = vld [vmem:[#allocation11 + $0xc0] sm:$0xff]   ;;  %v8824_v57 = vld [vmem:[#allocation11 + $0x138] sm:$0xff]  }
 0xa90   :  { %8112 = vmatpush3.bf16.msra.mxu0 %v8800_v40  ;;  %v8818_v50 = vld [vmem:[#allocation11 + $0x88] sm:$0xff]   ;;  %v8822_v26 = vld [vmem:[#allocation11 + $0x80] sm:$0xff]   ;;  %v8825_v52 = vld [vmem:[#allocation11 + $0x1f8] sm:$0xff]   ;;  %v6312_v40 = vpack.c.bf16 %v6172_v53, %v6172_v53 }
 0xa91   :  { %8134 = vmatpush3.bf16.msra.mxu1 %v8802_v2  ;;  %8113 = vmatprep.subr.bf16.mxu0 %v8803_v3  ;;  %v8826_v18 = vld [vmem:[#allocation11 + $0x1b8] sm:$0xff]   ;;  %v8827_v48 = vld [vmem:[#allocation11 + $0x170] sm:$0xff]   ;;  %v8831_v15 = vld [vmem:[#allocation11 + $0x168] sm:$0xff]   ;;  %v6314_v3 = vpack.c.bf16 %v6174_v11, %v6174_v11 }
 0xa92   :  { %8135 = vmatprep.subr.bf16.mxu1 %v8805_v32  ;;  %v8828_v17 = vld [vmem:[#allocation11 + $0x130] sm:$0xff]   ;;  %v8832_v46 = vld [vmem:[#allocation11 + $0x128] sm:$0xff]   ;;  %v8835_v44 = vld [vmem:[#allocation11 + $0x160] sm:$0xff]  }
 0xa93   :  { %v8829_v60 = vld [vmem:[#allocation11 + $0x1f0] sm:$0xff]   ;;  %v8833_v47 = vld [vmem:[#allocation11 + $0x1e8] sm:$0xff]   ;;  %v8836_v45 = vld [vmem:[#allocation11 + $0x120] sm:$0xff]  }
 0xa94   :  { %8114 = vmatpush3.bf16.msra.mxu0 %v8804_v34  ;;  %v8830_v0 = vld [vmem:[#allocation11 + $0x1b0] sm:$0xff]   ;;  %v8834_v58 = vld [vmem:[#allocation11 + $0x1a8] sm:$0xff]   ;;  %v8837_v10 = vld [vmem:[#allocation11 + $0x1e0] sm:$0xff]  }
 0xa95   :  { %8136 = vmatpush3.bf16.msra.mxu1 %v8806_v33  ;;  %8115 = vmatprep.subr.bf16.mxu0 %v8807_v59  ;;  %v8838_v8 = vld [vmem:[#allocation11 + $0x1a0] sm:$0xff]   ;;  %v8839_v9 = vld [vmem:[#allocation11 + $0x158] sm:$0xff]   ;;  %v8843_v13 = vld [vmem:[#allocation11 + $0x150] sm:$0xff]  }
 0xa96   :  { %8137 = vmatprep.subr.bf16.mxu1 %v8809_v24  ;;  %v8840_v41 = vld [vmem:[#allocation11 + $0x118] sm:$0xff]   ;;  %v8844_v39 = vld [vmem:[#allocation11 + $0x110] sm:$0xff]   ;;  %v8847_v49 = vld [vmem:[#allocation11 + $0x148] sm:$0xff]  }
 0xa97   :  { %v8841_v7 = vld [vmem:[#allocation11 + $0x1d8] sm:$0xff]   ;;  %v8845_v37 = vld [vmem:[#allocation11 + $0x1d0] sm:$0xff]   ;;  %v8848_v1 = vld [vmem:[#allocation11 + $0x108] sm:$0xff]  }
 0xa98   :  { %8116 = vmatpush3.bf16.msra.mxu0 %v8808_v19  ;;  %v8842_v38 = vld [vmem:[#allocation11 + $0x198] sm:$0xff]   ;;  %v8846_v35 = vld [vmem:[#allocation11 + $0x190] sm:$0xff]   ;;  %v8849_v61 = vld [vmem:[#allocation11 + $0x1c8] sm:$0xff]  }
 0xa99   :  { %8138 = vmatpush3.bf16.msra.mxu1 %v8810_v30  ;;  %8117 = vmatprep.subr.bf16.mxu0 %v8811_v16  ;;  %v8850_v42 = vld [vmem:[#allocation11 + $0x188] sm:$0xff]   ;;  %v8851_v4 = vld [vmem:[#allocation11 + $0x140] sm:$0xff]   ;;  %v6865_v28 = vld [vmem:[%s10149_s2] sm:$0xff] }
 0xa9a   :  { %8139 = vmatprep.subr.bf16.mxu1 %v8813_v55  ;;  %v8852_v54 = vld [vmem:[#allocation11 + $0x100] sm:$0xff]   ;;  %v6868_v53 = vld [vmem:[%s10149_s2 + $0x18] sm:$0x7f]  ;;  %v6867_v12 = vld [vmem:[%s10149_s2 + $0x10] sm:$0xff] }
 0xa9b   :  { %v8853_v14 = vld [vmem:[#allocation11 + $0x1c0] sm:$0xff]   ;;  %v6307_v16 = vld [vmem:[%s10148_s1 + $0x41] ss:$0 sm:$0xff] }
 0xa9c   :  { %8118 = vmatpush3.bf16.msra.mxu0 %v8812_v25  ;;  %v8854_v36 = vld [vmem:[#allocation11 + $0x180] sm:$0xff]  }
 0xa9d   :  { %8140 = vmatpush3.bf16.msra.mxu1 %v8814_v31  ;;  %8119 = vmatprep.subr.bf16.mxu0 %v8815_v62  ;;  %v6866_v2 = vld [vmem:[%s10149_s2 + $0x8] sm:$0xff] }
 0xa9e   :  { %8141 = vmatprep.subr.bf16.mxu1 %v8817_v23 }
 0xaa0   :  { %8120 = vmatpush3.bf16.msra.mxu0 %v8816_v63 }
 0xaa1   :  { %8142 = vmatpush3.bf16.msra.mxu1 %v8818_v50  ;;  %8121 = vmatprep.subr.bf16.mxu0 %v8819_v22 }
 0xaa2   :  { %8143 = vmatprep.subr.bf16.mxu1 %v8821_v27 }
 0xaa4   :  { %8122 = vmatpush3.bf16.msra.mxu0 %v8820_v29 }
 0xaa5   :  { %8144 = vmatpush3.bf16.msra.mxu1 %v8822_v26  ;;  %8151 = vmatprep.subr.bf16.mxu0 %v8823_v21 }
 0xaa6   :  { %8173 = vmatprep.subr.bf16.mxu1 %v8825_v52 }
 0xaa7   :  { %6733 = vmatmul.mubr.bf16.vlgmr.msra.gmra.mxu0 %v6308_v20 }
 0xaa8   :  { %8152 = vmatpush3.bf16.msra.mxu0 %v8824_v57  ;;  %6812 = vmatprep.mubr.bf16.mxu0 %v6313_v56  ;;  %v6871_v56 = vld [vmem:[%s10148_s1 + $0x42] ss:$0 sm:$0xff] }
 0xaa9   :  { %6773 = vmatmul.mubr.bf16.vlgmr.msra.gmra.mxu1 %v6310_v51  ;;  %8153 = vmatprep.subr.bf16.mxu0 %v8827_v48 }
 0xaaa   :  { %8174 = vmatpush3.bf16.msra.mxu1 %v8826_v18  ;;  %6852 = vmatprep.mubr.bf16.mxu1 %v6315_v6 }
 0xaab   :  { %8175 = vmatprep.subr.bf16.mxu1 %v8829_v60 }
 0xaac   :  { %8154 = vmatpush3.bf16.msra.mxu0 %v8828_v17 }
 0xaad   :  { %8155 = vmatprep.subr.bf16.mxu0 %v8831_v15 }
 0xaae   :  { %8176 = vmatpush3.bf16.msra.mxu1 %v8830_v0 }
 0xaaf   :  { %8177 = vmatprep.subr.bf16.mxu1 %v8833_v47 }
 0xab0   :  { %8156 = vmatpush3.bf16.msra.mxu0 %v8832_v46 }
 0xab1   :  { %8157 = vmatprep.subr.bf16.mxu0 %v8835_v44 }
 0xab2   :  { %8178 = vmatpush3.bf16.msra.mxu1 %v8834_v58 }
 0xab3   :  { %8179 = vmatprep.subr.bf16.mxu1 %v8837_v10 }
 0xab4   :  { %8158 = vmatpush3.bf16.msra.mxu0 %v8836_v45 }
 0xab5   :  { %8159 = vmatprep.subr.bf16.mxu0 %v8839_v9 }
 0xab6   :  { %8180 = vmatpush3.bf16.msra.mxu1 %v8838_v8 }
 0xab7   :  { %8181 = vmatprep.subr.bf16.mxu1 %v8841_v7 }
 0xab8   :  { %8160 = vmatpush3.bf16.msra.mxu0 %v8840_v41 }
 0xab9   :  { %8161 = vmatprep.subr.bf16.mxu0 %v8843_v13 }
 0xaba   :  { %8182 = vmatpush3.bf16.msra.mxu1 %v8842_v38 }
 0xabb   :  { %8183 = vmatprep.subr.bf16.mxu1 %v8845_v37 }
 0xabc   :  { %8162 = vmatpush3.bf16.msra.mxu0 %v8844_v39 }
 0xabd   :  { %8163 = vmatprep.subr.bf16.mxu0 %v8847_v49 }
 0xabe   :  { %8184 = vmatpush3.bf16.msra.mxu1 %v8846_v35 }
 0xabf   :  { %8185 = vmatprep.subr.bf16.mxu1 %v8849_v61 }
 0xac0   :  { %8164 = vmatpush3.bf16.msra.mxu0 %v8848_v1 }
 0xac1   :  { %8165 = vmatprep.subr.bf16.mxu0 %v8851_v4 }
 0xac2   :  { %8186 = vmatpush3.bf16.msra.mxu1 %v8850_v42 }
 0xac3   :  { %8187 = vmatprep.subr.bf16.mxu1 %v8853_v14 }
 0xac4   :  { %8166 = vmatpush3.bf16.msra.mxu0 %v8852_v54  ;;  %v6874_v54 = vld [vmem:[%s10148_s1 + $0x45] ss:$0 sm:$0xff] }
 0xac5   :  { %8230 = vmatprep.subr.mxu0 %v9038_v43 }
 0xac6   :  { %8188 = vmatpush3.bf16.msra.mxu1 %v8854_v36 }
 0xac7   :  { %6813 = vmatmul.mubr.bf16.vlgmr.msra.gmra.mxu0 %v6312_v40  ;;  %v6875_v40 = vld [vmem:[%s10148_s1 + $0x46] ss:$0 sm:$0xff] }
 0xac8   :  { %8231 = vmatpush3.msra.mxu0 %v6866_v2  ;;  %8234 = vmatprep.mubr.msk.f32.mxu0 %vm9039_vm1, %v9038_v43 }
 0xac9   :  { %6853 = vmatmul.mubr.bf16.vlgmr.msra.gmra.mxu1 %v6314_v3  ;;  %8232 = vmatprep.subr.mxu0 %v9038_v43 }
 0xaca   :  { %8233 = vmatpush3.msra.mxu0 %v6865_v28 }
 0xacb   :  { %8237 = vmatprep.subr.mxu0 %v9038_v43 }
 0xacf   :  { %8235 = vmatmul.mubr.msk.f32.vlgmr.msra.gmra.mxu0 %vm3553_vm2, %v9958_v5 }
 0xad0   :  { %8241 = vmatprep.mubr.msk.f32.mxu0 %vm9039_vm1, %v9038_v43  ;;  %8238 = vmatpush3.msk.msra.mxu0 %vm6985_vm3, %v6868_v53 }
 0xad1   :  { %8239 = vmatprep.subr.mxu0 %v9038_v43 }
 0xad2   :  { %8240 = vmatpush3.msra.mxu0 %v6867_v12 }
 0xad3   :  { %8244 = vmatprep.subr.mxu0 %v9038_v43 }
 0xb67   :  { %v8123_v5 = vpop.f32.mrf.mxu0 }
 0xb69   :  { %v8124_v11 = vpop.f32.mrf.mxu0  ;;  %v8145_v34 = vpop.f32.mrf.mxu1 }
 0xb6a   :  { %v8125_v30 = vadd.f32 %v8124_v11, %v8123_v5  ;;  %v6870_v11 = vld [vmem:[%s10149_s2 + $0x28] sm:$0x7f] }
 0xb6b   :  { %v8126_v32 = vpop.f32.mrf.mxu0  ;;  %v8146_v33 = vpop.f32.mrf.mxu1 }
 0xb6c   :  { %v6735_v25 = vadd.f32 %v8125_v30, %v6307_v16  ;;  %v8147_v55 = vadd.f32 %v8146_v33, %v8145_v34  ;;  %v6869_v34 = vld [vmem:[%s10149_s2 + $0x20] sm:$0xff] }
 0xb6d   :  { %v8127_v59 = vpop.f32.mrf.mxu0  ;;  %v8148_v19 = vpop.f32.mrf.mxu1  ;;  %v6872_v32 = vld [vmem:[%s10148_s1 + $0x43] ss:$0 sm:$0xff] }
 0xb6e   :  { %v6775_v23 = vadd.f32 %v8147_v55, %v6735_v25 }
 0xb6f   :  { %v8149_v24 = vpop.f32.mrf.mxu1 }
 0xb87   :  { %v8167_v31 = vpop.f32.mrf.mxu0 }
 0xb89   :  { %v8168_v62 = vpop.f32.mrf.mxu0  ;;  %v8189_v63 = vpop.f32.mrf.mxu1 }
 0xb8a   :  { %v8169_v50 = vadd.f32 %v8168_v62, %v8167_v31 }
 0xb8b   :  { %v8170_v22 = vpop.f32.mrf.mxu0  ;;  %v8190_v29 = vpop.f32.mrf.mxu1 }
 0xb8c   :  { %v6815_v27 = vadd.f32 %v8169_v50, %v6775_v23  ;;  %v8191_v20 = vadd.f32 %v8190_v29, %v8189_v63 }
 0xb8d   :  { %v8171_v26 = vpop.f32.mrf.mxu0  ;;  %v8192_v21 = vpop.f32.mrf.mxu1 }
 0xb8e   :  { %v6855_v51 = vadd.f32 %v8191_v20, %v6815_v27 }
 0xb8f   :  { %v6947_v57 = vpop.f32.mrf.mxu0  ;;  %v8193_v6 = vpop.f32.mrf.mxu1 }
 0xb90   :  { %v6860_v52 = vsub.f32 0.0, %v6855_v51  ;;  %v6948_v18 = vadd.f32 %v6947_v57, %v6871_v56  ;;  %v6876_v6 = vld [vmem:[%s10148_s1 + $0x47] ss:$0 sm:$0xff] }
 0xb91   :  { %v8236_v48 = vpop.f32.mrf.mxu0 }
 0xb92   :  { %v6861_v17 = vmul.f32 1.442695, %v6860_v52  ;;  %v6952_v60 = vsel %vm6951_vm4, %v6948_v18, 0.0 }
 0xb93   :  { %v6953_v0 = vrot.slane %v6952_v60, 4 }
 0xb94   :  { %8855 = vpow2.f32 %v6861_v17 }
 0xb95   :  { %v6954_v15 = vadd.f32 %v6953_v0, %v6952_v60 }
 0xb97   :  { %v6955_v46 = vrot.slane %v6954_v15, 2 }
 0xb99   :  { %v6956_v47 = vadd.f32 %v6955_v46, %v6954_v15 }
 0xb9b   :  { %v6957_v58 = vrot.slane %v6956_v47, 1 }
 0xb9d   :  { %v6958_v44 = vadd.f32 %v6957_v58, %v6956_v47  ;;  %v6873_v58 = vld [vmem:[%s10148_s1 + $0x44] ss:$0 sm:$0xff] }
 0xb9f   :  { %v6960_v45 = vmul.f32 0.125, %v6958_v44 }
 0xba1   :  { %v8856_v10 = vpop.eup %8855  ;;  %v6961_v8 = vsub.f32 %v6948_v18, %v6960_v45  ;;  %v6877_v18 = vld [vmem:[%s10148_s1 + $0x80] ss:$0 sm:$0xff] }
 0xba2   :  { %v6863_v9 = vadd.f32 1.0, %v8856_v10 }
 0xba3   :  { %v6962_v41 = vmul.f32 %v6961_v8, %v6961_v8 }
 0xba4   :  { %8857 = vrcp.f32 %v6863_v9 }
 0xba5   :  { %v6963_v7 = vsel %vm6951_vm4, %v6962_v41, 0.0 }
 0xba6   :  { %v6964_v38 = vrot.slane %v6963_v7, 4 }
 0xba8   :  { %v6965_v13 = vadd.f32 %v6964_v38, %v6963_v7 }
 0xbaa   :  { %v6966_v39 = vrot.slane %v6965_v13, 2 }
 0xbac   :  { %v6967_v37 = vadd.f32 %v6966_v39, %v6965_v13 }
 0xbae   :  { %v6968_v35 = vrot.slane %v6967_v37, 1 }
 0xbb0   :  { %v6969_v49 = vadd.f32 %v6968_v35, %v6967_v37 }
 0xbb1   :  { %v8858_v1 = vpop.eup %8857 }
 0xbb2   :  { %7164 = vst.msk [vmem:[#allocation13] sm:$0xff] %vm685_vm0, %v8858_v1  ;;  %v6970_v61 = vmul.f32 0.125, %v6969_v49 }
 0xbb4   :  { %v6971_v42 = vadd.f32 1e-05, %v6970_v61 }
 0xbb6   :  { %8859 = vrsqrt.f32 %v6971_v42 }
 0xbc3   :  { %v8860_v4 = vpop.eup %8859 }
 0xbc4   :  { %v6973_v14 = vmul.f32 %v8860_v4, %v6961_v8 }
 0xbc6   :  { %v6974_v36 = vmul.f32 %v6973_v14, %v6874_v54 }
 0xbc8   :  { %v6975_v2 = vadd.f32 %v6974_v36, %v6875_v40 }
 0xbca   :  { %v6977_v3 = vmin.f32 %v6975_v2, 0.0  ;;  %vm6976_vm5 = vcmp.gt.f32.partialorder %v6975_v2, 0.0 }
 0xbcc   :  { %v6978_v28 = vmul.f32 1.442695, %v6977_v3 }
 0xbce   :  { %8861 = vpow2.f32 %v6978_v28 }
 0xbdb   :  { %v8862_v53 = vpop.eup %8861 }
 0xbdc   :  { %v8059_v12 = vadd.f32 -1.0, %v8862_v53 }
 0xbde   :  { %v6981_v5 = vsel %vm6976_vm5, %v6975_v2, %v8059_v12 }
 0xbdf   :  { %8242 = vmatmul.mubr.msk.f32.vlgmr.msra.gmra.mxu0 %vm6951_vm4, %v6981_v5 }
 0xbe0   :  { %8248 = vmatprep.mubr.msk.f32.mxu0 %vm9039_vm1, %v9038_v43  ;;  %8245 = vmatpush3.msk.msra.mxu0 %vm6985_vm3, %v6870_v11 }
 0xbe1   :  { %8246 = vmatprep.subr.mxu0 %v9038_v43 }
 0xbe2   :  { %8247 = vmatpush3.msra.mxu0 %v6869_v34 }
 0xc9f   :  { %v7055_v33 = vpop.f32.mrf.mxu0 }
 0xca0   :  { %v7056_v59 = vadd.f32 %v7055_v33, %v6872_v32 }
 0xca1   :  { %v8243_v19 = vpop.f32.mrf.mxu0 }
 0xca2   :  { %v7059_v24 = vsel %vm6951_vm4, %v7056_v59, 0.0 }
 0xca3   :  { %v7060_v30 = vrot.slane %v7059_v24, 4 }
 0xca5   :  { %v7061_v16 = vadd.f32 %v7060_v30, %v7059_v24 }
 0xca7   :  { %v7062_v25 = vrot.slane %v7061_v16, 2 }
 0xca9   :  { %v7063_v55 = vadd.f32 %v7062_v25, %v7061_v16 }
 0xcab   :  { %v7064_v31 = vrot.slane %v7063_v55, 1 }
 0xcad   :  { %v7065_v62 = vadd.f32 %v7064_v31, %v7063_v55 }
 0xcaf   :  { %v7066_v63 = vmul.f32 0.125, %v7065_v62 }
 0xcb1   :  { %v7067_v23 = vsub.f32 %v7056_v59, %v7066_v63 }
 0xcb3   :  { %v7068_v50 = vmul.f32 %v7067_v23, %v7067_v23 }
 0xcb5   :  { %v7069_v43 = vsel %vm6951_vm4, %v7068_v50, 0.0 }
 0xcb6   :  { %v7070_v22 = vrot.slane %v7069_v43, 4 }
 0xcb8   :  { %v7071_v29 = vadd.f32 %v7070_v22, %v7069_v43 }
 0xcba   :  { %v7072_v27 = vrot.slane %v7071_v29, 2 }
 0xcbc   :  { %v7073_v20 = vadd.f32 %v7072_v27, %v7071_v29 }
 0xcbe   :  { %v7074_v26 = vrot.slane %v7073_v20, 1 }
 0xcc0   :  { %v7075_v56 = vadd.f32 %v7074_v26, %v7073_v20 }
 0xcc2   :  { %v7076_v21 = vmul.f32 0.125, %v7075_v56 }
 0xcc4   :  { %v7077_v51 = vadd.f32 1e-05, %v7076_v21 }
 0xcc6   :  { %8863 = vrsqrt.f32 %v7077_v51 }
 0xcd3   :  { %v8864_v57 = vpop.eup %8863 }
 0xcd4   :  { %v7079_v52 = vmul.f32 %v8864_v57, %v7067_v23 }
 0xcd6   :  { %v7080_v48 = vmul.f32 %v7079_v52, %v6876_v6 }
 0xcd8   :  { %v7081_v17 = vadd.f32 %v7080_v48, %v6877_v18 }
 0xcda   :  { %v7082_v60 = vsub.f32 0.0, %v7081_v17 }
 0xcdc   :  { %v7083_v0 = vmul.f32 1.442695, %v7082_v60 }
 0xcde   :  { %8865 = vpow2.f32 %v7083_v0 }
 0xceb   :  { %v8866_v15 = vpop.eup %8865 }
 0xcec   :  { %v7085_v46 = vadd.f32 1.0, %v8866_v15 }
 0xcee   :  { %8867 = vrcp.f32 %v7085_v46 }
 0xcfb   :  { %v8868_v47 = vpop.eup %8867 }
 0xcfc   :  { %8249 = vmatmul.mubr.msk.f32.vlgmr.msra.gmra.mxu0 %vm6951_vm4, %v8868_v47 }
 0xdbc   :  { %v7159_v44 = vpop.f32.mrf.mxu0 }
 0xdbd   :  { %v7160_v45 = vadd.f32 %v7159_v44, %v6873_v58 }
 0xdbe   :  { %v8250_v10 = vpop.f32.mrf.mxu0 }
 0xdbf   :  { %7166 = vrot.lane.b32.xlu0 %v7160_v45, %s9040_s26 }
 0xe31   :  { %v7167_v8 = vpop.permute.xlu0 %7166 }
 0xe32   :  { %7170 = vst.msk [vmem:[#allocation13] sm:$0xff] %vm7169_vm6, %v7167_v8 }
 0xe33   :  { %9000 = shalt.err (!%p8997_p6)
}
 0xe34   :  { %7180 = dma.vmem_to_hbm [thread:$0]  %s7178_s28, 128, %s10160_s13, [#allocation14]  }
 0xe35   :  { %9029 = dma.done.wait [#allocation14], 128  }
 0xe36   :  { %9030 = vsyncadd [#allocation14], 4294967168 }
 0xe37   :  { %7184 = vsyncpa [#allocation14], 1 }
 0xe38   :  { %7185 = vsyncmov [#allocation12] }
 0xe3b   :  { %s7186_s23 = vpop.sfrf %7185 }
 0xe3c   :  { %p8064_p7 = scmp.ne.s32.totalorder %s7186_s23, 0 }
 0xe3e   :  { %7190 = shalt.err (%p8064_p7)  }
 0xe3f   :  { %7192 = vsyncmov [#allocation12 + $0x1] }
 0xe42   :  { %s7193_s14 = vpop.sfrf %7192 }
 0xe43   :  { %p8065_p8 = scmp.ne.s32.totalorder %s7193_s14, 0 }
 0xe45   :  { %7197 = shalt.err (%p8065_p8)  }
 0xe46   :  { %7199 = vsyncmov [#allocation12 + $0x2] }
 0xe49   :  { %s7200_s0 = vpop.sfrf %7199 }
 0xe4a   :  { %p8066_p9 = scmp.ne.s32.totalorder %s7200_s0, 0 }
 0xe4c   :  { %7204 = shalt.err (%p8066_p9)  }
 0xe4d   :  { %7206 = vsyncmov [#allocation12 + $0x3] }
 0xe50   :  { %s7207_s12 = vpop.sfrf %7206 }
 0xe51   :  { %p8067_p10 = scmp.ne.s32.totalorder %s7207_s12, 0 }
 0xe53   :  { %7211 = shalt.err (%p8067_p10)  }
 0xe54   :  { %7213 = vsyncmov [#allocation12 + $0x4] }
 0xe57   :  { %s7214_s13 = vpop.sfrf %7213 }
 0xe58   :  { %p8068_p11 = scmp.ne.s32.totalorder %s7214_s13, 0 }
 0xe5a   :  { %7218 = shalt.err (%p8068_p11)  }
 0xe5b   :  { %7220 = vsyncmov [#allocation12 + $0x5] }
 0xe5e   :  { %s7221_s4 = vpop.sfrf %7220 }
 0xe5f   :  { %p8069_p12 = scmp.ne.s32.totalorder %s7221_s4, 0 }
 0xe61   :  { %7225 = shalt.err (%p8069_p12)  }
 0xe62   :  { %7227 = vsyncmov [#allocation12 + $0x6] }
 0xe65   :  { %s7228_s11 = vpop.sfrf %7227 }
 0xe66   :  { %p8070_p13 = scmp.ne.s32.totalorder %s7228_s11, 0 }
 0xe68   :  { %7232 = shalt.err (%p8070_p13)  }
 0xe69   :  { %7234 = vsyncmov [#allocation12 + $0x7] }
 0xe6c   :  { %s7235_s15 = vpop.sfrf %7234 }
 0xe6d   :  { %p8071_p0 = scmp.ne.s32.totalorder %s7235_s15, 0 }
 0xe6f   :  { %7239 = shalt.err (%p8071_p0)  }
 0xe70   :  { %7241 = vsyncmov [#allocation12 + $0x8] }
 0xe73   :  { %s7242_s16 = vpop.sfrf %7241 }
 0xe74   :  { %p8072_p1 = scmp.ne.s32.totalorder %s7242_s16, 0 }
 0xe76   :  { %7246 = shalt.err (%p8072_p1)  }
 0xe77   :  { %7248 = vsyncmov [#allocation12 + $0x9] }
 0xe7a   :  { %s7249_s17 = vpop.sfrf %7248 }
 0xe7b   :  { %p8073_p2 = scmp.ne.s32.totalorder %s7249_s17, 0 }
 0xe7d   :  { %7253 = shalt.err (%p8073_p2)  }

</bundles_post_ra>
